<compile_context>
chip_gen: v7x
topology: tpu7x:2x2x1
jax: 0.10.0
libtpu: 0.0.40
codegen_flags: <defaults>
</compile_context>

<pallas_src>
import functools

import jax
import jax.numpy as jnp
from jax.experimental import pallas as pl
from jax.experimental.pallas import tpu as pltpu

H = 64                      # hidden_channels (2*H + 8 = 136 = edge_mlp input width)
NEG_SLOPE = 0.01            # F.leaky_relu default
TE = 256                    # edge-MLP row tile (per perf review: 256-512)
NODE_PAD = 128              # node counts padded to a lane-aligned multiple
VMEM_LIMIT = 48 * 1024 * 1024
MXU_DTYPE = jnp.bfloat16    # matmul operand dtype; accumulation stays f32


def _round_up(x, m):
    return ((x + m - 1) // m) * m


# ----------------------------- Pallas kernels ------------------------------

def gnn3_kernel(mll_ref, mpl_ref, mlp_ref, mpp_ref, xl_ref, xp_ref,
                wl_ll_ref, wl_pl_ref, wr_l_ref, b_l_ref,
                wl_lp_ref, wl_pp_ref, wr_p_ref, b_p_ref,
                xl_out_ref, xp_out_ref):
    """All 3 HeteroConv(SAGEConv) layers fused; x and weights stay VMEM-resident."""
    mll, mpl, mlp_, mpp = mll_ref[...], mpl_ref[...], mlp_ref[...], mpp_ref[...]
    xl, xp = xl_ref[...], xp_ref[...]                 # bf16, feature-padded to H
    xl_sum = jnp.zeros(xl_out_ref.shape, jnp.float32)
    xp_sum = jnp.zeros(xp_out_ref.shape, jnp.float32)

    def dot32(a, b):
        return jnp.dot(a, b, preferred_element_type=jnp.float32)

    def lrelu(v):
        return jnp.where(v > 0, v, NEG_SLOPE * v)

    for l in range(3):                                # static unroll, 3 layers
        agg_ll = dot32(mll, xl).astype(MXU_DTYPE)     # mean over lig->lig neighbors
        agg_pl = dot32(mpl, xp).astype(MXU_DTYPE)     # mean over pro->lig neighbors
        agg_lp = dot32(mlp_, xl).astype(MXU_DTYPE)    # mean over lig->pro neighbors
        agg_pp = dot32(mpp, xp).astype(MXU_DTYPE)     # mean over pro->pro neighbors
        ol = lrelu(dot32(agg_ll, wl_ll_ref[l]) + dot32(agg_pl, wl_pl_ref[l])
                   + dot32(xl, wr_l_ref[l]) + b_l_ref[l])
        op = lrelu(dot32(agg_lp, wl_lp_ref[l]) + dot32(agg_pp, wl_pp_ref[l])
                   + dot32(xp, wr_p_ref[l]) + b_p_ref[l])
        xl_sum += ol
        xp_sum += op
        xl = ol.astype(MXU_DTYPE)
        xp = op.astype(MXU_DTYPE)

    xl_out_ref[...] = xl_sum                          # x1 + x2 + x3 (per node type)
    xp_out_ref[...] = xp_sum


def gnn3(prep):
    vm = pl.BlockSpec(memory_space=pltpu.MemorySpace.VMEM)
    nl = prep['xl0'].shape[0]
    np_ = prep['xp0'].shape[0]
    return pl.pallas_call(
        gnn3_kernel,
        out_shape=(jax.ShapeDtypeStruct((nl, H), jnp.float32),
                   jax.ShapeDtypeStruct((np_, H), jnp.float32)),
        in_specs=[vm] * 14,
        out_specs=(vm, vm),
        compiler_params=pltpu.CompilerParams(vmem_limit_bytes=VMEM_LIMIT),
    )(prep['m_ll'], prep['m_pl'], prep['m_lp'], prep['m_pp'],
      prep['xl0'], prep['xp0'],
      prep['wl_ll'], prep['wl_pl'], prep['wr_l'], prep['b_l'],
      prep['wl_lp'], prep['wl_pp'], prep['wr_p'], prep['b_p'])


def edge_mlp_kernel(xls_ref, xpd_ref, ea_ref,
                    w1l_ref, w1p_ref, wef_ref, b1_ref,
                    w2_ref, b2_ref, w3_ref, b3_ref, wm_ref, bm_ref, o_ref):
    """Fused edge_lin (pre-folded) + edge_mlp + lin_mpl/tanh gate, one edge tile."""
    # First MLP layer with split weights: avoids materializing [TE, 136] anywhere.
    h = (jnp.dot(xls_ref[...], w1l_ref[...], preferred_element_type=jnp.float32)
         + jnp.dot(xpd_ref[...], w1p_ref[...], preferred_element_type=jnp.float32)
         + ea_ref[...] * wef_ref[...]            # folded edge_lin contribution
         + b1_ref[...])
    h = jnp.maximum(h, 0.0).astype(MXU_DTYPE)
    h = jnp.dot(h, w2_ref[...], preferred_element_type=jnp.float32) + b2_ref[...]
    h = jnp.maximum(h, 0.0).astype(MXU_DTYPE)
    m = jnp.dot(h, w3_ref[...], preferred_element_type=jnp.float32) + b3_ref[...]
    g = jnp.tanh(jnp.dot(m.astype(MXU_DTYPE), wm_ref[...],
                         preferred_element_type=jnp.float32) + bm_ref[...])
    # Single lane-denser output slab: [:, :16] = m_pl, [:, 16:] = m_w.
    o_ref[:, 0:16] = m
    o_ref[:, 16:32] = g * m


def edge_pipeline(xls, xpd, ea, prep):
    e_pad = xls.shape[0]
    grid = (e_pad // TE,)

    def full(a):
        return pl.BlockSpec(a.shape, lambda i: (0,) * a.ndim)

    weights = (prep['w1l'], prep['w1p'], prep['wef'], prep['b1'],
               prep['w2'], prep['b2'], prep['w3'], prep['b3'],
               prep['wm'], prep['bm'])
    return pl.pallas_call(
        edge_mlp_kernel,
        out_shape=jax.ShapeDtypeStruct((e_pad, 32), jnp.float32),
        grid=grid,
        in_specs=[pl.BlockSpec((TE, H), lambda i: (i, 0)),
                  pl.BlockSpec((TE, H), lambda i: (i, 0)),
                  pl.BlockSpec((TE, 1), lambda i: (i, 0))]
                 + [full(w) for w in weights],
        out_specs=pl.BlockSpec((TE, 32), lambda i: (i, 0)),
        compiler_params=pltpu.CompilerParams(
            dimension_semantics=("parallel",),       # shards over v7x's 2 TCs
            vmem_limit_bytes=VMEM_LIMIT),
    )(xls, xpd, ea, *weights)


def pool_kernel(eb_ref, mv_ref, o_ref, *, num_graphs):
    """scatter_sum(m_w) / scatter_max(m_pl) per graph via masked sublane reductions."""
    eb = eb_ref[...]                     # [E_pad, 1] int32; padded edges == num_graphs
    mv = mv_ref[...]                     # [E_pad, 32] f32 = [m_pl | m_w]
    m_pl = mv[:, 0:16]
    m_w = mv[:, 16:32]
    for b in range(num_graphs):          # static unroll; num_graphs is small
        mask = eb == b
        o_ref[b:b + 1, 0:16] = jnp.sum(jnp.where(mask, m_w, 0.0),
                                       axis=0, keepdims=True)
        # NOTE: a graph with zero 'lig->pro' edges yields -inf here (matches the
        # reference; PyG scatter_max would leave its fill value instead).
        o_ref[b:b + 1, 16:32] = jnp.max(jnp.where(mask, m_pl, -jnp.inf),
                                        axis=0, keepdims=True)


def pool(edge_batch, m_all, num_graphs):
    vm = pl.BlockSpec(memory_space=pltpu.MemorySpace.VMEM)
    return pl.pallas_call(
        functools.partial(pool_kernel, num_graphs=num_graphs),
        out_shape=jax.ShapeDtypeStruct((num_graphs, 32), jnp.float32),
        in_specs=[vm, vm],
        out_specs=vm,
    )(edge_batch, m_all)


# ------------------------------- glue / model ------------------------------

def prepare_inputs(params, x_lig, x_pro, edge_index):
    """Padded / bf16-cast operands shared by the kernels AND the reference."""
    n_lig, f_lig = x_lig.shape
    n_pro, f_pro = x_pro.shape
    assert f_lig <= H and f_pro <= H
    nl = _round_up(n_lig, NODE_PAD)
    np_ = _round_up(n_pro, NODE_PAD)

    def mean_mat(src, dst, n_src_pad, n_dst_pad):
        cnt = jnp.zeros((n_dst_pad, n_src_pad), jnp.float32).at[dst, src].add(1.0)
        deg = cnt.sum(axis=1, keepdims=True)
        return (cnt / jnp.maximum(deg, 1.0)).astype(MXU_DTYPE)

    def pad_feat(x, rows):
        return (jnp.zeros((rows, H), jnp.float32)
                .at[:x.shape[0], :x.shape[1]].set(x).astype(MXU_DTYPE))

    def pad_rows(w):
        return jnp.zeros((H, w.shape[1]), jnp.float32).at[:w.shape[0]].set(w)

    L = params['layers']
    wl_ll = jnp.stack([pad_rows(L[0]['ll']['wl']), L[1]['ll']['wl'], L[2]['ll']['wl']])
    wl_pl = jnp.stack([pad_rows(L[0]['pl']['wl']), L[1]['pl']['wl'], L[2]['pl']['wl']])
    wr_l = jnp.stack([pad_rows(L[0]['ll']['wr'] + L[0]['pl']['wr']),
                      L[1]['ll']['wr'] + L[1]['pl']['wr'],
                      L[2]['ll']['wr'] + L[2]['pl']['wr']])
    b_l = jnp.stack([L[i]['ll']['b'] + L[i]['pl']['b'] for i in range(3)])
    wl_lp = jnp.stack([pad_rows(L[0]['lp']['wl']), L[1]['lp']['wl'], L[2]['lp']['wl']])
    wl_pp = jnp.stack([pad_rows(L[0]['pp']['wl']), L[1]['pp']['wl'], L[2]['pp']['wl']])
    wr_p = jnp.stack([pad_rows(L[0]['lp']['wr'] + L[0]['pp']['wr']),
                      L[1]['lp']['wr'] + L[1]['pp']['wr'],
                      L[2]['lp']['wr'] + L[2]['pp']['wr']])
    b_p = jnp.stack([L[i]['lp']['b'] + L[i]['pp']['b'] for i in range(3)])

    # edge_lin followed by the (linear) first MLP matmul folds algebraically:
    #   (ea @ We + be) @ W1e == ea @ (We @ W1e) + be @ W1e
    w1 = params['mlp'][0]['w']                       # [2H+8, 512]
    w1e = w1[2 * H:]                                 # [8, 512]
    wef = params['edge_lin']['w'] @ w1e              # [1, 512]  f32
    b1 = params['mlp'][0]['b'] + params['edge_lin']['b'] @ w1e   # [1, 512] f32

    return {
        'm_ll': mean_mat(*edge_index['ll'], nl, nl),
        'm_pl': mean_mat(*edge_index['pl'], np_, nl),
        'm_lp': mean_mat(*edge_index['lp'], nl, np_),
        'm_pp': mean_mat(*edge_index['pp'], np_, np_),
        'xl0': pad_feat(x_lig, nl),
        'xp0': pad_feat(x_pro, np_),
        'wl_ll': wl_ll.astype(MXU_DTYPE), 'wl_pl': wl_pl.astype(MXU_DTYPE),
        'wr_l': wr_l.astype(MXU_DTYPE), 'b_l': b_l,
        'wl_lp': wl_lp.astype(MXU_DTYPE), 'wl_pp': wl_pp.astype(MXU_DTYPE),
        'wr_p': wr_p.astype(MXU_DTYPE), 'b_p': b_p,
        'w1l': w1[:H].astype(MXU_DTYPE), 'w1p': w1[H:2 * H].astype(MXU_DTYPE),
        'wef': wef, 'b1': b1,
        'w2': params['mlp'][1]['w'].astype(MXU_DTYPE), 'b2': params['mlp'][1]['b'],
        'w3': params['mlp'][2]['w'].astype(MXU_DTYPE), 'b3': params['mlp'][2]['b'],
        'wm': params['lin_mpl']['w'].astype(MXU_DTYPE), 'bm': params['lin_mpl']['b'],
    }


def init_params(key, f_lig, f_pro):
    ks = iter(jax.random.split(key, 64))

    def w(shape, scale=0.1):
        return (scale * jax.random.normal(next(ks), shape)).astype(jnp.float32)

    def sage_et(f_src, f_dst):
        return {'wl': w((f_src, H)), 'wr': w((f_dst, H)), 'b': w((1, H))}

    layers = []
    for fl, fp in [(f_lig, f_pro), (H, H), (H, H)]:
        layers.append({'ll': sage_et(fl, fl), 'lp': sage_et(fl, fp),
                       'pl': sage_et(fp, fl), 'pp': sage_et(fp, fp)})
    return {
        'layers': layers,
        'edge_lin': {'w': w((1, 8)), 'b': w((1, 8))},
        'mlp': [{'w': w((2 * H + 8, 512)), 'b': w((1, 512))},
                {'w': w((512, 64)), 'b': w((1, 64))},
                {'w': w((64, 16)), 'b': w((1, 16))}],
        'lin_mpl': {'w': w((16, 16)), 'b': w((1, 16))},
    }


def hetero_gnn_forward(params, x_lig, x_pro, edge_index, edge_attr_lp,
                       batch_lig, num_graphs):
    prep = prepare_inputs(params, x_lig, x_pro, edge_index)
    xl_nodes, xp_nodes = gnn3(prep)                  # f32, padded node rows

    src, dst = edge_index['lp']
    e = src.shape[0]
    e_pad = _round_up(e, TE)
    pad = e_pad - e
    src_p = jnp.concatenate([src, jnp.zeros((pad,), src.dtype)])
    dst_p = jnp.concatenate([dst, jnp.zeros((pad,), dst.dtype)])
    ea_p = jnp.concatenate(
        [edge_attr_lp, jnp.zeros((pad, edge_attr_lp.shape[1]), edge_attr_lp.dtype)])
    # Padded edges get batch id == num_graphs -> excluded from both pools.
    eb_p = jnp.concatenate([batch_lig[src],
                            jnp.full((pad,), num_graphs, batch_lig.dtype)])[:, None]

    xls = xl_nodes[src_p].astype(MXU_DTYPE)          # [E_pad, 64]
    xpd = xp_nodes[dst_p].astype(MXU_DTYPE)          # [E_pad, 64]

    m_all = edge_pipeline(xls, xpd, ea_p, prep)      # [E_pad, 32] = [m_pl | m_w]
    return pool(eb_p, m_all, num_graphs)             # [num_graphs, 32] = [sum | max]


# Pure-JAX reference (same bf16 operand quantization as the kernels).
def ref_forward(params, x_lig, x_pro, edge_index, edge_attr_lp,
                batch_lig, num_graphs):
    prep = prepare_inputs(params, x_lig, x_pro, edge_index)
    dot32 = lambda a, b: jnp.dot(a, b, preferred_element_type=jnp.float32)
    lrelu = lambda v: jnp.where(v > 0, v, NEG_SLOPE * v)

    xl, xp = prep['xl0'], prep['xp0']
    xl_sum = jnp.zeros((xl.shape[0], H), jnp.float32)
    xp_sum = jnp.zeros((xp.shape[0], H), jnp.float32)
    for l in range(3):
        agg_ll = dot32(prep['m_ll'], xl).astype(MXU_DTYPE)
        agg_pl = dot32(prep['m_pl'], xp).astype(MXU_DTYPE)
        agg_lp = dot32(prep['m_lp'], xl).astype(MXU_DTYPE)
        agg_pp = dot32(prep['m_pp'], xp).astype(MXU_DTYPE)
        ol = lrelu(dot32(agg_ll, prep['wl_ll'][l]) + dot32(agg_pl, prep['wl_pl'][l])
                   + dot32(xl, prep['wr_l'][l]) + prep['b_l'][l])
        op = lrelu(dot32(agg_lp, prep['wl_lp'][l]) + dot32(agg_pp, prep['wl_pp'][l])
                   + dot32(xp, prep['wr_p'][l]) + prep['b_p'][l])
        xl_sum += ol
        xp_sum += op
        xl = ol.astype(MXU_DTYPE)
        xp = op.astype(MXU_DTYPE)

    src, dst = edge_index['lp']
    xls = xl_sum[src].astype(MXU_DTYPE)
    xpd = xp_sum[dst].astype(MXU_DTYPE)
    h = (dot32(xls, prep['w1l']) + dot32(xpd, prep['w1p'])
         + edge_attr_lp * prep['wef'] + prep['b1'])
    h = jnp.maximum(h, 0.0).astype(MXU_DTYPE)
    h = jnp.maximum(dot32(h, prep['w2']) + prep['b2'], 0.0).astype(MXU_DTYPE)
    m = dot32(h, prep['w3']) + prep['b3']
    g = jnp.tanh(dot32(m.astype(MXU_DTYPE), prep['wm']) + prep['bm'])
    mw = g * m

    eb = batch_lig[src]
    rows_sum, rows_max = [], []
    for b in range(num_graphs):
        mask = (eb == b)[:, None]
        rows_sum.append(jnp.sum(jnp.where(mask, mw, 0.0), axis=0))
        rows_max.append(jnp.max(jnp.where(mask, m, -jnp.inf), axis=0))
    return jnp.concatenate([jnp.stack(rows_sum), jnp.stack(rows_max)], axis=-1)


if __name__ == "__main__":
    key = jax.random.PRNGKey(0)
    k = iter(jax.random.split(key, 32))

    N_LIG, N_PRO = 16, 24        # node counts
    F_LIG, F_PRO = 16, 32        # input feature dims (SAGEConv([-1,-1]) lazy)
    B = 2                        # graphs in the batch
    E_LL, E_LP, E_PL, E_PP = 48, 64, 48, 64

    x_lig = jax.random.normal(next(k), (N_LIG, F_LIG), jnp.float32)
    x_pro = jax.random.normal(next(k), (N_PRO, F_PRO), jnp.float32)

    def rand_edges(ks, kd, e, n_src, n_dst):
        return (jax.random.randint(ks, (e,), 0, n_src),
                jax.random.randint(kd, (e,), 0, n_dst))

    src_lp = jax.random.randint(next(k), (E_LP,), 0, N_LIG)
    src_lp = src_lp.at[0].set(0).at[1].set(N_LIG - 1)   # both graphs get edges
    dst_lp = jax.random.randint(next(k), (E_LP,), 0, N_PRO)

    edge_index = {
        'll': rand_edges(next(k), next(k), E_LL, N_LIG, N_LIG),
        'lp': (src_lp, dst_lp),
        'pl': rand_edges(next(k), next(k), E_PL, N_PRO, N_LIG),
        'pp': rand_edges(next(k), next(k), E_PP, N_PRO, N_PRO),
    }
    edge_attr_lp = jax.random.uniform(next(k), (E_LP, 1), jnp.float32, 1.0, 10.0)
    batch_lig = (jnp.arange(N_LIG) >= N_LIG // 2).astype(jnp.int32)

    params = init_params(next(k), F_LIG, F_PRO)

    out = jax.block_until_ready(
        hetero_gnn_forward(params, x_lig, x_pro, edge_index, edge_attr_lp,
                           batch_lig, B))
    ref = ref_forward(params, x_lig, x_pro, edge_index, edge_attr_lp,
                      batch_lig, B)

    assert out.shape == (B, 32), out.shape
    assert jnp.allclose(out, ref, atol=2e-2, rtol=2e-2), \
        float(jnp.max(jnp.abs(out - ref)))
    print("KERNEL_OK")
</pallas_src>

<mosaic_0001>
module attributes {stable_mosaic.version = 11 : i64} {
  func.func @gnn3_kernel(%arg0: memref<128x128xbf16, #tpu.memory_space<vmem>>, %arg1: memref<128x128xbf16, #tpu.memory_space<vmem>>, %arg2: memref<128x128xbf16, #tpu.memory_space<vmem>>, %arg3: memref<128x128xbf16, #tpu.memory_space<vmem>>, %arg4: memref<128x64xbf16, #tpu.memory_space<vmem>>, %arg5: memref<128x64xbf16, #tpu.memory_space<vmem>>, %arg6: memref<3x64x64xbf16, #tpu.memory_space<vmem>>, %arg7: memref<3x64x64xbf16, #tpu.memory_space<vmem>>, %arg8: memref<3x64x64xbf16, #tpu.memory_space<vmem>>, %arg9: memref<3x1x64xf32, #tpu.memory_space<vmem>>, %arg10: memref<3x64x64xbf16, #tpu.memory_space<vmem>>, %arg11: memref<3x64x64xbf16, #tpu.memory_space<vmem>>, %arg12: memref<3x64x64xbf16, #tpu.memory_space<vmem>>, %arg13: memref<3x1x64xf32, #tpu.memory_space<vmem>>, %arg14: memref<128x64xf32, #tpu.memory_space<vmem>>, %arg15: memref<128x64xf32, #tpu.memory_space<vmem>>) attributes {dimension_semantics = [], scalar_prefetch = 0 : i64, scratch_operands = 0 : i64, tpu.core_type = #tpu.core_type<tc>} {
    %c0 = arith.constant 0 : index
    %c0_0 = arith.constant 0 : index
    %0 = vector.load %arg0[%c0, %c0_0] : memref<128x128xbf16, #tpu.memory_space<vmem>>, vector<128x128xbf16>
    %c0_1 = arith.constant 0 : index
    %c0_2 = arith.constant 0 : index
    %1 = vector.load %arg1[%c0_1, %c0_2] : memref<128x128xbf16, #tpu.memory_space<vmem>>, vector<128x128xbf16>
    %c0_3 = arith.constant 0 : index
    %c0_4 = arith.constant 0 : index
    %2 = vector.load %arg2[%c0_3, %c0_4] : memref<128x128xbf16, #tpu.memory_space<vmem>>, vector<128x128xbf16>
    %c0_5 = arith.constant 0 : index
    %c0_6 = arith.constant 0 : index
    %3 = vector.load %arg3[%c0_5, %c0_6] : memref<128x128xbf16, #tpu.memory_space<vmem>>, vector<128x128xbf16>
    %c0_7 = arith.constant 0 : index
    %c0_8 = arith.constant 0 : index
    %4 = vector.load %arg4[%c0_7, %c0_8] : memref<128x64xbf16, #tpu.memory_space<vmem>>, vector<128x64xbf16>
    %c0_9 = arith.constant 0 : index
    %c0_10 = arith.constant 0 : index
    %5 = vector.load %arg5[%c0_9, %c0_10] : memref<128x64xbf16, #tpu.memory_space<vmem>>, vector<128x64xbf16>
    %cst = arith.constant 0.000000e+00 : f32
    %6 = vector.broadcast %cst : f32 to vector<128x64xf32>
    %cst_11 = arith.constant 0.000000e+00 : f32
    %7 = vector.broadcast %cst_11 : f32 to vector<128x64xf32>
    %cst_12 = arith.constant dense<0.000000e+00> : vector<128x64xf32>
    %8 = tpu.matmul %0, %4, %cst_12 {dimension_numbers = #tpu.dot_dimension_numbers<[1], [0], [0], [1], [0, 0, 1, 1], [], []>} : vector<128x128xbf16>, vector<128x64xbf16>, vector<128x64xf32> -> vector<128x64xf32>
    %9 = arith.truncf %8 : vector<128x64xf32> to vector<128x64xbf16>
    %cst_13 = arith.constant dense<0.000000e+00> : vector<128x64xf32>
    %10 = tpu.matmul %1, %5, %cst_13 {dimension_numbers = #tpu.dot_dimension_numbers<[1], [0], [0], [1], [0, 0, 1, 1], [], []>} : vector<128x128xbf16>, vector<128x64xbf16>, vector<128x64xf32> -> vector<128x64xf32>
    %11 = arith.truncf %10 : vector<128x64xf32> to vector<128x64xbf16>
    %cst_14 = arith.constant dense<0.000000e+00> : vector<128x64xf32>
    %12 = tpu.matmul %2, %4, %cst_14 {dimension_numbers = #tpu.dot_dimension_numbers<[1], [0], [0], [1], [0, 0, 1, 1], [], []>} : vector<128x128xbf16>, vector<128x64xbf16>, vector<128x64xf32> -> vector<128x64xf32>
    %13 = arith.truncf %12 : vector<128x64xf32> to vector<128x64xbf16>
    %cst_15 = arith.constant dense<0.000000e+00> : vector<128x64xf32>
    %14 = tpu.matmul %3, %5, %cst_15 {dimension_numbers = #tpu.dot_dimension_numbers<[1], [0], [0], [1], [0, 0, 1, 1], [], []>} : vector<128x128xbf16>, vector<128x64xbf16>, vector<128x64xf32> -> vector<128x64xf32>
    %15 = arith.truncf %14 : vector<128x64xf32> to vector<128x64xbf16>
    %c0_16 = arith.constant 0 : index
    %c0_17 = arith.constant 0 : index
    %c0_18 = arith.constant 0 : index
    %16 = vector.load %arg6[%c0_16, %c0_17, %c0_18] : memref<3x64x64xbf16, #tpu.memory_space<vmem>>, vector<1x64x64xbf16>
    %17 = vector.shape_cast %16 : vector<1x64x64xbf16> to vector<64x64xbf16>
    %cst_19 = arith.constant dense<0.000000e+00> : vector<128x64xf32>
    %18 = tpu.matmul %9, %17, %cst_19 {dimension_numbers = #tpu.dot_dimension_numbers<[1], [0], [0], [1], [0, 0, 1, 1], [], []>} : vector<128x64xbf16>, vector<64x64xbf16>, vector<128x64xf32> -> vector<128x64xf32>
    %c0_20 = arith.constant 0 : index
    %c0_21 = arith.constant 0 : index
    %c0_22 = arith.constant 0 : index
    %19 = vector.load %arg7[%c0_20, %c0_21, %c0_22] : memref<3x64x64xbf16, #tpu.memory_space<vmem>>, vector<1x64x64xbf16>
    %20 = vector.shape_cast %19 : vector<1x64x64xbf16> to vector<64x64xbf16>
    %cst_23 = arith.constant dense<0.000000e+00> : vector<128x64xf32>
    %21 = tpu.matmul %11, %20, %cst_23 {dimension_numbers = #tpu.dot_dimension_numbers<[1], [0], [0], [1], [0, 0, 1, 1], [], []>} : vector<128x64xbf16>, vector<64x64xbf16>, vector<128x64xf32> -> vector<128x64xf32>
    %22 = arith.addf %18, %21 : vector<128x64xf32>
    %c0_24 = arith.constant 0 : index
    %c0_25 = arith.constant 0 : index
    %c0_26 = arith.constant 0 : index
    %23 = vector.load %arg8[%c0_24, %c0_25, %c0_26] : memref<3x64x64xbf16, #tpu.memory_space<vmem>>, vector<1x64x64xbf16>
    %24 = vector.shape_cast %23 : vector<1x64x64xbf16> to vector<64x64xbf16>
    %cst_27 = arith.constant dense<0.000000e+00> : vector<128x64xf32>
    %25 = tpu.matmul %4, %24, %cst_27 {dimension_numbers = #tpu.dot_dimension_numbers<[1], [0], [0], [1], [0, 0, 1, 1], [], []>} : vector<128x64xbf16>, vector<64x64xbf16>, vector<128x64xf32> -> vector<128x64xf32>
    %26 = arith.addf %22, %25 : vector<128x64xf32>
    %c0_28 = arith.constant 0 : index
    %c0_29 = arith.constant 0 : index
    %c0_30 = arith.constant 0 : index
    %27 = vector.load %arg9[%c0_28, %c0_29, %c0_30] : memref<3x1x64xf32, #tpu.memory_space<vmem>>, vector<1x1x64xf32>
    %28 = vector.shape_cast %27 : vector<1x1x64xf32> to vector<1x64xf32>
    %29 = vector.broadcast %28 : vector<1x64xf32> to vector<128x64xf32>
    %30 = arith.addf %26, %29 : vector<128x64xf32>
    %cst_31 = arith.constant 0.000000e+00 : f32
    %31 = vector.broadcast %cst_31 : f32 to vector<128x64xf32>
    %32 = arith.cmpf ogt, %30, %31 : vector<128x64xf32>
    %cst_32 = arith.constant 0.00999999977 : f32
    %33 = vector.broadcast %cst_32 : f32 to vector<128x64xf32>
    %34 = arith.mulf %33, %30 : vector<128x64xf32>
    %35 = arith.select %32, %30, %34 : vector<128x64xi1>, vector<128x64xf32>
    %c0_33 = arith.constant 0 : index
    %c0_34 = arith.constant 0 : index
    %c0_35 = arith.constant 0 : index
    %36 = vector.load %arg10[%c0_33, %c0_34, %c0_35] : memref<3x64x64xbf16, #tpu.memory_space<vmem>>, vector<1x64x64xbf16>
    %37 = vector.shape_cast %36 : vector<1x64x64xbf16> to vector<64x64xbf16>
    %cst_36 = arith.constant dense<0.000000e+00> : vector<128x64xf32>
    %38 = tpu.matmul %13, %37, %cst_36 {dimension_numbers = #tpu.dot_dimension_numbers<[1], [0], [0], [1], [0, 0, 1, 1], [], []>} : vector<128x64xbf16>, vector<64x64xbf16>, vector<128x64xf32> -> vector<128x64xf32>
    %c0_37 = arith.constant 0 : index
    %c0_38 = arith.constant 0 : index
    %c0_39 = arith.constant 0 : index
    %39 = vector.load %arg11[%c0_37, %c0_38, %c0_39] : memref<3x64x64xbf16, #tpu.memory_space<vmem>>, vector<1x64x64xbf16>
    %40 = vector.shape_cast %39 : vector<1x64x64xbf16> to vector<64x64xbf16>
    %cst_40 = arith.constant dense<0.000000e+00> : vector<128x64xf32>
    %41 = tpu.matmul %15, %40, %cst_40 {dimension_numbers = #tpu.dot_dimension_numbers<[1], [0], [0], [1], [0, 0, 1, 1], [], []>} : vector<128x64xbf16>, vector<64x64xbf16>, vector<128x64xf32> -> vector<128x64xf32>
    %42 = arith.addf %38, %41 : vector<128x64xf32>
    %c0_41 = arith.constant 0 : index
    %c0_42 = arith.constant 0 : index
    %c0_43 = arith.constant 0 : index
    %43 = vector.load %arg12[%c0_41, %c0_42, %c0_43] : memref<3x64x64xbf16, #tpu.memory_space<vmem>>, vector<1x64x64xbf16>
    %44 = vector.shape_cast %43 : vector<1x64x64xbf16> to vector<64x64xbf16>
    %cst_44 = arith.constant dense<0.000000e+00> : vector<128x64xf32>
    %45 = tpu.matmul %5, %44, %cst_44 {dimension_numbers = #tpu.dot_dimension_numbers<[1], [0], [0], [1], [0, 0, 1, 1], [], []>} : vector<128x64xbf16>, vector<64x64xbf16>, vector<128x64xf32> -> vector<128x64xf32>
    %46 = arith.addf %42, %45 : vector<128x64xf32>
    %c0_45 = arith.constant 0 : index
    %c0_46 = arith.constant 0 : index
    %c0_47 = arith.constant 0 : index
    %47 = vector.load %arg13[%c0_45, %c0_46, %c0_47] : memref<3x1x64xf32, #tpu.memory_space<vmem>>, vector<1x1x64xf32>
    %48 = vector.shape_cast %47 : vector<1x1x64xf32> to vector<1x64xf32>
    %49 = vector.broadcast %48 : vector<1x64xf32> to vector<128x64xf32>
    %50 = arith.addf %46, %49 : vector<128x64xf32>
    %cst_48 = arith.constant 0.000000e+00 : f32
    %51 = vector.broadcast %cst_48 : f32 to vector<128x64xf32>
    %52 = arith.cmpf ogt, %50, %51 : vector<128x64xf32>
    %cst_49 = arith.constant 0.00999999977 : f32
    %53 = vector.broadcast %cst_49 : f32 to vector<128x64xf32>
    %54 = arith.mulf %53, %50 : vector<128x64xf32>
    %55 = arith.select %52, %50, %54 : vector<128x64xi1>, vector<128x64xf32>
    %56 = arith.addf %6, %35 : vector<128x64xf32>
    %57 = arith.addf %7, %55 : vector<128x64xf32>
    %58 = arith.truncf %35 : vector<128x64xf32> to vector<128x64xbf16>
    %59 = arith.truncf %55 : vector<128x64xf32> to vector<128x64xbf16>
    %cst_50 = arith.constant dense<0.000000e+00> : vector<128x64xf32>
    %60 = tpu.matmul %0, %58, %cst_50 {dimension_numbers = #tpu.dot_dimension_numbers<[1], [0], [0], [1], [0, 0, 1, 1], [], []>} : vector<128x128xbf16>, vector<128x64xbf16>, vector<128x64xf32> -> vector<128x64xf32>
    %61 = arith.truncf %60 : vector<128x64xf32> to vector<128x64xbf16>
    %cst_51 = arith.constant dense<0.000000e+00> : vector<128x64xf32>
    %62 = tpu.matmul %1, %59, %cst_51 {dimension_numbers = #tpu.dot_dimension_numbers<[1], [0], [0], [1], [0, 0, 1, 1], [], []>} : vector<128x128xbf16>, vector<128x64xbf16>, vector<128x64xf32> -> vector<128x64xf32>
    %63 = arith.truncf %62 : vector<128x64xf32> to vector<128x64xbf16>
    %cst_52 = arith.constant dense<0.000000e+00> : vector<128x64xf32>
    %64 = tpu.matmul %2, %58, %cst_52 {dimension_numbers = #tpu.dot_dimension_numbers<[1], [0], [0], [1], [0, 0, 1, 1], [], []>} : vector<128x128xbf16>, vector<128x64xbf16>, vector<128x64xf32> -> vector<128x64xf32>
    %65 = arith.truncf %64 : vector<128x64xf32> to vector<128x64xbf16>
    %cst_53 = arith.constant dense<0.000000e+00> : vector<128x64xf32>
    %66 = tpu.matmul %3, %59, %cst_53 {dimension_numbers = #tpu.dot_dimension_numbers<[1], [0], [0], [1], [0, 0, 1, 1], [], []>} : vector<128x128xbf16>, vector<128x64xbf16>, vector<128x64xf32> -> vector<128x64xf32>
    %67 = arith.truncf %66 : vector<128x64xf32> to vector<128x64xbf16>
    %c1 = arith.constant 1 : index
    %c0_54 = arith.constant 0 : index
    %c0_55 = arith.constant 0 : index
    %68 = vector.load %arg6[%c1, %c0_54, %c0_55] : memref<3x64x64xbf16, #tpu.memory_space<vmem>>, vector<1x64x64xbf16>
    %69 = vector.shape_cast %68 : vector<1x64x64xbf16> to vector<64x64xbf16>
    %cst_56 = arith.constant dense<0.000000e+00> : vector<128x64xf32>
    %70 = tpu.matmul %61, %69, %cst_56 {dimension_numbers = #tpu.dot_dimension_numbers<[1], [0], [0], [1], [0, 0, 1, 1], [], []>} : vector<128x64xbf16>, vector<64x64xbf16>, vector<128x64xf32> -> vector<128x64xf32>
    %c1_57 = arith.constant 1 : index
    %c0_58 = arith.constant 0 : index
    %c0_59 = arith.constant 0 : index
    %71 = vector.load %arg7[%c1_57, %c0_58, %c0_59] : memref<3x64x64xbf16, #tpu.memory_space<vmem>>, vector<1x64x64xbf16>
    %72 = vector.shape_cast %71 : vector<1x64x64xbf16> to vector<64x64xbf16>
    %cst_60 = arith.constant dense<0.000000e+00> : vector<128x64xf32>
    %73 = tpu.matmul %63, %72, %cst_60 {dimension_numbers = #tpu.dot_dimension_numbers<[1], [0], [0], [1], [0, 0, 1, 1], [], []>} : vector<128x64xbf16>, vector<64x64xbf16>, vector<128x64xf32> -> vector<128x64xf32>
    %74 = arith.addf %70, %73 : vector<128x64xf32>
    %c1_61 = arith.constant 1 : index
    %c0_62 = arith.constant 0 : index
    %c0_63 = arith.constant 0 : index
    %75 = vector.load %arg8[%c1_61, %c0_62, %c0_63] : memref<3x64x64xbf16, #tpu.memory_space<vmem>>, vector<1x64x64xbf16>
    %76 = vector.shape_cast %75 : vector<1x64x64xbf16> to vector<64x64xbf16>
    %cst_64 = arith.constant dense<0.000000e+00> : vector<128x64xf32>
    %77 = tpu.matmul %58, %76, %cst_64 {dimension_numbers = #tpu.dot_dimension_numbers<[1], [0], [0], [1], [0, 0, 1, 1], [], []>} : vector<128x64xbf16>, vector<64x64xbf16>, vector<128x64xf32> -> vector<128x64xf32>
    %78 = arith.addf %74, %77 : vector<128x64xf32>
    %c1_65 = arith.constant 1 : index
    %c0_66 = arith.constant 0 : index
    %c0_67 = arith.constant 0 : index
    %79 = vector.load %arg9[%c1_65, %c0_66, %c0_67] : memref<3x1x64xf32, #tpu.memory_space<vmem>>, vector<1x1x64xf32>
    %80 = vector.shape_cast %79 : vector<1x1x64xf32> to vector<1x64xf32>
    %81 = vector.broadcast %80 : vector<1x64xf32> to vector<128x64xf32>
    %82 = arith.addf %78, %81 : vector<128x64xf32>
    %cst_68 = arith.constant 0.000000e+00 : f32
    %83 = vector.broadcast %cst_68 : f32 to vector<128x64xf32>
    %84 = arith.cmpf ogt, %82, %83 : vector<128x64xf32>
    %cst_69 = arith.constant 0.00999999977 : f32
    %85 = vector.broadcast %cst_69 : f32 to vector<128x64xf32>
    %86 = arith.mulf %85, %82 : vector<128x64xf32>
    %87 = arith.select %84, %82, %86 : vector<128x64xi1>, vector<128x64xf32>
    %c1_70 = arith.constant 1 : index
    %c0_71 = arith.constant 0 : index
    %c0_72 = arith.constant 0 : index
    %88 = vector.load %arg10[%c1_70, %c0_71, %c0_72] : memref<3x64x64xbf16, #tpu.memory_space<vmem>>, vector<1x64x64xbf16>
    %89 = vector.shape_cast %88 : vector<1x64x64xbf16> to vector<64x64xbf16>
    %cst_73 = arith.constant dense<0.000000e+00> : vector<128x64xf32>
    %90 = tpu.matmul %65, %89, %cst_73 {dimension_numbers = #tpu.dot_dimension_numbers<[1], [0], [0], [1], [0, 0, 1, 1], [], []>} : vector<128x64xbf16>, vector<64x64xbf16>, vector<128x64xf32> -> vector<128x64xf32>
    %c1_74 = arith.constant 1 : index
    %c0_75 = arith.constant 0 : index
    %c0_76 = arith.constant 0 : index
    %91 = vector.load %arg11[%c1_74, %c0_75, %c0_76] : memref<3x64x64xbf16, #tpu.memory_space<vmem>>, vector<1x64x64xbf16>
    %92 = vector.shape_cast %91 : vector<1x64x64xbf16> to vector<64x64xbf16>
    %cst_77 = arith.constant dense<0.000000e+00> : vector<128x64xf32>
    %93 = tpu.matmul %67, %92, %cst_77 {dimension_numbers = #tpu.dot_dimension_numbers<[1], [0], [0], [1], [0, 0, 1, 1], [], []>} : vector<128x64xbf16>, vector<64x64xbf16>, vector<128x64xf32> -> vector<128x64xf32>
    %94 = arith.addf %90, %93 : vector<128x64xf32>
    %c1_78 = arith.constant 1 : index
    %c0_79 = arith.constant 0 : index
    %c0_80 = arith.constant 0 : index
    %95 = vector.load %arg12[%c1_78, %c0_79, %c0_80] : memref<3x64x64xbf16, #tpu.memory_space<vmem>>, vector<1x64x64xbf16>
    %96 = vector.shape_cast %95 : vector<1x64x64xbf16> to vector<64x64xbf16>
    %cst_81 = arith.constant dense<0.000000e+00> : vector<128x64xf32>
    %97 = tpu.matmul %59, %96, %cst_81 {dimension_numbers = #tpu.dot_dimension_numbers<[1], [0], [0], [1], [0, 0, 1, 1], [], []>} : vector<128x64xbf16>, vector<64x64xbf16>, vector<128x64xf32> -> vector<128x64xf32>
    %98 = arith.addf %94, %97 : vector<128x64xf32>
    %c1_82 = arith.constant 1 : index
    %c0_83 = arith.constant 0 : index
    %c0_84 = arith.constant 0 : index
    %99 = vector.load %arg13[%c1_82, %c0_83, %c0_84] : memref<3x1x64xf32, #tpu.memory_space<vmem>>, vector<1x1x64xf32>
    %100 = vector.shape_cast %99 : vector<1x1x64xf32> to vector<1x64xf32>
    %101 = vector.broadcast %100 : vector<1x64xf32> to vector<128x64xf32>
    %102 = arith.addf %98, %101 : vector<128x64xf32>
    %cst_85 = arith.constant 0.000000e+00 : f32
    %103 = vector.broadcast %cst_85 : f32 to vector<128x64xf32>
    %104 = arith.cmpf ogt, %102, %103 : vector<128x64xf32>
    %cst_86 = arith.constant 0.00999999977 : f32
    %105 = vector.broadcast %cst_86 : f32 to vector<128x64xf32>
    %106 = arith.mulf %105, %102 : vector<128x64xf32>
    %107 = arith.select %104, %102, %106 : vector<128x64xi1>, vector<128x64xf32>
    %108 = arith.addf %56, %87 : vector<128x64xf32>
    %109 = arith.addf %57, %107 : vector<128x64xf32>
    %110 = arith.truncf %87 : vector<128x64xf32> to vector<128x64xbf16>
    %111 = arith.truncf %107 : vector<128x64xf32> to vector<128x64xbf16>
    %cst_87 = arith.constant dense<0.000000e+00> : vector<128x64xf32>
    %112 = tpu.matmul %0, %110, %cst_87 {dimension_numbers = #tpu.dot_dimension_numbers<[1], [0], [0], [1], [0, 0, 1, 1], [], []>} : vector<128x128xbf16>, vector<128x64xbf16>, vector<128x64xf32> -> vector<128x64xf32>
    %113 = arith.truncf %112 : vector<128x64xf32> to vector<128x64xbf16>
    %cst_88 = arith.constant dense<0.000000e+00> : vector<128x64xf32>
    %114 = tpu.matmul %1, %111, %cst_88 {dimension_numbers = #tpu.dot_dimension_numbers<[1], [0], [0], [1], [0, 0, 1, 1], [], []>} : vector<128x128xbf16>, vector<128x64xbf16>, vector<128x64xf32> -> vector<128x64xf32>
    %115 = arith.truncf %114 : vector<128x64xf32> to vector<128x64xbf16>
    %cst_89 = arith.constant dense<0.000000e+00> : vector<128x64xf32>
    %116 = tpu.matmul %2, %110, %cst_89 {dimension_numbers = #tpu.dot_dimension_numbers<[1], [0], [0], [1], [0, 0, 1, 1], [], []>} : vector<128x128xbf16>, vector<128x64xbf16>, vector<128x64xf32> -> vector<128x64xf32>
    %117 = arith.truncf %116 : vector<128x64xf32> to vector<128x64xbf16>
    %cst_90 = arith.constant dense<0.000000e+00> : vector<128x64xf32>
    %118 = tpu.matmul %3, %111, %cst_90 {dimension_numbers = #tpu.dot_dimension_numbers<[1], [0], [0], [1], [0, 0, 1, 1], [], []>} : vector<128x128xbf16>, vector<128x64xbf16>, vector<128x64xf32> -> vector<128x64xf32>
    %119 = arith.truncf %118 : vector<128x64xf32> to vector<128x64xbf16>
    %c2 = arith.constant 2 : index
    %c0_91 = arith.constant 0 : index
    %c0_92 = arith.constant 0 : index
    %120 = vector.load %arg6[%c2, %c0_91, %c0_92] : memref<3x64x64xbf16, #tpu.memory_space<vmem>>, vector<1x64x64xbf16>
    %121 = vector.shape_cast %120 : vector<1x64x64xbf16> to vector<64x64xbf16>
    %cst_93 = arith.constant dense<0.000000e+00> : vector<128x64xf32>
    %122 = tpu.matmul %113, %121, %cst_93 {dimension_numbers = #tpu.dot_dimension_numbers<[1], [0], [0], [1], [0, 0, 1, 1], [], []>} : vector<128x64xbf16>, vector<64x64xbf16>, vector<128x64xf32> -> vector<128x64xf32>
    %c2_94 = arith.constant 2 : index
    %c0_95 = arith.constant 0 : index
    %c0_96 = arith.constant 0 : index
    %123 = vector.load %arg7[%c2_94, %c0_95, %c0_96] : memref<3x64x64xbf16, #tpu.memory_space<vmem>>, vector<1x64x64xbf16>
    %124 = vector.shape_cast %123 : vector<1x64x64xbf16> to vector<64x64xbf16>
    %cst_97 = arith.constant dense<0.000000e+00> : vector<128x64xf32>
    %125 = tpu.matmul %115, %124, %cst_97 {dimension_numbers = #tpu.dot_dimension_numbers<[1], [0], [0], [1], [0, 0, 1, 1], [], []>} : vector<128x64xbf16>, vector<64x64xbf16>, vector<128x64xf32> -> vector<128x64xf32>
    %126 = arith.addf %122, %125 : vector<128x64xf32>
    %c2_98 = arith.constant 2 : index
    %c0_99 = arith.constant 0 : index
    %c0_100 = arith.constant 0 : index
    %127 = vector.load %arg8[%c2_98, %c0_99, %c0_100] : memref<3x64x64xbf16, #tpu.memory_space<vmem>>, vector<1x64x64xbf16>
    %128 = vector.shape_cast %127 : vector<1x64x64xbf16> to vector<64x64xbf16>
    %cst_101 = arith.constant dense<0.000000e+00> : vector<128x64xf32>
    %129 = tpu.matmul %110, %128, %cst_101 {dimension_numbers = #tpu.dot_dimension_numbers<[1], [0], [0], [1], [0, 0, 1, 1], [], []>} : vector<128x64xbf16>, vector<64x64xbf16>, vector<128x64xf32> -> vector<128x64xf32>
    %130 = arith.addf %126, %129 : vector<128x64xf32>
    %c2_102 = arith.constant 2 : index
    %c0_103 = arith.constant 0 : index
    %c0_104 = arith.constant 0 : index
    %131 = vector.load %arg9[%c2_102, %c0_103, %c0_104] : memref<3x1x64xf32, #tpu.memory_space<vmem>>, vector<1x1x64xf32>
    %132 = vector.shape_cast %131 : vector<1x1x64xf32> to vector<1x64xf32>
    %133 = vector.broadcast %132 : vector<1x64xf32> to vector<128x64xf32>
    %134 = arith.addf %130, %133 : vector<128x64xf32>
    %cst_105 = arith.constant 0.000000e+00 : f32
    %135 = vector.broadcast %cst_105 : f32 to vector<128x64xf32>
    %136 = arith.cmpf ogt, %134, %135 : vector<128x64xf32>
    %cst_106 = arith.constant 0.00999999977 : f32
    %137 = vector.broadcast %cst_106 : f32 to vector<128x64xf32>
    %138 = arith.mulf %137, %134 : vector<128x64xf32>
    %139 = arith.select %136, %134, %138 : vector<128x64xi1>, vector<128x64xf32>
    %c2_107 = arith.constant 2 : index
    %c0_108 = arith.constant 0 : index
    %c0_109 = arith.constant 0 : index
    %140 = vector.load %arg10[%c2_107, %c0_108, %c0_109] : memref<3x64x64xbf16, #tpu.memory_space<vmem>>, vector<1x64x64xbf16>
    %141 = vector.shape_cast %140 : vector<1x64x64xbf16> to vector<64x64xbf16>
    %cst_110 = arith.constant dense<0.000000e+00> : vector<128x64xf32>
    %142 = tpu.matmul %117, %141, %cst_110 {dimension_numbers = #tpu.dot_dimension_numbers<[1], [0], [0], [1], [0, 0, 1, 1], [], []>} : vector<128x64xbf16>, vector<64x64xbf16>, vector<128x64xf32> -> vector<128x64xf32>
    %c2_111 = arith.constant 2 : index
    %c0_112 = arith.constant 0 : index
    %c0_113 = arith.constant 0 : index
    %143 = vector.load %arg11[%c2_111, %c0_112, %c0_113] : memref<3x64x64xbf16, #tpu.memory_space<vmem>>, vector<1x64x64xbf16>
    %144 = vector.shape_cast %143 : vector<1x64x64xbf16> to vector<64x64xbf16>
    %cst_114 = arith.constant dense<0.000000e+00> : vector<128x64xf32>
    %145 = tpu.matmul %119, %144, %cst_114 {dimension_numbers = #tpu.dot_dimension_numbers<[1], [0], [0], [1], [0, 0, 1, 1], [], []>} : vector<128x64xbf16>, vector<64x64xbf16>, vector<128x64xf32> -> vector<128x64xf32>
    %146 = arith.addf %142, %145 : vector<128x64xf32>
    %c2_115 = arith.constant 2 : index
    %c0_116 = arith.constant 0 : index
    %c0_117 = arith.constant 0 : index
    %147 = vector.load %arg12[%c2_115, %c0_116, %c0_117] : memref<3x64x64xbf16, #tpu.memory_space<vmem>>, vector<1x64x64xbf16>
    %148 = vector.shape_cast %147 : vector<1x64x64xbf16> to vector<64x64xbf16>
    %cst_118 = arith.constant dense<0.000000e+00> : vector<128x64xf32>
    %149 = tpu.matmul %111, %148, %cst_118 {dimension_numbers = #tpu.dot_dimension_numbers<[1], [0], [0], [1], [0, 0, 1, 1], [], []>} : vector<128x64xbf16>, vector<64x64xbf16>, vector<128x64xf32> -> vector<128x64xf32>
    %150 = arith.addf %146, %149 : vector<128x64xf32>
    %c2_119 = arith.constant 2 : index
    %c0_120 = arith.constant 0 : index
    %c0_121 = arith.constant 0 : index
    %151 = vector.load %arg13[%c2_119, %c0_120, %c0_121] : memref<3x1x64xf32, #tpu.memory_space<vmem>>, vector<1x1x64xf32>
    %152 = vector.shape_cast %151 : vector<1x1x64xf32> to vector<1x64xf32>
    %153 = vector.broadcast %152 : vector<1x64xf32> to vector<128x64xf32>
    %154 = arith.addf %150, %153 : vector<128x64xf32>
    %cst_122 = arith.constant 0.000000e+00 : f32
    %155 = vector.broadcast %cst_122 : f32 to vector<128x64xf32>
    %156 = arith.cmpf ogt, %154, %155 : vector<128x64xf32>
    %cst_123 = arith.constant 0.00999999977 : f32
    %157 = vector.broadcast %cst_123 : f32 to vector<128x64xf32>
    %158 = arith.mulf %157, %154 : vector<128x64xf32>
    %159 = arith.select %156, %154, %158 : vector<128x64xi1>, vector<128x64xf32>
    %160 = arith.addf %108, %139 : vector<128x64xf32>
    %161 = arith.addf %109, %159 : vector<128x64xf32>
    %c0_124 = arith.constant 0 : index
    %c0_125 = arith.constant 0 : index
    %162 = vector.load %arg14[%c0_124, %c0_125] : memref<128x64xf32, #tpu.memory_space<vmem>>, vector<128x64xf32>
    tpu.vector_store %arg14[%c0_124, %c0_125], %160 {strides = array<i32>} : memref<128x64xf32, #tpu.memory_space<vmem>>, vector<128x64xf32>,
    %c0_126 = arith.constant 0 : index
    %c0_127 = arith.constant 0 : index
    %163 = vector.load %arg15[%c0_126, %c0_127] : memref<128x64xf32, #tpu.memory_space<vmem>>, vector<128x64xf32>
    tpu.vector_store %arg15[%c0_126, %c0_127], %161 {strides = array<i32>} : memref<128x64xf32, #tpu.memory_space<vmem>>, vector<128x64xf32>,
    return
  }
}

</mosaic_0001>

<bundles_post_ra>
// kernel: tpu_custom_call.1
= control target key start
LH: loop header
LB: loop body
LE: loop exit
PB: predicated region body
PF: predicated region fallthrough
CT: control target
= control target key end

     0   :  { %21 = vsyncpa [#allocation3], 0  ;;  %s9169_s0 = inlined_call_operand.hbm [shape: bf16[128,128], index: 0, kind: input, shape index: {}]   ;;  %s9170_s1 = inlined_call_operand.hbm [shape: bf16[128,128], index: 1, kind: input, shape index: {}]   ;;  %s9171_s2 = inlined_call_operand.hbm [shape: bf16[128,128], index: 2, kind: input, shape index: {}]   ;;  %s9172_s3 = inlined_call_operand.hbm [shape: bf16[128,128], index: 3, kind: input, shape index: {}]   ;;  %s9173_s4 = inlined_call_operand.vmem [shape: bf16[128,64], index: 4, kind: input, shape index: {}]   ;;  %s9174_s5 = inlined_call_operand.vmem [shape: bf16[128,64], index: 5, kind: input, shape index: {}]   ;;  %s9175_s6 = inlined_call_operand.vmem [shape: bf16[3,64,64], index: 6, kind: input, shape index: {}]   ;;  %s9176_s7 = inlined_call_operand.vmem [shape: bf16[3,64,64], index: 7, kind: input, shape index: {}]   ;;  %s9177_s8 = inlined_call_operand.hbm [shape: bf16[3,64,64], index: 8, kind: input, shape index: {}]   ;;  %s9178_s9 = inlined_call_operand.vmem [shape: f32[3,1,64], index: 9, kind: input, shape index: {}]   ;;  %s9179_s10 = inlined_call_operand.hbm [shape: bf16[3,64,64], index: 10, kind: input, shape index: {}]   ;;  %s9180_s11 = inlined_call_operand.hbm [shape: bf16[3,64,64], index: 11, kind: input, shape index: {}]   ;;  %s9181_s12 = inlined_call_operand.hbm [shape: bf16[3,64,64], index: 12, kind: input, shape index: {}]   ;;  %s9182_s13 = inlined_call_operand.vmem [shape: f32[3,1,64], index: 13, kind: input, shape index: {}]   ;;  %s9183_s14 = inlined_call_operand.vmem [shape: f32[128,64], index: 14, kind: output, shape index: {0}]   ;;  %s9184_s15 = inlined_call_operand.vmem [shape: f32[128,64], index: 15, kind: output, shape index: {1}]  }
   0x1   :  { %22 = vsyncpa [#allocation5], 0 }
   0x2   :  { %23 = vsyncpa [#allocation8], 0 }
   0x3   :  { %24 = vsyncpa [#allocation11], 0 }
   0x4   :  { %25 = vsyncpa [#allocation14], 0  ;;  %s7352_s18 = smov [#allocation4]   ;;  %s7353_s20 = smov [#allocation7]  }
   0x5   :  { %s43_s19 = sshll.u32 %s7352_s18, 4  ;;  %s67_s21 = sshll.u32 %s7353_s20, 4  ;;  %s44_s19 = int_to_ptr.vmem [resolvable:$true] %s43_s19  ;;  %s7442_s21 = int_to_ptr.vmem [resolvable:$true] %s67_s21 }
   0x6   :  { %s7166_s24 = scalar_lea.hbm %s9170_s1, 1024 }
   0x7   :  { %p7167_p0 = scmp.ne.s32.totalorder %s9170_s1, %s7166_s24  ;;  %p7170_p1 = scmp.lt.u32.totalorder %s7166_s24, %s9170_s1 }
   0x9   :  { %p7172_p2 = pnand %p7170_p1, %p7167_p0 }
   0xb   :  { %7175 = shalt.err (!%p7172_p2)
}
   0xc   :  { %s7176_s29 = scalar_lea.vmem %s44_s19, 1024  ;;  %p7181_p4 = scmp.lt.s32.totalorder %s44_s19, %s44_s19 }
   0xd   :  { %p7177_p3 = scmp.ne.s32.totalorder %s44_s19, %s7176_s29  ;;  %p7182_p5 = scmp.lt.s32.totalorder %s7176_s29, %s7176_s29 }
   0xf   :  { %p7183_p6 = por %p7182_p5, %p7181_p4 }
  0x11   :  { %p7184_p7 = pnand %p7183_p6, %p7177_p3 }
  0x13   :  { %7187 = shalt.err (!%p7184_p7)
}
  0x14   :  { %s7354_s30 = smov 64   ;;  %s7355_s16 = smov 4  }
  0x15   :  { %49 = dma.hbm_to_vmem [thread:$0]  %s9170_s1, 1024, %s44_s19, [#allocation5], %s7354_s30, %s7354_s30, %s7355_s16  }
  0x16   :  { %s7188_s23 = scalar_lea.hbm %s9172_s3, 1024 }
  0x17   :  { %p7189_p8 = scmp.ne.s32.totalorder %s9172_s3, %s7188_s23  ;;  %p7192_p9 = scmp.lt.u32.totalorder %s7188_s23, %s9172_s3 }
  0x19   :  { %p7194_p10 = pnand %p7192_p9, %p7189_p8 }
  0x1b   :  { %7197 = shalt.err (!%p7194_p10)
}
  0x1c   :  { %s7198_s28 = scalar_lea.vmem %s7442_s21, 1024  ;;  %p7203_p12 = scmp.lt.s32.totalorder %s7442_s21, %s7442_s21 }
  0x1d   :  { %p7199_p11 = scmp.ne.s32.totalorder %s7442_s21, %s7198_s28  ;;  %p7204_p13 = scmp.lt.s32.totalorder %s7198_s28, %s7198_s28 }
  0x1f   :  { %p7205_p0 = por %p7204_p13, %p7203_p12 }
  0x21   :  { %p7206_p1 = pnand %p7205_p0, %p7199_p11 }
  0x23   :  { %7209 = shalt.err (!%p7206_p1)
}
  0x24   :  { %73 = dma.hbm_to_vmem [thread:$0]  %s9172_s3, 1024, %s7442_s21, [#allocation8], %s7354_s30, %s7354_s30, %s7355_s16  }
  0x25   :  { %s7356_s29 = smov [#allocation10]   ;;  %s7357_s18 = smov [#allocation2]  }
  0x26   :  { %s101_s17 = sshll.u32 %s7356_s29, 4  ;;  %s31_s20 = sshll.u32 %s7357_s18, 4  ;;  %s102_s17 = int_to_ptr.vmem [resolvable:$true] %s101_s17  ;;  %s7479_s20 = int_to_ptr.vmem [resolvable:$true] %s31_s20 }
  0x27   :  { %s7210_s24 = scalar_lea.hbm %s9179_s10, 1536 }
  0x28   :  { %p7211_p2 = scmp.ne.s32.totalorder %s9179_s10, %s7210_s24  ;;  %p7214_p3 = scmp.lt.u32.totalorder %s7210_s24, %s9179_s10 }
  0x2a   :  { %p7216_p4 = pnand %p7214_p3, %p7211_p2 }
  0x2c   :  { %7219 = shalt.err (!%p7216_p4)
}
  0x2d   :  { %s7220_s3 = scalar_lea.vmem %s102_s17, 1536  ;;  %p7225_p6 = scmp.lt.s32.totalorder %s102_s17, %s102_s17 }
  0x2e   :  { %p7221_p5 = scmp.ne.s32.totalorder %s102_s17, %s7220_s3  ;;  %p7226_p7 = scmp.lt.s32.totalorder %s7220_s3, %s7220_s3 }
  0x30   :  { %p7227_p8 = por %p7226_p7, %p7225_p6 }
  0x32   :  { %p7228_p9 = pnand %p7227_p8, %p7221_p5 }
  0x34   :  { %7231 = shalt.err (!%p7228_p9)
}
  0x35   :  { %107 = dma.hbm_to_vmem [thread:$0]  %s9179_s10, 1536, %s102_s17, [#allocation11], %s7354_s30, %s7354_s30, %s7355_s16  }
  0x36   :  { %s7232_s18 = scalar_lea.hbm %s9169_s0, 1024 }
  0x37   :  { %p7233_p10 = scmp.ne.s32.totalorder %s9169_s0, %s7232_s18  ;;  %p7236_p11 = scmp.lt.u32.totalorder %s7232_s18, %s9169_s0 }
  0x39   :  { %p7238_p12 = pnand %p7236_p11, %p7233_p10 }
  0x3b   :  { %7241 = shalt.err (!%p7238_p12)
}
  0x3c   :  { %s7242_s26 = scalar_lea.vmem %s7479_s20, 1024  ;;  %p7247_p0 = scmp.lt.s32.totalorder %s7479_s20, %s7479_s20 }
  0x3d   :  { %p7243_p13 = scmp.ne.s32.totalorder %s7479_s20, %s7242_s26  ;;  %p7248_p1 = scmp.lt.s32.totalorder %s7242_s26, %s7242_s26 }
  0x3f   :  { %p7249_p2 = por %p7248_p1, %p7247_p0 }
  0x41   :  { %p7250_p3 = pnand %p7249_p2, %p7243_p13 }
  0x43   :  { %7253 = shalt.err (!%p7250_p3)
}
  0x44   :  { %37 = dma.hbm_to_vmem [thread:$0]  %s9169_s0, 1024, %s7479_s20, [#allocation3], %s7354_s30, %s7354_s30, %s7355_s16  }
  0x45   :  { %s7358_s27 = smov [#allocation6]   ;;  %s7359_s3 = smov [#allocation9]  }
  0x46   :  { %s55_s28 = sshll.u32 %s7358_s27, 4  ;;  %s87_s21 = sshll.u32 %s7359_s3, 4  ;;  %s56_s28 = int_to_ptr.vmem [resolvable:$true] %s55_s28  ;;  %s7516_s21 = int_to_ptr.vmem [resolvable:$true] %s87_s21 }
  0x47   :  { %s7254_s29 = scalar_lea.hbm %s9171_s2, 1024 }
  0x48   :  { %p7255_p4 = scmp.ne.s32.totalorder %s9171_s2, %s7254_s29  ;;  %p7258_p5 = scmp.lt.u32.totalorder %s7254_s29, %s9171_s2 }
  0x4a   :  { %p7260_p6 = pnand %p7258_p5, %p7255_p4 }
  0x4c   :  { %7263 = shalt.err (!%p7260_p6)
}
  0x4d   :  { %s7264_s0 = scalar_lea.vmem %s56_s28, 1024  ;;  %p7269_p8 = scmp.lt.s32.totalorder %s56_s28, %s56_s28 }
  0x4e   :  { %p7265_p7 = scmp.ne.s32.totalorder %s56_s28, %s7264_s0  ;;  %p7270_p9 = scmp.lt.s32.totalorder %s7264_s0, %s7264_s0 }
  0x50   :  { %p7271_p10 = por %p7270_p9, %p7269_p8 }
  0x52   :  { %p7272_p11 = pnand %p7271_p10, %p7265_p7 }
  0x54   :  { %7275 = shalt.err (!%p7272_p11)
}
  0x55   :  { %61 = dma.hbm_to_vmem [thread:$0]  %s9171_s2, 1024, %s56_s28, [#allocation5], %s7354_s30, %s7354_s30, %s7355_s16  }
  0x56   :  { %s7276_s17 = scalar_lea.hbm %s9177_s8, 1536 }
  0x57   :  { %p7277_p12 = scmp.ne.s32.totalorder %s9177_s8, %s7276_s17  ;;  %p7280_p13 = scmp.lt.u32.totalorder %s7276_s17, %s9177_s8 }
  0x59   :  { %p7282_p0 = pnand %p7280_p13, %p7277_p12 }
  0x5b   :  { %7285 = shalt.err (!%p7282_p0)
}
  0x5c   :  { %s7286_s29 = scalar_lea.vmem %s7516_s21, 1536  ;;  %p7291_p2 = scmp.lt.s32.totalorder %s7516_s21, %s7516_s21 }
  0x5d   :  { %p7287_p1 = scmp.ne.s32.totalorder %s7516_s21, %s7286_s29  ;;  %p7292_p3 = scmp.lt.s32.totalorder %s7286_s29, %s7286_s29 }
  0x5f   :  { %p7293_p4 = por %p7292_p3, %p7291_p2 }
  0x61   :  { %p7294_p5 = pnand %p7293_p4, %p7287_p1 }
  0x63   :  { %7297 = shalt.err (!%p7294_p5)
}
  0x64   :  { %93 = dma.hbm_to_vmem [thread:$0]  %s9177_s8, 1536, %s7516_s21, [#allocation8], %s7354_s30, %s7354_s30, %s7355_s16  }
  0x65   :  { %s7360_s18 = smov [#allocation12]   ;;  %s7361_s23 = smov [#allocation13]  }
  0x66   :  { %s113_s22 = sshll.u32 %s7360_s18, 4  ;;  %s125_s24 = sshll.u32 %s7361_s23, 4  ;;  %s114_s22 = int_to_ptr.vmem [resolvable:$true] %s113_s22  ;;  %s7553_s24 = int_to_ptr.vmem [resolvable:$true] %s125_s24 }
  0x67   :  { %s7298_s25 = scalar_lea.hbm %s9180_s11, 1536 }
  0x68   :  { %p7299_p6 = scmp.ne.s32.totalorder %s9180_s11, %s7298_s25  ;;  %p7302_p7 = scmp.lt.u32.totalorder %s7298_s25, %s9180_s11 }
  0x6a   :  { %p7304_p8 = pnand %p7302_p7, %p7299_p6 }
  0x6c   :  { %7307 = shalt.err (!%p7304_p8)
}
  0x6d   :  { %s7308_s8 = scalar_lea.vmem %s114_s22, 1536  ;;  %p7313_p10 = scmp.lt.s32.totalorder %s114_s22, %s114_s22 }
  0x6e   :  { %p7309_p9 = scmp.ne.s32.totalorder %s114_s22, %s7308_s8  ;;  %p7314_p11 = scmp.lt.s32.totalorder %s7308_s8, %s7308_s8 }
  0x70   :  { %p7315_p12 = por %p7314_p11, %p7313_p10 }
  0x72   :  { %p7316_p13 = pnand %p7315_p12, %p7309_p9 }
  0x74   :  { %7319 = shalt.err (!%p7316_p13)
}
  0x75   :  { %119 = dma.hbm_to_vmem [thread:$0]  %s9180_s11, 1536, %s114_s22, [#allocation11], %s7354_s30, %s7354_s30, %s7355_s16  }
  0x76   :  { %s7320_s29 = scalar_lea.hbm %s9181_s12, 1536 }
  0x77   :  { %p7321_p0 = scmp.ne.s32.totalorder %s9181_s12, %s7320_s29  ;;  %p7324_p1 = scmp.lt.u32.totalorder %s7320_s29, %s9181_s12 }
  0x79   :  { %p7326_p2 = pnand %p7324_p1, %p7321_p0 }
  0x7b   :  { %7329 = shalt.err (!%p7326_p2)
}
  0x7c   :  { %s7330_s0 = scalar_lea.vmem %s7553_s24, 1536  ;;  %p7335_p4 = scmp.lt.s32.totalorder %s7553_s24, %s7553_s24 }
  0x7d   :  { %p7331_p3 = scmp.ne.s32.totalorder %s7553_s24, %s7330_s0  ;;  %p7336_p5 = scmp.lt.s32.totalorder %s7330_s0, %s7330_s0 }
  0x7f   :  { %p7337_p6 = por %p7336_p5, %p7335_p4 }
  0x81   :  { %p7338_p7 = pnand %p7337_p6, %p7331_p3 }
  0x83   :  { %7341 = shalt.err (!%p7338_p7)
}
  0x84   :  { %131 = dma.hbm_to_vmem [thread:$0]  %s9181_s12, 1536, %s7553_s24, [#allocation14], %s7354_s30, %s7354_s30, %s7355_s16  }
  0x85   :  { %7342 = dma.done.wait [#allocation3], 1024  }
  0x86   :  { %7343 = vsyncadd [#allocation3], 4294966272 }
  0x87   :  { %7344 = dma.done.wait [#allocation5], 2048  }
  0x88   :  { %7345 = vsyncadd [#allocation5], 4294965248 }
  0x89   :  { %7346 = dma.done.wait [#allocation8], 2560  }
  0x8a   :  { %7347 = vsyncadd [#allocation8], 4294964736 }
  0x8b   :  { %7348 = dma.done.wait [#allocation11], 3072  }
  0x8c   :  { %7349 = vsyncadd [#allocation11], 4294964224 }
  0x8d   :  { %7350 = dma.done.wait [#allocation14], 1536  }
  0x8e   :  { %7351 = vsyncadd [#allocation14], 4294965760  ;;  %v7001_v0 = vld [vmem:[%s9174_s5] sm:$0xff]   ;;  %v7002_v1 = vld [vmem:[%s9174_s5 + $0x8] sm:$0xff]   ;;  %vm1003_vm0 = vcmask 523264  }
  0x8f   :  { %6015 = vmatprep.subr.bf16.mxu1 %v7001_v0  ;;  %v7003_v2 = vld [vmem:[%s9174_s5 + $0x10] sm:$0xff]   ;;  %v7602_v3 = vld [vmem:[%s9174_s5 + $0x18] sm:$0xff]   ;;  %v7009_v4 = vld [vmem:[%s9173_s4] sm:$0xff]  }
  0x90   :  { %6016 = vmatpush3.bf16.msra.mxu1 %v7001_v0  ;;  %v7010_v5 = vld [vmem:[#allocation4] sm:$0xff]   ;;  %5983 = vmatprep.subr.bf16.mxu0 %v7009_v4  ;;  %v7615_v7 = vld [vmem:[%s9173_s4 + $0x8] sm:$0xff]   ;;  %v7621_v8 = vld [vmem:[%s9173_s4 + $0x10] sm:$0xff]  }
  0x91   :  { %6017 = vmatprep.subr.bf16.mxu1 %v7002_v1  ;;  %v7610_v6 = vld [vmem:[%s9174_s5 + $0x20] sm:$0xff]   ;;  %5984 = vmatpush3.bf16.msra.mxu0 %v7009_v4  ;;  %v7628_v9 = vld [vmem:[%s9174_s5 + $0x28] sm:$0xff]   ;;  %v7636_v10 = vld [vmem:[%s9173_s4 + $0x18] sm:$0xff]  }
  0x92   :  { %6031 = vmatprep.mubr.bf16.mxu1 %v7010_v5  ;;  %5985 = vmatprep.subr.bf16.mxu0 %v7615_v7  ;;  %v7642_v11 = vld [vmem:[%s9174_s5 + $0x30] sm:$0xff]   ;;  %v7650_v12 = vld [vmem:[%s9173_s4 + $0x20] sm:$0xff]   ;;  %v7655_v13 = vld [vmem:[%s9174_s5 + $0x38] sm:$0xff]  }
  0x93   :  { %v7662_v14 = vld [vmem:[%s9173_s4 + $0x28] sm:$0xff]   ;;  %v7666_v15 = vld [vmem:[#allocation2] sm:$0xff]   ;;  %v7676_v16 = vld [vmem:[%s9173_s4 + $0x30] sm:$0xff]  }
  0x94   :  { %6018 = vmatpush3.bf16.msra.mxu1 %v7002_v1  ;;  %5999 = vmatprep.mubr.bf16.mxu0 %v7666_v15  ;;  %v7011_v17 = vld [vmem:[#allocation4 + $0x8] sm:$0xff]   ;;  %v7014_v18 = vld [vmem:[#allocation4 + $0x10] sm:$0xff]   ;;  %v7684_v19 = vld [vmem:[%s9173_s4 + $0x38] sm:$0xff]  }
  0x95   :  { %6019 = vmatprep.subr.bf16.mxu1 %v7003_v2  ;;  %5986 = vmatpush3.bf16.msra.mxu0 %v7615_v7  ;;  %v7015_v20 = vld [vmem:[#allocation4 + $0x18] sm:$0xff]   ;;  %v7018_v21 = vld [vmem:[#allocation4 + $0x20] sm:$0xff]   ;;  %v7026_v22 = vld [vmem:[#allocation2 + $0x8] sm:$0xff]  }
  0x96   :  { %5987 = vmatprep.subr.bf16.mxu0 %v7621_v8  ;;  %v7029_v23 = vld [vmem:[#allocation2 + $0x10] sm:$0xff]   ;;  %v7019_v24 = vld [vmem:[#allocation4 + $0x28] sm:$0xff]   ;;  %v7030_v26 = vld [vmem:[#allocation2 + $0x18] sm:$0xff]  }
  0x97   :  { %v7022_v25 = vld [vmem:[#allocation4 + $0x30] sm:$0xff]   ;;  %v7033_v27 = vld [vmem:[#allocation2 + $0x20] sm:$0xff]   ;;  %v7023_v28 = vld [vmem:[#allocation4 + $0x38] sm:$0xff]  }
  0x98   :  { %6020 = vmatpush3.bf16.msra.mxu1 %v7003_v2  ;;  %v7027_v29 = vld [vmem:[#allocation7] sm:$0xff]   ;;  %v7034_v30 = vld [vmem:[#allocation2 + $0x28] sm:$0xff]   ;;  %v7037_v31 = vld [vmem:[#allocation2 + $0x30] sm:$0xff]  }
  0x99   :  { %6021 = vmatprep.subr.bf16.mxu1 %v7602_v3  ;;  %5988 = vmatpush3.bf16.msra.mxu0 %v7621_v8  ;;  %v7028_v32 = vld [vmem:[#allocation7 + $0x8] sm:$0xff]   ;;  %v7031_v33 = vld [vmem:[#allocation7 + $0x10] sm:$0xff]   ;;  %v7038_v34 = vld [vmem:[#allocation2 + $0x38] sm:$0xff]  }
  0x9a   :  { %5989 = vmatprep.subr.bf16.mxu0 %v7636_v10  ;;  %v7041_v35 = vld [vmem:[#allocation6] sm:$0xff]   ;;  %v7032_v36 = vld [vmem:[#allocation7 + $0x18] sm:$0xff]   ;;  %v7042_v39 = vld [vmem:[#allocation6 + $0x8] sm:$0xff]  }
  0x9b   :  { %v7049_v37 = vld [vmem:[%s9176_s7] sm:$0xff]   ;;  %v7043_v40 = vld [vmem:[#allocation6 + $0x10] sm:$0xff]   ;;  %v7050_v41 = vld [vmem:[%s9176_s7 + $0x8] sm:$0xff]  }
  0x9c   :  { %6022 = vmatpush3.bf16.msra.mxu1 %v7602_v3  ;;  %v7035_v38 = vld [vmem:[#allocation7 + $0x20] sm:$0xff]   ;;  %v7036_v42 = vld [vmem:[#allocation7 + $0x28] sm:$0xff]   ;;  %v7051_v43 = vld [vmem:[%s9176_s7 + $0x10] sm:$0xff]  }
  0x9d   :  { %6023 = vmatprep.subr.bf16.mxu1 %v7610_v6  ;;  %5990 = vmatpush3.bf16.msra.mxu0 %v7636_v10  ;;  %v7039_v44 = vld [vmem:[#allocation7 + $0x30] sm:$0xff]   ;;  %v7044_v45 = vld [vmem:[#allocation6 + $0x18] sm:$0xff]   ;;  %v7045_v46 = vld [vmem:[#allocation6 + $0x20] sm:$0xff]  }
  0x9e   :  { %5991 = vmatprep.subr.bf16.mxu0 %v7650_v12  ;;  %v7040_v47 = vld [vmem:[#allocation7 + $0x38] sm:$0xff]   ;;  %v7722_v48 = vld [vmem:[#allocation6 + $0x28] sm:$0xff]   ;;  %v7724_v49 = vld [vmem:[#allocation6 + $0x30] sm:$0xff]  }
  0x9f   :  { %v7728_v50 = vld [vmem:[#allocation6 + $0x38] sm:$0xff]   ;;  %v7053_v52 = vld [vmem:[#allocation12] sm:$0xff]   ;;  %v7054_v53 = vld [vmem:[#allocation12 + $0x8] sm:$0xff]  }
  0xa0   :  { %6024 = vmatpush3.bf16.msra.mxu1 %v7610_v6  ;;  %v7052_v51 = vld [vmem:[%s9176_s7 + $0x18] sm:$0xff]   ;;  %v7055_v54 = vld [vmem:[%s9175_s6] sm:$0xff]   ;;  %v7056_v55 = vld [vmem:[#allocation12 + $0x10] sm:$0xff]  }
  0xa1   :  { %6025 = vmatprep.subr.bf16.mxu1 %v7628_v9  ;;  %5992 = vmatpush3.bf16.msra.mxu0 %v7650_v12  ;;  %v7059_v56 = vld [vmem:[#allocation12 + $0x18] sm:$0xff]   ;;  %v7737_v57 = vld [vmem:[#allocation10] sm:$0xff]  }
  0xa2   :  { %5993 = vmatprep.subr.bf16.mxu0 %v7662_v14 }
  0xa4   :  { %6026 = vmatpush3.bf16.msra.mxu1 %v7628_v9 }
  0xa5   :  { %6027 = vmatprep.subr.bf16.mxu1 %v7642_v11  ;;  %5994 = vmatpush3.bf16.msra.mxu0 %v7662_v14 }
  0xa6   :  { %5995 = vmatprep.subr.bf16.mxu0 %v7676_v16 }
  0xa8   :  { %6028 = vmatpush3.bf16.msra.mxu1 %v7642_v11 }
  0xa9   :  { %6029 = vmatprep.subr.bf16.mxu1 %v7655_v13  ;;  %5996 = vmatpush3.bf16.msra.mxu0 %v7676_v16 }
  0xaa   :  { %5997 = vmatprep.subr.bf16.mxu0 %v7684_v19 }
  0xac   :  { %6030 = vmatpush3.bf16.msra.mxu1 %v7655_v13 }
  0xad   :  { %6079 = vmatprep.subr.bf16.mxu1 %v7001_v0  ;;  %5998 = vmatpush3.bf16.msra.mxu0 %v7684_v19 }
  0xae   :  { %6047 = vmatprep.subr.bf16.mxu0 %v7009_v4 }
  0xaf   :  { %6032 = vmatmul.mubr.bf16.vlgmr.msra.gmra.mrb[0].mxu1 %v7011_v17 }
  0xb0   :  { %6080 = vmatpush3.bf16.msra.mxu1 %v7001_v0  ;;  %6035 = vmatprep.mubr.bf16.mxu1 %v7014_v18  ;;  %v7057_v0 = vld [vmem:[%s9175_s6 + $0x8] sm:$0xff]  }
  0xb1   :  { %6081 = vmatprep.subr.bf16.mxu1 %v7002_v1  ;;  %6000 = vmatmul.mubr.bf16.vlgmr.msra.gmra.mrb[0].mxu0 %v7026_v22 }
  0xb2   :  { %6048 = vmatpush3.bf16.msra.mxu0 %v7009_v4  ;;  %6003 = vmatprep.mubr.bf16.mxu0 %v7029_v23 }
  0xb3   :  { %6049 = vmatprep.subr.bf16.mxu0 %v7615_v7 }
  0xb4   :  { %6082 = vmatpush3.bf16.msra.mxu1 %v7002_v1 }
  0xb5   :  { %6083 = vmatprep.subr.bf16.mxu1 %v7003_v2 }
  0xb6   :  { %6050 = vmatpush3.bf16.msra.mxu0 %v7615_v7 }
  0xb7   :  { %6036 = vmatmul.mubr.bf16.gmra.mrb[4].mxu1 %v7015_v20  ;;  %6051 = vmatprep.subr.bf16.mxu0 %v7621_v8 }
  0xb8   :  { %6084 = vmatpush3.bf16.msra.mxu1 %v7003_v2  ;;  %6039 = vmatprep.mubr.bf16.mxu1 %v7018_v21  ;;  %v7063_v21 = vld [vmem:[#allocation9] sm:$0xff]  }
  0xb9   :  { %6085 = vmatprep.subr.bf16.mxu1 %v7602_v3  ;;  %6004 = vmatmul.mubr.bf16.gmra.mrb[4].mxu0 %v7030_v26 }
  0xba   :  { %6052 = vmatpush3.bf16.msra.mxu0 %v7621_v8  ;;  %6007 = vmatprep.mubr.bf16.mxu0 %v7033_v27 }
  0xbb   :  { %6053 = vmatprep.subr.bf16.mxu0 %v7636_v10 }
  0xbc   :  { %6086 = vmatpush3.bf16.msra.mxu1 %v7602_v3  ;;  %v7058_v3 = vld [vmem:[%s9175_s6 + $0x10] sm:$0xff]  }
  0xbd   :  { %6087 = vmatprep.subr.bf16.mxu1 %v7610_v6 }
  0xbe   :  { %6054 = vmatpush3.bf16.msra.mxu0 %v7636_v10 }
  0xbf   :  { %6040 = vmatmul.mubr.bf16.gmra.mrb[8].mxu1 %v7019_v24  ;;  %6055 = vmatprep.subr.bf16.mxu0 %v7650_v12 }
  0xc0   :  { %6088 = vmatpush3.bf16.msra.mxu1 %v7610_v6  ;;  %6043 = vmatprep.mubr.bf16.mxu1 %v7022_v25 }
  0xc1   :  { %6089 = vmatprep.subr.bf16.mxu1 %v7628_v9  ;;  %6008 = vmatmul.mubr.bf16.gmra.mrb[8].mxu0 %v7034_v30 }
  0xc2   :  { %6056 = vmatpush3.bf16.msra.mxu0 %v7650_v12  ;;  %6011 = vmatprep.mubr.bf16.mxu0 %v7037_v31 }
  0xc3   :  { %6057 = vmatprep.subr.bf16.mxu0 %v7662_v14 }
  0xc4   :  { %6090 = vmatpush3.bf16.msra.mxu1 %v7628_v9 }
  0xc5   :  { %6091 = vmatprep.subr.bf16.mxu1 %v7642_v11 }
  0xc6   :  { %6058 = vmatpush3.bf16.msra.mxu0 %v7662_v14 }
  0xc7   :  { %6044 = vmatmul.mubr.bf16.gmra.mrb[12].mxu1 %v7023_v28  ;;  %6059 = vmatprep.subr.bf16.mxu0 %v7676_v16 }
  0xc8   :  { %6092 = vmatpush3.bf16.msra.mxu1 %v7642_v11  ;;  %6095 = vmatprep.mubr.bf16.mxu1 %v7027_v29 }
  0xc9   :  { %6093 = vmatprep.subr.bf16.mxu1 %v7655_v13  ;;  %6012 = vmatmul.mubr.bf16.gmra.mrb[12].mxu0 %v7038_v34 }
  0xca   :  { %6060 = vmatpush3.bf16.msra.mxu0 %v7676_v16  ;;  %6063 = vmatprep.mubr.bf16.mxu0 %v7041_v35 }
  0xcb   :  { %6061 = vmatprep.subr.bf16.mxu0 %v7684_v19 }
  0xcc   :  { %6094 = vmatpush3.bf16.msra.mxu1 %v7655_v13  ;;  %v7060_v13 = vld [vmem:[%s9175_s6 + $0x18] sm:$0xff]  }
  0xcd   :  { %6183 = vmatprep.subr.bf16.mxu1 %v7053_v52 }
  0xce   :  { %6062 = vmatpush3.bf16.msra.mxu0 %v7684_v19 }
  0xcf   :  { %6096 = vmatmul.mubr.bf16.vlgmr.msra.gmra.mrb[16].mxu1 %v7028_v32  ;;  %6111 = vmatprep.subr.bf16.mxu0 %v7049_v37 }
  0xd0   :  { %6099 = vmatprep.mubr.bf16.mxu1 %v7031_v33  ;;  %6184 = vmatpush3.bf16.msra.mxu1 %v7053_v52 }
  0xd1   :  { %6064 = vmatmul.mubr.bf16.vlgmr.msra.gmra.mrb[16].mxu0 %v7042_v39  ;;  %6185 = vmatprep.subr.bf16.mxu1 %v7054_v53 }
  0xd2   :  { %6067 = vmatprep.mubr.bf16.mxu0 %v7043_v40  ;;  %6112 = vmatpush3.bf16.msra.mxu0 %v7049_v37 }
  0xd3   :  { %6113 = vmatprep.subr.bf16.mxu0 %v7050_v41 }
  0xd4   :  { %6186 = vmatpush3.bf16.msra.mxu1 %v7054_v53 }
  0xd5   :  { %6187 = vmatprep.subr.bf16.mxu1 %v7056_v55 }
  0xd6   :  { %6114 = vmatpush3.bf16.msra.mxu0 %v7050_v41 }
  0xd7   :  { %6100 = vmatmul.mubr.bf16.gmra.mrb[20].mxu1 %v7032_v36  ;;  %6115 = vmatprep.subr.bf16.mxu0 %v7051_v43 }
  0xd8   :  { %6103 = vmatprep.mubr.bf16.mxu1 %v7035_v38  ;;  %6188 = vmatpush3.bf16.msra.mxu1 %v7056_v55 }
  0xd9   :  { %6068 = vmatmul.mubr.bf16.gmra.mrb[20].mxu0 %v7044_v45  ;;  %6189 = vmatprep.subr.bf16.mxu1 %v7059_v56 }
  0xda   :  { %6071 = vmatprep.mubr.bf16.mxu0 %v7045_v46  ;;  %6116 = vmatpush3.bf16.msra.mxu0 %v7051_v43 }
  0xdb   :  { %6117 = vmatprep.subr.bf16.mxu0 %v7052_v51 }
  0xdc   :  { %6190 = vmatpush3.bf16.msra.mxu1 %v7059_v56  ;;  %v7062_v56 = vld [vmem:[#allocation10 + $0x8] sm:$0xff]  }
  0xdd   :  { %6207 = vmatprep.subr.bf16.mxu1 %v7737_v57 }
  0xde   :  { %6118 = vmatpush3.bf16.msra.mxu0 %v7052_v51 }
  0xdf   :  { %6104 = vmatmul.mubr.bf16.gmra.mrb[24].mxu1 %v7036_v42  ;;  %6135 = vmatprep.subr.bf16.mxu0 %v7055_v54 }
  0xe0   :  { %6107 = vmatprep.mubr.bf16.mxu1 %v7039_v44 }
  0xe1   :  { %6072 = vmatmul.mubr.bf16.gmra.mrb[24].mxu0 %v7722_v48 }
  0xe2   :  { %6075 = vmatprep.mubr.bf16.mxu0 %v7724_v49 }
  0xe7   :  { %6108 = vmatmul.mubr.bf16.gmra.mrb[28].mxu1 %v7040_v47 }
  0xe9   :  { %6076 = vmatmul.mubr.bf16.gmra.mrb[28].mxu0 %v7728_v50 }
 0x182   :  { %v6033_v58 = vpop.f32.mrb[0].mxu1 }
 0x183   :  { %v586_v59 = vpop.f32.mrb[1].mxu1 }
 0x184   :  { %v6034_v60 = vpop.f32.mrb[2].mxu1  ;;  %v7748_v5 = vpop.f32.mrb[0].mxu0 }
 0x185   :  { %v650_v61 = vpack.c.bf16 %v6034_v60, %v6033_v58  ;;  %v589_v62 = vpop.f32.mrb[3].mxu1  ;;  %v385_v8 = vpop.f32.mrb[1].mxu0 }
 0x186   :  { %v649_v63 = vpack.c.bf16 %v589_v62, %v586_v59  ;;  %v6002_v10 = vpop.f32.mrb[2].mxu0 }
 0x187   :  { %v449_v11 = vpack.c.bf16 %v6002_v10, %v7748_v5  ;;  %v388_v12 = vpop.f32.mrb[3].mxu0 }
 0x188   :  { %6119 = vmatprep.mubr.msk.bf16.mxu0 %vm1003_vm0, %v649_v63  ;;  %v448_v17 = vpack.c.bf16 %v388_v12, %v385_v8  ;;  %v7068_v12 = vld [vmem:[#allocation9 + $0x18] sm:$0xff]  }
 0x189   :  { %6120 = vmatmul.mubr.msk.bf16.vlgmr.msra.gmra.mrb[32].mxu0 %vm1003_vm0, %v650_v61  ;;  %v7065_v61 = vld [vmem:[#allocation9 + $0x8] sm:$0xff]  }
 0x18a   :  { %v6037_v1 = vpop.f32.mrb[4].mxu1  ;;  %6136 = vmatpush3.bf16.msra.mxu0 %v7055_v54 }
 0x18b   :  { %v602_v2 = vpop.f32.mrb[5].mxu1  ;;  %6137 = vmatprep.subr.bf16.mxu0 %v7057_v0 }
 0x18c   :  { %v6038_v4 = vpop.f32.mrb[6].mxu1  ;;  %v7756_v23 = vpop.f32.mrb[4].mxu0 }
 0x18d   :  { %v652_v6 = vpack.c.bf16 %v6038_v4, %v6037_v1  ;;  %v605_v7 = vpop.f32.mrb[7].mxu1  ;;  %v401_v26 = vpop.f32.mrb[5].mxu0 }
 0x18e   :  { %v651_v9 = vpack.c.bf16 %v605_v7, %v602_v2  ;;  %6138 = vmatpush3.bf16.msra.mxu0 %v7057_v0  ;;  %v7758_v28 = vpop.f32.mrb[6].mxu0  ;;  %v7064_v0 = vld [vmem:[#allocation10 + $0x10] sm:$0xff]  }
 0x18f   :  { %6139 = vmatprep.subr.bf16.mxu0 %v7058_v3  ;;  %v451_v29 = vpack.c.bf16 %v7758_v28, %v7756_v23  ;;  %v404_v30 = vpop.f32.mrb[7].mxu0 }
 0x190   :  { %6123 = vmatprep.mubr.msk.bf16.mxu0 %vm1003_vm0, %v651_v9  ;;  %v450_v31 = vpack.c.bf16 %v404_v30, %v401_v26  ;;  %v7067_v9 = vld [vmem:[#allocation10 + $0x18] sm:$0xff]  }
 0x191   :  { %6124 = vmatmul.mubr.msk.bf16.gmra.mrb[36].mxu0 %vm1003_vm0, %v652_v6 }
 0x192   :  { %v6041_v18 = vpop.f32.mrb[8].mxu1  ;;  %6140 = vmatpush3.bf16.msra.mxu0 %v7058_v3  ;;  %v7066_v3 = vld [vmem:[#allocation9 + $0x10] sm:$0xff]  }
 0x193   :  { %v618_v20 = vpop.f32.mrb[9].mxu1  ;;  %6141 = vmatprep.subr.bf16.mxu0 %v7060_v13 }
 0x194   :  { %v6042_v22 = vpop.f32.mrb[10].mxu1  ;;  %v7764_v35 = vpop.f32.mrb[8].mxu0 }
 0x195   :  { %v654_v24 = vpack.c.bf16 %v6042_v22, %v6041_v18  ;;  %v621_v25 = vpop.f32.mrb[11].mxu1  ;;  %v417_v38 = vpop.f32.mrb[9].mxu0  ;;  %v7069_v18 = vld [vmem:[#allocation13] sm:$0xff]  }
 0x196   :  { %v653_v27 = vpack.c.bf16 %v621_v25, %v618_v20  ;;  %6142 = vmatpush3.bf16.msra.mxu0 %v7060_v13  ;;  %v7766_v40 = vpop.f32.mrb[10].mxu0 }
 0x197   :  { %6159 = vmatprep.subr.bf16.mxu0 %v7063_v21  ;;  %v453_v41 = vpack.c.bf16 %v7766_v40, %v7764_v35  ;;  %v420_v42 = vpop.f32.mrb[11].mxu0  ;;  %v7121_v40 = vld [vmem:[%s9173_s4] sm:$0xff]  }
 0x198   :  { %6127 = vmatprep.mubr.msk.bf16.mxu0 %vm1003_vm0, %v653_v27  ;;  %v452_v43 = vpack.c.bf16 %v420_v42, %v417_v38 }
 0x199   :  { %6128 = vmatmul.mubr.msk.bf16.gmra.mrb[40].mxu0 %vm1003_vm0, %v654_v24 }
 0x19a   :  { %v6045_v32 = vpop.f32.mrb[12].mxu1 }
 0x19b   :  { %v634_v33 = vpop.f32.mrb[13].mxu1 }
 0x19c   :  { %v6046_v34 = vpop.f32.mrb[14].mxu1  ;;  %v7773_v47 = vpop.f32.mrb[12].mxu0 }
 0x19d   :  { %v656_v36 = vpack.c.bf16 %v6046_v34, %v6045_v32  ;;  %v637_v37 = vpop.f32.mrb[15].mxu1  ;;  %v7775_v53 = vpop.f32.mrb[13].mxu0 }
 0x19e   :  { %v655_v39 = vpack.c.bf16 %v637_v37, %v634_v33  ;;  %v7777_v55 = vpop.f32.mrb[14].mxu0 }
 0x19f   :  { %v455_v58 = vpack.c.bf16 %v7777_v55, %v7773_v47  ;;  %v436_v59 = vpop.f32.mrb[15].mxu0  ;;  %v7122_v47 = vld [vmem:[%s9173_s4 + $0x8] sm:$0xff]   ;;  %v7071_v55 = vld [vmem:[#allocation13 + $0x10] sm:$0xff]  }
 0x1a0   :  { %6131 = vmatprep.mubr.msk.bf16.mxu0 %vm1003_vm0, %v655_v39  ;;  %v454_v60 = vpack.c.bf16 %v436_v59, %v7775_v53  ;;  %v7125_v59 = vld [vmem:[%s9173_s4 + $0x20] sm:$0xff]  }
 0x1a1   :  { %6132 = vmatmul.mubr.msk.bf16.gmra.mrb[44].mxu0 %vm1003_vm0, %v656_v36 }
 0x1a2   :  { %v6097_v44 = vpop.f32.mrb[16].mxu1  ;;  %6143 = vmatprep.mubr.msk.bf16.mxu0 %vm1003_vm0, %v448_v17 }
 0x1a3   :  { %v892_v45 = vpop.f32.mrb[17].mxu1 }
 0x1a4   :  { %v6098_v46 = vpop.f32.mrb[18].mxu1  ;;  %v7787_v2 = vpop.f32.mrb[16].mxu0 }
 0x1a5   :  { %v956_v51 = vpack.c.bf16 %v6098_v46, %v6097_v44  ;;  %v895_v52 = vpop.f32.mrb[19].mxu1  ;;  %v739_v6 = vpop.f32.mrb[17].mxu0  ;;  %v7070_v46 = vld [vmem:[#allocation13 + $0x8] sm:$0xff]  }
 0x1a6   :  { %v955_v54 = vpack.c.bf16 %v895_v52, %v892_v45  ;;  %v7789_v8 = vpop.f32.mrb[18].mxu0 }
 0x1a7   :  { %v742_v10 = vpop.f32.mrb[19].mxu0 }
 0x1a8   :  { %6191 = vmatprep.mubr.msk.bf16.mxu1 %vm1003_vm0, %v955_v54  ;;  %v7123_v54 = vld [vmem:[%s9173_s4 + $0x10] sm:$0xff]  }
 0x1a9   :  { %6144 = vmatmul.mubr.msk.bf16.vlgmr.msra.gmra.mrb[32].mxu0 %vm1003_vm0, %v449_v11  ;;  %6192 = vmatmul.mubr.msk.bf16.vlgmr.msra.gmra.mrb[32].mxu1 %vm1003_vm0, %v956_v51  ;;  %v802_v11 = vpack.c.bf16 %v742_v10, %v739_v6 }
 0x1aa   :  { %v6101_v62 = vpop.f32.mrb[20].mxu1  ;;  %6208 = vmatpush3.bf16.msra.mxu1 %v7737_v57  ;;  %6147 = vmatprep.mubr.msk.bf16.mxu0 %vm1003_vm0, %v450_v31  ;;  %v803_v57 = vpack.c.bf16 %v7789_v8, %v7787_v2 }
 0x1ab   :  { %v908_v63 = vpop.f32.mrb[21].mxu1  ;;  %6209 = vmatprep.subr.bf16.mxu1 %v7062_v56  ;;  %6160 = vmatpush3.bf16.msra.mxu0 %v7063_v21 }
 0x1ac   :  { %v6102_v1 = vpop.f32.mrb[22].mxu1  ;;  %6161 = vmatprep.subr.bf16.mxu0 %v7065_v61  ;;  %v6069_v21 = vpop.f32.mrb[20].mxu0 }
 0x1ad   :  { %v958_v4 = vpack.c.bf16 %v6102_v1, %v6101_v62  ;;  %v911_v5 = vpop.f32.mrb[23].mxu1  ;;  %v755_v25 = vpop.f32.mrb[21].mxu0  ;;  %v7132_v62 = vld [vmem:[%s9174_s5 + $0x30] sm:$0xff]   ;;  %v7886_v1 = vld [vmem:[%s9178_s9] ss:$0 sm:$0xff] }
 0x1ae   :  { %v957_v7 = vpack.c.bf16 %v911_v5, %v908_v63  ;;  %6210 = vmatpush3.bf16.msra.mxu1 %v7062_v56  ;;  %v6070_v23 = vpop.f32.mrb[22].mxu0  ;;  %v7072_v56 = vld [vmem:[#allocation13 + $0x18] sm:$0xff]  }
 0x1af   :  { %6211 = vmatprep.subr.bf16.mxu1 %v7064_v0  ;;  %6162 = vmatpush3.bf16.msra.mxu0 %v7065_v61  ;;  %v805_v27 = vpack.c.bf16 %v6070_v23, %v6069_v21  ;;  %v758_v28 = vpop.f32.mrb[23].mxu0  ;;  %v7131_v61 = vld [vmem:[%s9174_s5 + $0x28] sm:$0xff]   ;;  %v7133_v63 = vld [vmem:[%s9174_s5 + $0x38] sm:$0xff]  }
 0x1b0   :  { %6195 = vmatprep.mubr.msk.bf16.mxu1 %vm1003_vm0, %v957_v7  ;;  %6163 = vmatprep.subr.bf16.mxu0 %v7066_v3 }
 0x1b1   :  { %6148 = vmatmul.mubr.msk.bf16.gmra.mrb[36].mxu0 %vm1003_vm0, %v451_v29  ;;  %6196 = vmatmul.mubr.msk.bf16.gmra.mrb[36].mxu1 %vm1003_vm0, %v958_v4  ;;  %v804_v29 = vpack.c.bf16 %v758_v28, %v755_v25 }
 0x1b2   :  { %v6105_v13 = vpop.f32.mrb[24].mxu1  ;;  %6151 = vmatprep.mubr.msk.bf16.mxu0 %vm1003_vm0, %v452_v43  ;;  %6212 = vmatpush3.bf16.msra.mxu1 %v7064_v0  ;;  %v7880_v0 = vld [vmem:[#allocation4] sm:$0xff]  }
 0x1b3   :  { %v924_v17 = vpop.f32.mrb[25].mxu1  ;;  %6213 = vmatprep.subr.bf16.mxu1 %v7067_v9  ;;  %6164 = vmatpush3.bf16.msra.mxu0 %v7066_v3 }
 0x1b4   :  { %v6106_v20 = vpop.f32.mrb[26].mxu1  ;;  %6165 = vmatprep.subr.bf16.mxu0 %v7068_v12  ;;  %v6073_v33 = vpop.f32.mrb[24].mxu0 }
 0x1b5   :  { %v960_v22 = vpack.c.bf16 %v6106_v20, %v6105_v13  ;;  %v927_v24 = vpop.f32.mrb[27].mxu1  ;;  %v771_v37 = vpop.f32.mrb[25].mxu0 }
 0x1b6   :  { %v959_v26 = vpack.c.bf16 %v927_v24, %v924_v17  ;;  %6214 = vmatpush3.bf16.msra.mxu1 %v7067_v9  ;;  %v6074_v39 = vpop.f32.mrb[26].mxu0 }
 0x1b7   :  { %6166 = vmatpush3.bf16.msra.mxu0 %v7068_v12  ;;  %6231 = vmatprep.subr.bf16.mxu1 %v7069_v18  ;;  %v807_v42 = vpack.c.bf16 %v6074_v39, %v6073_v33  ;;  %v774_v43 = vpop.f32.mrb[27].mxu0 }
 0x1b8   :  { %6199 = vmatprep.mubr.msk.bf16.mxu1 %vm1003_vm0, %v959_v26  ;;  %v806_v35 = vpack.c.bf16 %v774_v43, %v771_v37 }
 0x1b9   :  { %6152 = vmatmul.mubr.msk.bf16.gmra.mrb[40].mxu0 %vm1003_vm0, %v453_v41  ;;  %6200 = vmatmul.mubr.msk.bf16.gmra.mrb[40].mxu1 %vm1003_vm0, %v960_v22 }
 0x1ba   :  { %v6109_v30 = vpop.f32.mrb[28].mxu1  ;;  %6155 = vmatprep.mubr.msk.bf16.mxu0 %vm1003_vm0, %v454_v60  ;;  %v7126_v60 = vld [vmem:[%s9174_s5] sm:$0xff]  }
 0x1bb   :  { %v940_v31 = vpop.f32.mrb[29].mxu1 }
 0x1bc   :  { %v6110_v32 = vpop.f32.mrb[30].mxu1  ;;  %v6077_v41 = vpop.f32.mrb[28].mxu0 }
 0x1bd   :  { %v962_v34 = vpack.c.bf16 %v6110_v32, %v6109_v30  ;;  %v943_v36 = vpop.f32.mrb[31].mxu1  ;;  %v787_v44 = vpop.f32.mrb[29].mxu0 }
 0x1be   :  { %v961_v38 = vpack.c.bf16 %v943_v36, %v940_v31  ;;  %v6078_v45 = vpop.f32.mrb[30].mxu0 }
 0x1bf   :  { %v809_v51 = vpack.c.bf16 %v6078_v45, %v6077_v41  ;;  %v790_v52 = vpop.f32.mrb[31].mxu0 }
 0x1c0   :  { %6203 = vmatprep.mubr.msk.bf16.mxu1 %vm1003_vm0, %v961_v38  ;;  %v808_v53 = vpack.c.bf16 %v790_v52, %v787_v44 }
 0x1c1   :  { %6156 = vmatmul.mubr.msk.bf16.gmra.mrb[44].mxu0 %vm1003_vm0, %v455_v58  ;;  %6204 = vmatmul.mubr.msk.bf16.gmra.mrb[44].mxu1 %vm1003_vm0, %v962_v34  ;;  %v7124_v58 = vld [vmem:[%s9173_s4 + $0x18] sm:$0xff]  }
 0x1c2   :  { %6215 = vmatprep.mubr.msk.bf16.mxu1 %vm1003_vm0, %v802_v11  ;;  %6167 = vmatprep.mubr.msk.bf16.mxu0 %vm1003_vm0, %v7121_v40 }
 0x1c9   :  { %6168 = vmatmul.mubr.msk.bf16.vlgmr.msra.gmra.mrb[32].mxu0 %vm1003_vm0, %v7122_v47  ;;  %6216 = vmatmul.mubr.msk.bf16.vlgmr.msra.gmra.mrb[32].mxu1 %vm1003_vm0, %v803_v57 }
 0x1ca   :  { %6232 = vmatpush3.bf16.msra.mxu1 %v7069_v18  ;;  %6219 = vmatprep.mubr.msk.bf16.mxu1 %vm1003_vm0, %v804_v29 }
 0x1cb   :  { %6171 = vmatprep.mubr.msk.bf16.mxu0 %vm1003_vm0, %v7123_v54  ;;  %6233 = vmatprep.subr.bf16.mxu1 %v7070_v46 }
 0x1ce   :  { %6234 = vmatpush3.bf16.msra.mxu1 %v7070_v46 }
 0x1cf   :  { %6235 = vmatprep.subr.bf16.mxu1 %v7071_v55 }
 0x1d1   :  { %6172 = vmatmul.mubr.msk.bf16.gmra.mrb[36].mxu0 %vm1003_vm0, %v7124_v58  ;;  %6220 = vmatmul.mubr.msk.bf16.gmra.mrb[36].mxu1 %vm1003_vm0, %v805_v27 }
 0x1d2   :  { %6223 = vmatprep.mubr.msk.bf16.mxu1 %vm1003_vm0, %v806_v35  ;;  %6175 = vmatprep.mubr.msk.bf16.mxu0 %vm1003_vm0, %v7125_v59 }
 0x1d3   :  { %6236 = vmatpush3.bf16.msra.mxu1 %v7071_v55 }
 0x1d4   :  { %6237 = vmatprep.subr.bf16.mxu1 %v7072_v56 }
 0x1d7   :  { %6238 = vmatpush3.bf16.msra.mxu1 %v7072_v56 }
 0x1d9   :  { %6176 = vmatmul.mubr.msk.bf16.gmra.mrb[40].mxu0 %vm1003_vm0, %v7662_v14  ;;  %6224 = vmatmul.mubr.msk.bf16.gmra.mrb[40].mxu1 %vm1003_vm0, %v807_v42  ;;  %v7127_v14 = vld [vmem:[%s9174_s5 + $0x8] sm:$0xff]  }
 0x1da   :  { %6227 = vmatprep.mubr.msk.bf16.mxu1 %vm1003_vm0, %v808_v53  ;;  %6179 = vmatprep.mubr.msk.bf16.mxu0 %vm1003_vm0, %v7676_v16  ;;  %v7128_v16 = vld [vmem:[%s9174_s5 + $0x10] sm:$0xff]  }
 0x1e1   :  { %6180 = vmatmul.mubr.msk.bf16.gmra.mrb[44].mxu0 %vm1003_vm0, %v7684_v19  ;;  %6228 = vmatmul.mubr.msk.bf16.gmra.mrb[44].mxu1 %vm1003_vm0, %v809_v51  ;;  %v7129_v19 = vld [vmem:[%s9174_s5 + $0x18] sm:$0xff]  }
 0x1e2   :  { %6239 = vmatprep.mubr.msk.bf16.mxu1 %vm1003_vm0, %v7126_v60  ;;  %6271 = vmatprep.mubr.bf16.mxu0 %v7666_v15  ;;  %v7130_v15 = vld [vmem:[%s9174_s5 + $0x20] sm:$0xff]  }
 0x1e9   :  { %6240 = vmatmul.mubr.msk.bf16.vlgmr.msra.gmra.mrb[32].mxu1 %vm1003_vm0, %v7127_v14 }
 0x1ea   :  { %6243 = vmatprep.mubr.msk.bf16.mxu1 %vm1003_vm0, %v7128_v16 }
 0x1f1   :  { %6244 = vmatmul.mubr.msk.bf16.gmra.mrb[36].mxu1 %vm1003_vm0, %v7129_v19 }
 0x1f2   :  { %6247 = vmatprep.mubr.msk.bf16.mxu1 %vm1003_vm0, %v7130_v15 }
 0x1f9   :  { %6248 = vmatmul.mubr.msk.bf16.gmra.mrb[40].mxu1 %vm1003_vm0, %v7131_v61 }
 0x1fa   :  { %6251 = vmatprep.mubr.msk.bf16.mxu1 %vm1003_vm0, %v7132_v62 }
 0x201   :  { %6252 = vmatmul.mubr.msk.bf16.gmra.mrb[44].mxu1 %vm1003_vm0, %v7133_v63 }
 0x202   :  { %6303 = vmatprep.mubr.bf16.mxu1 %v7880_v0 }
 0x29c   :  { %v6169_v2 = vpop.f32.mrb[32].mxu0 }
 0x29d   :  { %v1360_v3 = vpop.f32.mrb[33].mxu0  ;;  %v1448_v4 = vadd.f32 %v6169_v2, %v7886_v1 }
 0x29e   :  { %v1446_v5 = vadd.f32 %v7886_v1, %v1360_v3  ;;  %v6170_v6 = vpop.f32.mrb[34].mxu0 }
 0x29f   :  { %v1449_v7 = vadd.f32 %v6170_v6, %v7886_v1  ;;  %v1363_v8 = vpop.f32.mrb[35].mxu0  ;;  %v1480_v11 = vmul.f32 0.01, %v1448_v4  ;;  %vm1464_vm4 = vcmp.gt.f32.partialorder %v1448_v4, 0.0 }
 0x2a0   :  { %v1478_v57 = vmul.f32 0.01, %v1446_v5  ;;  %v1447_v9 = vadd.f32 %v7886_v1, %v1363_v8  ;;  %vm1462_vm1 = vcmp.gt.f32.partialorder %v1446_v5, 0.0 }
 0x2a1   :  { %vm1465_vm2 = vcmp.gt.f32.partialorder %v1449_v7, 0.0  ;;  %v1481_v10 = vmul.f32 0.01, %v1449_v7  ;;  %v7902_v24 = vsel %vm1464_vm4, %v1448_v4, %v1480_v11 }
 0x2a2   :  { %vm1463_vm3 = vcmp.gt.f32.partialorder %v1447_v9, 0.0  ;;  %v1479_v12 = vmul.f32 0.01, %v1447_v9  ;;  %v7892_v13 = vsel %vm1462_vm1, %v1446_v5, %v1478_v57  ;;  %9278 = vst [vmem:[#allocation23_spill] sm:$0xff] %v7902_v24  ;;  %v7966_v57 = vld [vmem:[%s9182_s13] ss:$0 sm:$0xff] }
 0x2a3   :  { %9275 = vst [vmem:[#allocation20_spill] sm:$0xff] %v7892_v13  ;;  %v7894_v17 = vsel %vm1465_vm2, %v1449_v7, %v1481_v10 }
 0x2a4   :  { %9276 = vst [vmem:[#allocation21_spill] sm:$0xff] %v7894_v17  ;;  %v7896_v18 = vsel %vm1463_vm3, %v1447_v9, %v1479_v12  ;;  %v6173_v20 = vpop.f32.mrb[36].mxu0  ;;  %v7908_v27 = vpack.c.bf16 %v7894_v17, %v7902_v24 }
 0x2a5   :  { %9277 = vst [vmem:[#allocation22_spill] sm:$0xff] %v7896_v18  ;;  %v7900_v21 = vpack.c.bf16 %v7896_v18, %v7892_v13  ;;  %v1376_v22 = vpop.f32.mrb[37].mxu0  ;;  %v1452_v25 = vadd.f32 %v6173_v20, %v7886_v1 }
 0x2a6   :  { %v1450_v26 = vadd.f32 %v7886_v1, %v1376_v22  ;;  %v6174_v23 = vpop.f32.mrb[38].mxu0 }
 0x2a7   :  { %v1453_v28 = vadd.f32 %v6174_v23, %v7886_v1  ;;  %v1379_v29 = vpop.f32.mrb[39].mxu0  ;;  %6255 = vmatprep.subr.bf16.mxu0 %v7900_v21  ;;  %v1484_v33 = vmul.f32 0.01, %v1452_v25  ;;  %vm1468_vm8 = vcmp.gt.f32.partialorder %v1452_v25, 0.0 }
 0x2a8   :  { %v1482_v30 = vmul.f32 0.01, %v1450_v26  ;;  %v1451_v31 = vadd.f32 %v7886_v1, %v1379_v29  ;;  %6256 = vmatpush3.bf16.msra.mxu0 %v7900_v21  ;;  %vm1466_vm5 = vcmp.gt.f32.partialorder %v1450_v26, 0.0 }
 0x2a9   :  { %vm1469_vm6 = vcmp.gt.f32.partialorder %v1453_v28, 0.0  ;;  %v1485_v32 = vmul.f32 0.01, %v1453_v28  ;;  %6257 = vmatprep.subr.bf16.mxu0 %v7908_v27  ;;  %v7926_v35 = vsel %vm1468_vm8, %v1452_v25, %v1484_v33 }
 0x2aa   :  { %vm1467_vm7 = vcmp.gt.f32.partialorder %v1451_v31, 0.0  ;;  %v1483_v34 = vmul.f32 0.01, %v1451_v31  ;;  %v7915_v36 = vsel %vm1466_vm5, %v1450_v26, %v1482_v30  ;;  %9282 = vst [vmem:[#allocation27_spill] sm:$0xff] %v7926_v35 }
 0x2ab   :  { %9279 = vst [vmem:[#allocation24_spill] sm:$0xff] %v7915_v36  ;;  %v7917_v37 = vsel %vm1469_vm6, %v1453_v28, %v1485_v32 }
 0x2ac   :  { %9280 = vst [vmem:[#allocation25_spill] sm:$0xff] %v7917_v37  ;;  %v7919_v38 = vsel %vm1467_vm7, %v1451_v31, %v1483_v34  ;;  %v6177_v39 = vpop.f32.mrb[40].mxu0  ;;  %6258 = vmatpush3.bf16.msra.mxu0 %v7908_v27  ;;  %v7932_v45 = vpack.c.bf16 %v7917_v37, %v7926_v35 }
 0x2ad   :  { %9281 = vst [vmem:[#allocation26_spill] sm:$0xff] %v7919_v38  ;;  %v7924_v42 = vpack.c.bf16 %v7919_v38, %v7915_v36  ;;  %v1392_v43 = vpop.f32.mrb[41].mxu0  ;;  %v1456_v40 = vadd.f32 %v6177_v39, %v7886_v1 }
 0x2ae   :  { %v1454_v41 = vadd.f32 %v7886_v1, %v1392_v43  ;;  %v6178_v44 = vpop.f32.mrb[42].mxu0 }
 0x2af   :  { %v1457_v46 = vadd.f32 %v6178_v44, %v7886_v1  ;;  %v1395_v51 = vpop.f32.mrb[43].mxu0  ;;  %6259 = vmatprep.subr.bf16.mxu0 %v7924_v42  ;;  %v1488_v54 = vmul.f32 0.01, %v1456_v40  ;;  %vm1472_vm12 = vcmp.gt.f32.partialorder %v1456_v40, 0.0 }
 0x2b0   :  { %v1486_v52 = vmul.f32 0.01, %v1454_v41  ;;  %v1455_v53 = vadd.f32 %v7886_v1, %v1395_v51  ;;  %6260 = vmatpush3.bf16.msra.mxu0 %v7924_v42  ;;  %vm1470_vm9 = vcmp.gt.f32.partialorder %v1454_v41, 0.0 }
 0x2b1   :  { %vm1473_vm10 = vcmp.gt.f32.partialorder %v1457_v46, 0.0  ;;  %v1489_v47 = vmul.f32 0.01, %v1457_v46  ;;  %6261 = vmatprep.subr.bf16.mxu0 %v7932_v45  ;;  %v7950_v19 = vsel %vm1472_vm12, %v1456_v40, %v1488_v54 }
 0x2b2   :  { %vm1471_vm11 = vcmp.gt.f32.partialorder %v1455_v53, 0.0  ;;  %v1487_v55 = vmul.f32 0.01, %v1455_v53  ;;  %v7939_v56 = vsel %vm1470_vm9, %v1454_v41, %v1486_v52  ;;  %9286 = vst [vmem:[#allocation31_spill] sm:$0xff] %v7950_v19 }
 0x2b3   :  { %9283 = vst [vmem:[#allocation28_spill] sm:$0xff] %v7939_v56  ;;  %v7941_v58 = vsel %vm1473_vm10, %v1457_v46, %v1489_v47 }
 0x2b4   :  { %9284 = vst [vmem:[#allocation29_spill] sm:$0xff] %v7941_v58  ;;  %v7943_v59 = vsel %vm1471_vm11, %v1455_v53, %v1487_v55  ;;  %v6181_v60 = vpop.f32.mrb[44].mxu0  ;;  %6262 = vmatpush3.bf16.msra.mxu0 %v7932_v45  ;;  %v7956_v63 = vpack.c.bf16 %v7941_v58, %v7950_v19 }
 0x2b5   :  { %9285 = vst [vmem:[#allocation30_spill] sm:$0xff] %v7943_v59  ;;  %v7948_v14 = vpack.c.bf16 %v7943_v59, %v7939_v56  ;;  %v1408_v16 = vpop.f32.mrb[45].mxu0  ;;  %v1460_v15 = vadd.f32 %v6181_v60, %v7886_v1 }
 0x2b6   :  { %v1458_v61 = vadd.f32 %v7886_v1, %v1408_v16  ;;  %v6182_v62 = vpop.f32.mrb[46].mxu0 }
 0x2b7   :  { %v1461_v2 = vadd.f32 %v6182_v62, %v7886_v1  ;;  %v1411_v3 = vpop.f32.mrb[47].mxu0  ;;  %6263 = vmatprep.subr.bf16.mxu0 %v7948_v14  ;;  %v1492_v7 = vmul.f32 0.01, %v1460_v15  ;;  %vm1476_vm1 = vcmp.gt.f32.partialorder %v1460_v15, 0.0 }
 0x2b8   :  { %v1490_v4 = vmul.f32 0.01, %v1458_v61  ;;  %v1459_v5 = vadd.f32 %v7886_v1, %v1411_v3  ;;  %6264 = vmatpush3.bf16.msra.mxu0 %v7948_v14  ;;  %vm1474_vm13 = vcmp.gt.f32.partialorder %v1458_v61, 0.0 }
 0x2b9   :  { %vm1477_vm14 = vcmp.gt.f32.partialorder %v1461_v2, 0.0  ;;  %v1493_v6 = vmul.f32 0.01, %v1461_v2  ;;  %6265 = vmatprep.subr.bf16.mxu0 %v7956_v63  ;;  %v7979_v22 = vsel %vm1476_vm1, %v1460_v15, %v1492_v7  ;;  %v8014_v15 = vld [vmem:[#allocation2 + $0x8] sm:$0xff]  }
 0x2ba   :  { %vm1475_vm15 = vcmp.gt.f32.partialorder %v1459_v5, 0.0  ;;  %v1491_v8 = vmul.f32 0.01, %v1459_v5  ;;  %v7968_v9 = vsel %vm1474_vm13, %v1458_v61, %v1490_v4  ;;  %9290 = vst [vmem:[#allocation35_spill] sm:$0xff] %v7979_v22  ;;  %9295 = vst [vmem:[#allocation40_spill] sm:$0xff] %v8014_v15 }
 0x2bb   :  { %9287 = vst [vmem:[#allocation32_spill] sm:$0xff] %v7968_v9  ;;  %v7970_v10 = vsel %vm1477_vm14, %v1461_v2, %v1493_v6 }
 0x2bc   :  { %9288 = vst [vmem:[#allocation33_spill] sm:$0xff] %v7970_v10  ;;  %v7972_v1 = vsel %vm1475_vm15, %v1459_v5, %v1491_v8  ;;  %v6241_v11 = vpop.f32.mrb[32].mxu1  ;;  %6266 = vmatpush3.bf16.msra.mxu0 %v7956_v63  ;;  %v7985_v28 = vpack.c.bf16 %v7970_v10, %v7979_v22  ;;  %v8022_v5 = vld [vmem:[#allocation2 + $0x10] sm:$0xff]   ;;  %v7083_v10 = vld [vmem:[#allocation12 + $0x38] sm:$0xff]  }
 0x2bd   :  { %9289 = vst [vmem:[#allocation34_spill] sm:$0xff] %v7972_v1  ;;  %v7977_v12 = vpack.c.bf16 %v7972_v1, %v7968_v9  ;;  %v1906_v20 = vpop.f32.mrb[33].mxu1  ;;  %v1994_v25 = vadd.f32 %v6241_v11, %v7966_v57  ;;  %9296 = vst [vmem:[#allocation41_spill] sm:$0xff] %v8022_v5  ;;  %v7080_v1 = vld [vmem:[#allocation12 + $0x30] sm:$0xff]   ;;  %v8216_v9 = vld [vmem:[#allocation10 + $0x20] sm:$0xff]  }
 0x2be   :  { %v1992_v26 = vadd.f32 %v7966_v57, %v1906_v20  ;;  %v6242_v23 = vpop.f32.mrb[34].mxu1 }
 0x2bf   :  { %v1995_v29 = vadd.f32 %v6242_v23, %v7966_v57  ;;  %v1909_v30 = vpop.f32.mrb[35].mxu1  ;;  %6267 = vmatprep.subr.bf16.mxu0 %v7977_v12  ;;  %v2026_v34 = vmul.f32 0.01, %v1994_v25  ;;  %vm2010_vm5 = vcmp.gt.f32.partialorder %v1994_v25, 0.0 }
 0x2c0   :  { %v2024_v31 = vmul.f32 0.01, %v1992_v26  ;;  %v1993_v32 = vadd.f32 %v7966_v57, %v1909_v30  ;;  %6268 = vmatpush3.bf16.msra.mxu0 %v7977_v12  ;;  %vm2008_vm2 = vcmp.gt.f32.partialorder %v1992_v26, 0.0 }
 0x2c1   :  { %vm2011_vm3 = vcmp.gt.f32.partialorder %v1995_v29, 0.0  ;;  %v2027_v33 = vmul.f32 0.01, %v1995_v29  ;;  %6269 = vmatprep.subr.bf16.mxu0 %v7985_v28  ;;  %v8004_v52 = vsel %vm2010_vm5, %v1994_v25, %v2026_v34  ;;  %v8048_v34 = vld [vmem:[#allocation2 + $0x18] sm:$0xff]  }
 0x2c2   :  { %vm2009_vm4 = vcmp.gt.f32.partialorder %v1993_v32, 0.0  ;;  %v2025_v39 = vmul.f32 0.01, %v1993_v32  ;;  %v7992_v43 = vsel %vm2008_vm2, %v1992_v26, %v2024_v31  ;;  %9294 = vst [vmem:[#allocation39_spill] sm:$0xff] %v8004_v52  ;;  %9301 = vst [vmem:[#allocation46_spill] sm:$0xff] %v8048_v34 }
 0x2c3   :  { %9291 = vst [vmem:[#allocation36_spill] sm:$0xff] %v7992_v43  ;;  %v7994_v40 = vsel %vm2011_vm3, %v1995_v29, %v2027_v33 }
 0x2c4   :  { %9292 = vst [vmem:[#allocation37_spill] sm:$0xff] %v7994_v40  ;;  %v7996_v41 = vsel %vm2009_vm4, %v1993_v32, %v2025_v39  ;;  %v6245_v44 = vpop.f32.mrb[36].mxu1  ;;  %6270 = vmatpush3.bf16.msra.mxu0 %v7985_v28  ;;  %v8010_v55 = vpack.c.bf16 %v7994_v40, %v8004_v52  ;;  %v7077_v40 = vld [vmem:[#allocation12 + $0x20] sm:$0xff]  }
 0x2c5   :  { %9293 = vst [vmem:[#allocation38_spill] sm:$0xff] %v7996_v41  ;;  %v8001_v46 = vpack.c.bf16 %v7996_v41, %v7992_v43  ;;  %v1922_v51 = vpop.f32.mrb[37].mxu1  ;;  %6319 = vmatprep.subr.bf16.mxu0 %v7900_v21  ;;  %v1998_v53 = vadd.f32 %v6245_v44, %v7966_v57  ;;  %v7076_v41 = vld [vmem:[%s9176_s7 + $0x38] sm:$0xff]   ;;  %v7078_v43 = vld [vmem:[#allocation12 + $0x28] sm:$0xff]   ;;  %v7079_v52 = vld [vmem:[%s9175_s6 + $0x20] sm:$0xff]  }
 0x2c6   :  { %v1996_v47 = vadd.f32 %v7966_v57, %v1922_v51  ;;  %v6246_v54 = vpop.f32.mrb[38].mxu1 }
 0x2c7   :  { %v1999_v60 = vadd.f32 %v6246_v54, %v7966_v57  ;;  %v1925_v16 = vpop.f32.mrb[39].mxu1  ;;  %6287 = vmatprep.subr.bf16.mxu1 %v8001_v46  ;;  %6272 = vmatmul.mubr.bf16.vlgmr.msra.gmra.mrb[48].mxu0 %v8014_v15  ;;  %v2030_v3 = vmul.f32 0.01, %v1998_v53  ;;  %vm2014_vm9 = vcmp.gt.f32.partialorder %v1998_v53, 0.0  ;;  %v8056_v54 = vld [vmem:[#allocation2 + $0x20] sm:$0xff]   ;;  %v7086_v15 = vld [vmem:[#allocation10 + $0x28] sm:$0xff]  }
 0x2c8   :  { %v2028_v61 = vmul.f32 0.01, %v1996_v47  ;;  %v1997_v62 = vadd.f32 %v7966_v57, %v1925_v16  ;;  %6288 = vmatpush3.bf16.msra.mxu1 %v8001_v46  ;;  %6320 = vmatpush3.bf16.msra.mxu0 %v7900_v21  ;;  %vm2012_vm6 = vcmp.gt.f32.partialorder %v1996_v47, 0.0  ;;  %9302 = vst [vmem:[#allocation47_spill] sm:$0xff] %v8056_v54 }
 0x2c9   :  { %vm2015_vm7 = vcmp.gt.f32.partialorder %v1999_v60, 0.0  ;;  %v2031_v2 = vmul.f32 0.01, %v1999_v60  ;;  %6289 = vmatprep.subr.bf16.mxu1 %v8010_v55  ;;  %6321 = vmatprep.subr.bf16.mxu0 %v7908_v27  ;;  %v8038_v26 = vsel %vm2014_vm9, %v1998_v53, %v2030_v3 }
 0x2ca   :  { %vm2013_vm8 = vcmp.gt.f32.partialorder %v1997_v62, 0.0  ;;  %v2029_v4 = vmul.f32 0.01, %v1997_v62  ;;  %6275 = vmatprep.mubr.bf16.mxu0 %v8022_v5  ;;  %v8025_v6 = vsel %vm2012_vm6, %v1996_v47, %v2028_v61  ;;  %9300 = vst [vmem:[#allocation45_spill] sm:$0xff] %v8038_v26 }
 0x2cb   :  { %9297 = vst [vmem:[#allocation42_spill] sm:$0xff] %v8025_v6  ;;  %v8027_v7 = vsel %vm2015_vm7, %v1999_v60, %v2031_v2 }
 0x2cc   :  { %9298 = vst [vmem:[#allocation43_spill] sm:$0xff] %v8027_v7  ;;  %v8029_v8 = vsel %vm2013_vm8, %v1997_v62, %v2029_v4  ;;  %v6249_v11 = vpop.f32.mrb[40].mxu1  ;;  %6290 = vmatpush3.bf16.msra.mxu1 %v8010_v55  ;;  %6322 = vmatpush3.bf16.msra.mxu0 %v7908_v27  ;;  %v8044_v31 = vpack.c.bf16 %v8027_v7, %v8038_v26  ;;  %v8201_v7 = vld [vmem:[#allocation7 + $0x28] sm:$0xff]   ;;  %v8207_v26 = vld [vmem:[#allocation7 + $0x38] sm:$0xff]  }
 0x2cd   :  { %9299 = vst [vmem:[#allocation44_spill] sm:$0xff] %v8029_v8  ;;  %v8035_v20 = vpack.c.bf16 %v8029_v8, %v8025_v6  ;;  %v1938_v25 = vpop.f32.mrb[41].mxu1  ;;  %6323 = vmatprep.subr.bf16.mxu0 %v7924_v42  ;;  %v2002_v23 = vadd.f32 %v6249_v11, %v7966_v57  ;;  %v8195_v8 = vld [vmem:[#allocation7 + $0x18] sm:$0xff]   ;;  %9331 = vst [vmem:[#allocation76_spill] sm:$0xff] %v8201_v7  ;;  %v8204_v6 = vld [vmem:[#allocation7 + $0x30] sm:$0xff]  }
 0x2ce   :  { %v2000_v29 = vadd.f32 %v7966_v57, %v1938_v25  ;;  %v6250_v30 = vpop.f32.mrb[42].mxu1  ;;  %9329 = vst [vmem:[#allocation74_spill] sm:$0xff] %v8195_v8  ;;  %9332 = vst [vmem:[#allocation77_spill] sm:$0xff] %v8204_v6 }
 0x2cf   :  { %v2003_v32 = vadd.f32 %v6250_v30, %v7966_v57  ;;  %v1941_v33 = vpop.f32.mrb[43].mxu1  ;;  %6291 = vmatprep.subr.bf16.mxu1 %v8035_v20  ;;  %6276 = vmatmul.mubr.bf16.gmra.mrb[52].mxu0 %v8048_v34  ;;  %v2034_v53 = vmul.f32 0.01, %v2002_v23  ;;  %vm2018_vm13 = vcmp.gt.f32.partialorder %v2002_v23, 0.0  ;;  %9333 = vst [vmem:[#allocation78_spill] sm:$0xff] %v8207_v26 }
 0x2d0   :  { %v2032_v39 = vmul.f32 0.01, %v2000_v29  ;;  %v2001_v44 = vadd.f32 %v7966_v57, %v1941_v33  ;;  %6292 = vmatpush3.bf16.msra.mxu1 %v8035_v20  ;;  %6324 = vmatpush3.bf16.msra.mxu0 %v7924_v42  ;;  %vm2016_vm10 = vcmp.gt.f32.partialorder %v2000_v29, 0.0 }
 0x2d1   :  { %vm2019_vm11 = vcmp.gt.f32.partialorder %v2003_v32, 0.0  ;;  %v2035_v51 = vmul.f32 0.01, %v2003_v32  ;;  %6293 = vmatprep.subr.bf16.mxu1 %v8044_v31  ;;  %6325 = vmatprep.subr.bf16.mxu0 %v7932_v45  ;;  %v8072_v4 = vsel %vm2018_vm13, %v2002_v23, %v2034_v53 }
 0x2d2   :  { %vm2017_vm12 = vcmp.gt.f32.partialorder %v2001_v44, 0.0  ;;  %v2033_v47 = vmul.f32 0.01, %v2001_v44  ;;  %6279 = vmatprep.mubr.bf16.mxu0 %v8056_v54  ;;  %v8059_v60 = vsel %vm2016_vm10, %v2000_v29, %v2032_v39  ;;  %9306 = vst [vmem:[#allocation51_spill] sm:$0xff] %v8072_v4  ;;  %v8082_v39 = vld [vmem:[#allocation2 + $0x28] sm:$0xff]  }
 0x2d3   :  { %9303 = vst [vmem:[#allocation48_spill] sm:$0xff] %v8059_v60  ;;  %v8061_v16 = vsel %vm2019_vm11, %v2003_v32, %v2035_v51  ;;  %9307 = vst [vmem:[#allocation52_spill] sm:$0xff] %v8082_v39 }
 0x2d4   :  { %9304 = vst [vmem:[#allocation49_spill] sm:$0xff] %v8061_v16  ;;  %v8063_v61 = vsel %vm2017_vm12, %v2001_v44, %v2033_v47  ;;  %v6253_v62 = vpop.f32.mrb[44].mxu1  ;;  %6294 = vmatpush3.bf16.msra.mxu1 %v8044_v31  ;;  %6326 = vmatpush3.bf16.msra.mxu0 %v7932_v45  ;;  %v8078_v30 = vpack.c.bf16 %v8061_v16, %v8072_v4  ;;  %v8167_v16 = vld [vmem:[#allocation4 + $0x28] sm:$0xff]   ;;  %v8192_v4 = vld [vmem:[#allocation7 + $0x10] sm:$0xff]  }
 0x2d5   :  { %9305 = vst [vmem:[#allocation50_spill] sm:$0xff] %v8063_v61  ;;  %v8069_v2 = vpack.c.bf16 %v8063_v61, %v8059_v60  ;;  %v1954_v3 = vpop.f32.mrb[45].mxu1  ;;  %6327 = vmatprep.subr.bf16.mxu0 %v7948_v14  ;;  %v2006_v11 = vadd.f32 %v6253_v62, %v7966_v57  ;;  %v8090_v62 = vld [vmem:[#allocation2 + $0x30] sm:$0xff]   ;;  %9323 = vst [vmem:[#allocation68_spill] sm:$0xff] %v8167_v16 }
 0x2d6   :  { %v2004_v25 = vadd.f32 %v7966_v57, %v1954_v3  ;;  %v6254_v29 = vpop.f32.mrb[46].mxu1  ;;  %9308 = vst [vmem:[#allocation53_spill] sm:$0xff] %v8090_v62  ;;  %v8172_v60 = vld [vmem:[#allocation4 + $0x30] sm:$0xff]   ;;  %9328 = vst [vmem:[#allocation73_spill] sm:$0xff] %v8192_v4 }
 0x2d7   :  { %v2007_v32 = vadd.f32 %v6254_v29, %v7966_v57  ;;  %v1957_v33 = vpop.f32.mrb[47].mxu1  ;;  %6295 = vmatprep.subr.bf16.mxu1 %v8069_v2  ;;  %6280 = vmatmul.mubr.bf16.gmra.mrb[56].mxu0 %v8082_v39  ;;  %v2038_v53 = vmul.f32 0.01, %v2006_v11  ;;  %vm2022_vm2 = vcmp.gt.f32.partialorder %v2006_v11, 0.0  ;;  %9324 = vst [vmem:[#allocation69_spill] sm:$0xff] %v8172_v60 }
 0x2d8   :  { %v2036_v23 = vmul.f32 0.01, %v2004_v25  ;;  %v2005_v44 = vadd.f32 %v7966_v57, %v1957_v33  ;;  %6296 = vmatpush3.bf16.msra.mxu1 %v8069_v2  ;;  %6328 = vmatpush3.bf16.msra.mxu0 %v7948_v14  ;;  %vm2020_vm14 = vcmp.gt.f32.partialorder %v2004_v25, 0.0 }
 0x2d9   :  { %vm2023_vm15 = vcmp.gt.f32.partialorder %v2007_v32, 0.0  ;;  %v2039_v51 = vmul.f32 0.01, %v2007_v32  ;;  %6297 = vmatprep.subr.bf16.mxu1 %v8078_v30  ;;  %6329 = vmatprep.subr.bf16.mxu0 %v7956_v63  ;;  %v8106_v61 = vsel %vm2022_vm2, %v2006_v11, %v2038_v53  ;;  %v7073_v11 = vld [vmem:[%s9176_s7 + $0x20] sm:$0xff]   ;;  %v7074_v53 = vld [vmem:[%s9176_s7 + $0x28] sm:$0xff]  }
 0x2da   :  { %vm2021_vm1 = vcmp.gt.f32.partialorder %v2005_v44, 0.0  ;;  %v2037_v47 = vmul.f32 0.01, %v2005_v44  ;;  %6283 = vmatprep.mubr.bf16.mxu0 %v8090_v62  ;;  %v8093_v57 = vsel %vm2020_vm14, %v2004_v25, %v2036_v23  ;;  %9312 = vst [vmem:[#allocation57_spill] sm:$0xff] %v8106_v61  ;;  %v8123_v23 = vld [vmem:[#allocation6] sm:$0xff]  }
 0x2db   :  { %9309 = vst [vmem:[#allocation54_spill] sm:$0xff] %v8093_v57  ;;  %v8095_v3 = vsel %vm2023_vm15, %v2007_v32, %v2039_v51  ;;  %v8113_v32 = vld [vmem:[#allocation2 + $0x38] sm:$0xff]   ;;  %9314 = vst [vmem:[#allocation59_spill] sm:$0xff] %v8123_v23  ;;  %v8132_v51 = vld [vmem:[#allocation6 + $0x8] sm:$0xff]  }
 0x2dc   :  { %9310 = vst [vmem:[#allocation55_spill] sm:$0xff] %v8095_v3  ;;  %v8097_v29 = vsel %vm2021_vm1, %v2005_v44, %v2037_v47  ;;  %6298 = vmatpush3.bf16.msra.mxu1 %v8078_v30  ;;  %6330 = vmatpush3.bf16.msra.mxu0 %v7956_v63  ;;  %v8110_v25 = vpack.c.bf16 %v8095_v3, %v8106_v61  ;;  %9313 = vst [vmem:[#allocation58_spill] sm:$0xff] %v8113_v32  ;;  %v8129_v44 = vld [vmem:[#allocation4 + $0x8] sm:$0xff]   ;;  %v8139_v47 = vld [vmem:[#allocation4 + $0x10] sm:$0xff]  }
 0x2dd   :  { %9311 = vst [vmem:[#allocation56_spill] sm:$0xff] %v8097_v29  ;;  %v8103_v33 = vpack.c.bf16 %v8097_v29, %v8093_v57  ;;  %6331 = vmatprep.subr.bf16.mxu0 %v7977_v12  ;;  %9315 = vst [vmem:[#allocation60_spill] sm:$0xff] %v8129_v44  ;;  %v8143_v29 = vld [vmem:[#allocation6 + $0x10] sm:$0xff]   ;;  %v8151_v57 = vld [vmem:[#allocation4 + $0x18] sm:$0xff]  }
 0x2de   :  { %9316 = vst [vmem:[#allocation61_spill] sm:$0xff] %v8132_v51  ;;  %9317 = vst [vmem:[#allocation62_spill] sm:$0xff] %v8139_v47  ;;  %v7075_v3 = vld [vmem:[%s9176_s7 + $0x30] sm:$0xff]   ;;  %v8154_v61 = vld [vmem:[#allocation6 + $0x18] sm:$0xff]  }
 0x2df   :  { %6299 = vmatprep.subr.bf16.mxu1 %v8103_v33  ;;  %6284 = vmatmul.mubr.bf16.gmra.mrb[60].mxu0 %v8113_v32  ;;  %9318 = vst [vmem:[#allocation63_spill] sm:$0xff] %v8143_v29  ;;  %9319 = vst [vmem:[#allocation64_spill] sm:$0xff] %v8151_v57 }
 0x2e0   :  { %6300 = vmatpush3.bf16.msra.mxu1 %v8103_v33  ;;  %6332 = vmatpush3.bf16.msra.mxu0 %v7977_v12  ;;  %9320 = vst [vmem:[#allocation65_spill] sm:$0xff] %v8154_v61 }
 0x2e1   :  { %6301 = vmatprep.subr.bf16.mxu1 %v8110_v25  ;;  %6333 = vmatprep.subr.bf16.mxu0 %v7985_v28 }
 0x2e2   :  { %6335 = vmatprep.mubr.bf16.mxu0 %v8123_v23 }
 0x2e4   :  { %6302 = vmatpush3.bf16.msra.mxu1 %v8110_v25  ;;  %6334 = vmatpush3.bf16.msra.mxu0 %v7985_v28 }
 0x2e5   :  { %6351 = vmatprep.subr.bf16.mxu1 %v8001_v46  ;;  %6383 = vmatprep.subr.bf16.mxu0 %v7073_v11 }
 0x2e7   :  { %6304 = vmatmul.mubr.bf16.vlgmr.msra.gmra.mrb[48].mxu1 %v8129_v44  ;;  %6336 = vmatmul.mubr.bf16.vlgmr.msra.gmra.mrb[64].mxu0 %v8132_v51 }
 0x2e8   :  { %6352 = vmatpush3.bf16.msra.mxu1 %v8001_v46  ;;  %6307 = vmatprep.mubr.bf16.mxu1 %v8139_v47 }
 0x2e9   :  { %6353 = vmatprep.subr.bf16.mxu1 %v8010_v55  ;;  %6339 = vmatprep.mubr.bf16.mxu0 %v8143_v29  ;;  %v7084_v29 = vld [vmem:[%s9175_s6 + $0x38] sm:$0xff]  }
 0x2ea   :  { %6384 = vmatpush3.bf16.msra.mxu0 %v7073_v11  ;;  %v8158_v11 = vld [vmem:[#allocation4 + $0x20] sm:$0xff]  }
 0x2eb   :  { %6385 = vmatprep.subr.bf16.mxu0 %v7074_v53  ;;  %9321 = vst [vmem:[#allocation66_spill] sm:$0xff] %v8158_v11 }
 0x2ec   :  { %6354 = vmatpush3.bf16.msra.mxu1 %v8010_v55 }
 0x2ed   :  { %6355 = vmatprep.subr.bf16.mxu1 %v8035_v20 }
 0x2ee   :  { %6386 = vmatpush3.bf16.msra.mxu0 %v7074_v53  ;;  %v8162_v53 = vld [vmem:[#allocation6 + $0x20] sm:$0xff]  }
 0x2ef   :  { %6308 = vmatmul.mubr.bf16.gmra.mrb[52].mxu1 %v8151_v57  ;;  %6340 = vmatmul.mubr.bf16.gmra.mrb[68].mxu0 %v8154_v61  ;;  %9322 = vst [vmem:[#allocation67_spill] sm:$0xff] %v8162_v53 }
 0x2f0   :  { %6356 = vmatpush3.bf16.msra.mxu1 %v8035_v20  ;;  %6311 = vmatprep.mubr.bf16.mxu1 %v8158_v11 }
 0x2f1   :  { %6357 = vmatprep.subr.bf16.mxu1 %v8044_v31  ;;  %6343 = vmatprep.mubr.bf16.mxu0 %v8162_v53 }
 0x2f2   :  { %6387 = vmatprep.subr.bf16.mxu0 %v7075_v3 }
 0x2f3   :  { %6388 = vmatpush3.bf16.msra.mxu0 %v7075_v3  ;;  %v8179_v3 = vld [vmem:[#allocation4 + $0x38] sm:$0xff]  }
 0x2f4   :  { %6358 = vmatpush3.bf16.msra.mxu1 %v8044_v31  ;;  %9325 = vst [vmem:[#allocation70_spill] sm:$0xff] %v8179_v3  ;;  %6389 = vmatprep.subr.bf16.mxu0 %v7076_v41 }
 0x2f5   :  { %6359 = vmatprep.subr.bf16.mxu1 %v8069_v2 }
 0x2f7   :  { %6312 = vmatmul.mubr.bf16.gmra.mrb[56].mxu1 %v8167_v16  ;;  %6344 = vmatmul.mubr.bf16.gmra.mrb[72].mxu0 %v7722_v48  ;;  %v8184_v48 = vld [vmem:[#allocation7] sm:$0xff]   ;;  %v7081_v16 = vld [vmem:[%s9175_s6 + $0x28] sm:$0xff]  }
 0x2f8   :  { %6360 = vmatpush3.bf16.msra.mxu1 %v8069_v2  ;;  %6315 = vmatprep.mubr.bf16.mxu1 %v8172_v60  ;;  %9326 = vst [vmem:[#allocation71_spill] sm:$0xff] %v8184_v48 }
 0x2f9   :  { %6361 = vmatprep.subr.bf16.mxu1 %v8078_v30  ;;  %6347 = vmatprep.mubr.bf16.mxu0 %v7724_v49  ;;  %v8189_v49 = vld [vmem:[#allocation7 + $0x8] sm:$0xff]  }
 0x2fa   :  { %9327 = vst [vmem:[#allocation72_spill] sm:$0xff] %v8189_v49  ;;  %6390 = vmatpush3.bf16.msra.mxu0 %v7076_v41 }
 0x2fb   :  { %6407 = vmatprep.subr.bf16.mxu0 %v7079_v52 }
 0x2fc   :  { %6362 = vmatpush3.bf16.msra.mxu1 %v8078_v30 }
 0x2fd   :  { %6363 = vmatprep.subr.bf16.mxu1 %v8103_v33 }
 0x2ff   :  { %6316 = vmatmul.mubr.bf16.gmra.mrb[60].mxu1 %v8179_v3  ;;  %6348 = vmatmul.mubr.bf16.gmra.mrb[76].mxu0 %v7728_v50  ;;  %v8198_v50 = vld [vmem:[#allocation7 + $0x20] sm:$0xff]  }
 0x300   :  { %6364 = vmatpush3.bf16.msra.mxu1 %v8103_v33  ;;  %6367 = vmatprep.mubr.bf16.mxu1 %v8184_v48  ;;  %9330 = vst [vmem:[#allocation75_spill] sm:$0xff] %v8198_v50 }
 0x301   :  { %6365 = vmatprep.subr.bf16.mxu1 %v8110_v25 }
 0x304   :  { %6366 = vmatpush3.bf16.msra.mxu1 %v8110_v25 }
 0x305   :  { %6455 = vmatprep.subr.bf16.mxu1 %v7077_v40 }
 0x307   :  { %6368 = vmatmul.mubr.bf16.vlgmr.msra.gmra.mrb[64].mxu1 %v8189_v49 }
 0x308   :  { %6371 = vmatprep.mubr.bf16.mxu1 %v8192_v4  ;;  %6456 = vmatpush3.bf16.msra.mxu1 %v7077_v40 }
 0x309   :  { %6457 = vmatprep.subr.bf16.mxu1 %v7078_v43 }
 0x30c   :  { %6458 = vmatpush3.bf16.msra.mxu1 %v7078_v43 }
 0x30d   :  { %6459 = vmatprep.subr.bf16.mxu1 %v7080_v1 }
 0x30f   :  { %6372 = vmatmul.mubr.bf16.gmra.mrb[68].mxu1 %v8195_v8 }
 0x310   :  { %6375 = vmatprep.mubr.bf16.mxu1 %v8198_v50  ;;  %6460 = vmatpush3.bf16.msra.mxu1 %v7080_v1 }
 0x311   :  { %6461 = vmatprep.subr.bf16.mxu1 %v7083_v10 }
 0x314   :  { %6462 = vmatpush3.bf16.msra.mxu1 %v7083_v10 }
 0x315   :  { %6479 = vmatprep.subr.bf16.mxu1 %v8216_v9 }
 0x317   :  { %6376 = vmatmul.mubr.bf16.gmra.mrb[72].mxu1 %v8201_v7 }
 0x318   :  { %6379 = vmatprep.mubr.bf16.mxu1 %v8204_v6 }
 0x31f   :  { %6380 = vmatmul.mubr.bf16.gmra.mrb[76].mxu1 %v8207_v26 }
 0x39a   :  { %v8219_v41 = vpop.f32.mrb[48].mxu0 }
 0x39b   :  { %v8221_v40 = vpop.f32.mrb[49].mxu0 }
 0x39c   :  { %v8223_v43 = vpop.f32.mrb[50].mxu0 }
 0x39d   :  { %v8227_v59 = vpop.f32.mrb[51].mxu0 }
 0x39e   :  { %v9334_v54 = vpack.c.bf16 %v8227_v59, %v8221_v40  ;;  %v7088_v40 = vld [vmem:[#allocation10 + $0x30] sm:$0xff]  }
 0x3a2   :  { %v8231_v58 = vpop.f32.mrb[52].mxu0 }
 0x3a3   :  { %v8233_v10 = vpop.f32.mrb[53].mxu0 }
 0x3a4   :  { %v8235_v56 = vpop.f32.mrb[54].mxu0 }
 0x3a5   :  { %v8239_v38 = vpop.f32.mrb[55].mxu0 }
 0x3a6   :  { %v9336_v59 = vpack.c.bf16 %v8239_v38, %v8233_v10  ;;  %v7092_v38 = vld [vmem:[#allocation9 + $0x38] sm:$0xff]  }
 0x3aa   :  { %v8243_v22 = vpop.f32.mrb[56].mxu0 }
 0x3ab   :  { %v8245_v36 = vpop.f32.mrb[57].mxu0 }
 0x3ac   :  { %v8247_v35 = vpop.f32.mrb[58].mxu0 }
 0x3ad   :  { %v8251_v18 = vpop.f32.mrb[59].mxu0 }
 0x3b2   :  { %v8255_v19 = vpop.f32.mrb[60].mxu0 }
 0x3b3   :  { %v8257_v13 = vpop.f32.mrb[61].mxu0 }
 0x3b4   :  { %v8259_v24 = vpop.f32.mrb[62].mxu0 }
 0x3b5   :  { %v8263_v26 = vpop.f32.mrb[63].mxu0 }
 0x3ba   :  { %v6305_v1 = vpop.f32.mrb[48].mxu1  ;;  %v8267_v7 = vpop.f32.mrb[64].mxu0 }
 0x3bb   :  { %v2243_v50 = vpop.f32.mrb[49].mxu1  ;;  %v8269_v8 = vpop.f32.mrb[65].mxu0 }
 0x3bc   :  { %v6306_v17 = vpop.f32.mrb[50].mxu1  ;;  %v8271_v4 = vpop.f32.mrb[66].mxu0 }
 0x3bd   :  { %v2307_v49 = vpack.c.bf16 %v6306_v17, %v6305_v1  ;;  %v2246_v48 = vpop.f32.mrb[51].mxu1  ;;  %v8275_v37 = vpop.f32.mrb[67].mxu0 }
 0x3be   :  { %v2306_v60 = vpack.c.bf16 %v2246_v48, %v2243_v50  ;;  %v7082_v48 = vld [vmem:[%s9175_s6 + $0x30] sm:$0xff]  }
 0x3c0   :  { %6391 = vmatprep.mubr.msk.bf16.mxu0 %vm1003_vm0, %v2306_v60 }
 0x3c1   :  { %6392 = vmatmul.mubr.msk.bf16.vlgmr.msra.gmra.mrb[80].mxu0 %vm1003_vm0, %v2307_v49 }
 0x3c2   :  { %v6309_v53 = vpop.f32.mrb[52].mxu1  ;;  %6408 = vmatpush3.bf16.msra.mxu0 %v7079_v52  ;;  %v8284_v17 = vpop.f32.mrb[68].mxu0 }
 0x3c3   :  { %v2259_v1 = vpop.f32.mrb[53].mxu1  ;;  %6409 = vmatprep.subr.bf16.mxu0 %v7081_v16  ;;  %v8289_v50 = vpop.f32.mrb[69].mxu0 }
 0x3c4   :  { %v6310_v3 = vpop.f32.mrb[54].mxu1  ;;  %v8291_v6 = vpop.f32.mrb[70].mxu0 }
 0x3c5   :  { %v2309_v11 = vpack.c.bf16 %v6310_v3, %v6309_v53  ;;  %v2262_v61 = vpop.f32.mrb[55].mxu1  ;;  %v8295_v49 = vpop.f32.mrb[71].mxu0 }
 0x3c6   :  { %v2308_v52 = vpack.c.bf16 %v2262_v61, %v2259_v1  ;;  %6410 = vmatpush3.bf16.msra.mxu0 %v7081_v16  ;;  %v7087_v61 = vld [vmem:[#allocation9 + $0x20] sm:$0xff]  }
 0x3c7   :  { %6411 = vmatprep.subr.bf16.mxu0 %v7082_v48 }
 0x3c8   :  { %6395 = vmatprep.mubr.msk.bf16.mxu0 %vm1003_vm0, %v2308_v52 }
 0x3c9   :  { %6396 = vmatmul.mubr.msk.bf16.gmra.mrb[84].mxu0 %vm1003_vm0, %v2309_v11 }
 0x3ca   :  { %v6313_v53 = vpop.f32.mrb[56].mxu1  ;;  %6412 = vmatpush3.bf16.msra.mxu0 %v7082_v48  ;;  %v8304_v3 = vpop.f32.mrb[72].mxu0 }
 0x3cb   :  { %v2275_v60 = vpop.f32.mrb[57].mxu1  ;;  %6413 = vmatprep.subr.bf16.mxu0 %v7084_v29  ;;  %v8306_v16 = vpop.f32.mrb[73].mxu0 }
 0x3cc   :  { %v6314_v1 = vpop.f32.mrb[58].mxu1  ;;  %v8308_v57 = vpop.f32.mrb[74].mxu0 }
 0x3cd   :  { %v2311_v47 = vpack.c.bf16 %v6314_v1, %v6313_v53  ;;  %v2278_v51 = vpop.f32.mrb[59].mxu1  ;;  %v8312_v52 = vpop.f32.mrb[75].mxu0 }
 0x3ce   :  { %v2310_v11 = vpack.c.bf16 %v2278_v51, %v2275_v60  ;;  %6414 = vmatpush3.bf16.msra.mxu0 %v7084_v29 }
 0x3cf   :  { %6431 = vmatprep.subr.bf16.mxu0 %v7087_v61 }
 0x3d0   :  { %6399 = vmatprep.mubr.msk.bf16.mxu0 %vm1003_vm0, %v2310_v11 }
 0x3d1   :  { %6400 = vmatmul.mubr.msk.bf16.gmra.mrb[88].mxu0 %vm1003_vm0, %v2311_v47 }
 0x3d2   :  { %v6317_v23 = vpop.f32.mrb[60].mxu1  ;;  %v8318_v32 = vpop.f32.mrb[76].mxu0 }
 0x3d3   :  { %v2291_v53 = vpop.f32.mrb[61].mxu1  ;;  %v8320_v1 = vpop.f32.mrb[77].mxu0 }
 0x3d4   :  { %v6318_v62 = vpop.f32.mrb[62].mxu1  ;;  %v8322_v44 = vpop.f32.mrb[78].mxu0 }
 0x3d5   :  { %v2313_v39 = vpack.c.bf16 %v6318_v62, %v6317_v23  ;;  %v2294_v51 = vpop.f32.mrb[63].mxu1  ;;  %v8326_v60 = vpop.f32.mrb[79].mxu0 }
 0x3d6   :  { %v2312_v48 = vpack.c.bf16 %v2294_v51, %v2291_v53  ;;  %v2417_v47 = vpack.c.bf16 %v8326_v60, %v8320_v1  ;;  %v7089_v53 = vld [vmem:[#allocation9 + $0x28] sm:$0xff]   ;;  %v7090_v51 = vld [vmem:[#allocation9 + $0x30] sm:$0xff]  }
 0x3d8   :  { %6403 = vmatprep.mubr.msk.bf16.mxu0 %vm1003_vm0, %v2312_v48  ;;  %v9335_v48 = vpack.c.bf16 %v8223_v43, %v8219_v41 }
 0x3d9   :  { %6404 = vmatmul.mubr.msk.bf16.gmra.mrb[92].mxu0 %vm1003_vm0, %v2313_v39 }
 0x3da   :  { %v6369_v11 = vpop.f32.mrb[64].mxu1  ;;  %6415 = vmatprep.mubr.msk.bf16.mxu0 %vm1003_vm0, %v9334_v54 }
 0x3db   :  { %v2453_v62 = vpop.f32.mrb[65].mxu1 }
 0x3dc   :  { %v6370_v23 = vpop.f32.mrb[66].mxu1 }
 0x3dd   :  { %v2517_v34 = vpack.c.bf16 %v6370_v23, %v6369_v11  ;;  %v2456_v29 = vpop.f32.mrb[67].mxu1  ;;  %v7093_v11 = vld [vmem:[#allocation13 + $0x20] sm:$0xff]  }
 0x3de   :  { %v2516_v5 = vpack.c.bf16 %v2456_v29, %v2453_v62 }
 0x3e0   :  { %6463 = vmatprep.mubr.msk.bf16.mxu1 %vm1003_vm0, %v2516_v5 }
 0x3e1   :  { %6416 = vmatmul.mubr.msk.bf16.vlgmr.msra.gmra.mrb[80].mxu0 %vm1003_vm0, %v9335_v48  ;;  %6464 = vmatmul.mubr.msk.bf16.vlgmr.msra.gmra.mrb[80].mxu1 %vm1003_vm0, %v2517_v34  ;;  %v7091_v34 = vld [vmem:[#allocation10 + $0x38] sm:$0xff]  }
 0x3e2   :  { %v6373_v39 = vpop.f32.mrb[68].mxu1  ;;  %6480 = vmatpush3.bf16.msra.mxu1 %v8216_v9  ;;  %6419 = vmatprep.mubr.msk.bf16.mxu0 %vm1003_vm0, %v9336_v59  ;;  %v9337_v9 = vpack.c.bf16 %v8235_v56, %v8231_v58  ;;  %v9340_v58 = vpack.c.bf16 %v8263_v26, %v8257_v13  ;;  %v9342_v13 = vpack.c.bf16 %v8275_v37, %v8269_v8  ;;  %v7096_v37 = vld [vmem:[#allocation13 + $0x38] sm:$0xff]  }
 0x3e3   :  { %v2469_v54 = vpop.f32.mrb[69].mxu1  ;;  %6481 = vmatprep.subr.bf16.mxu1 %v7086_v15  ;;  %6432 = vmatpush3.bf16.msra.mxu0 %v7087_v61  ;;  %v9338_v61 = vpack.c.bf16 %v8251_v18, %v8245_v36  ;;  %v9339_v18 = vpack.c.bf16 %v8247_v35, %v8243_v22  ;;  %v9341_v35 = vpack.c.bf16 %v8259_v24, %v8255_v19  ;;  %v7094_v22 = vld [vmem:[#allocation13 + $0x28] sm:$0xff]   ;;  %v7095_v24 = vld [vmem:[#allocation13 + $0x30] sm:$0xff]   ;;  %v7162_v19 = vld [vmem:[#allocation2] sm:$0xff]  }
 0x3e4   :  { %v6374_v5 = vpop.f32.mrb[70].mxu1  ;;  %6433 = vmatprep.subr.bf16.mxu0 %v7089_v53  ;;  %v9343_v26 = vpack.c.bf16 %v8271_v4, %v8267_v7 }
 0x3e5   :  { %v2519_v41 = vpack.c.bf16 %v6374_v5, %v6373_v39  ;;  %v2472_v43 = vpop.f32.mrb[71].mxu1 }
 0x3e6   :  { %v2518_v29 = vpack.c.bf16 %v2472_v43, %v2469_v54  ;;  %6482 = vmatpush3.bf16.msra.mxu1 %v7086_v15 }
 0x3e7   :  { %6483 = vmatprep.subr.bf16.mxu1 %v7088_v40  ;;  %6434 = vmatpush3.bf16.msra.mxu0 %v7089_v53 }
 0x3e8   :  { %6467 = vmatprep.mubr.msk.bf16.mxu1 %vm1003_vm0, %v2518_v29  ;;  %6435 = vmatprep.subr.bf16.mxu0 %v7090_v51 }
 0x3e9   :  { %6420 = vmatmul.mubr.msk.bf16.gmra.mrb[84].mxu0 %vm1003_vm0, %v9337_v9  ;;  %6468 = vmatmul.mubr.msk.bf16.gmra.mrb[84].mxu1 %vm1003_vm0, %v2519_v41 }
 0x3ea   :  { %v6377_v10 = vpop.f32.mrb[72].mxu1  ;;  %6423 = vmatprep.mubr.msk.bf16.mxu0 %vm1003_vm0, %v9338_v61  ;;  %6484 = vmatpush3.bf16.msra.mxu1 %v7088_v40 }
 0x3eb   :  { %v2485_v15 = vpop.f32.mrb[73].mxu1  ;;  %6485 = vmatprep.subr.bf16.mxu1 %v7091_v34  ;;  %6436 = vmatpush3.bf16.msra.mxu0 %v7090_v51 }
 0x3ec   :  { %v6378_v62 = vpop.f32.mrb[74].mxu1  ;;  %6437 = vmatprep.subr.bf16.mxu0 %v7092_v38 }
 0x3ed   :  { %v2521_v23 = vpack.c.bf16 %v6378_v62, %v6377_v10  ;;  %v2488_v53 = vpop.f32.mrb[75].mxu1 }
 0x3ee   :  { %v2520_v56 = vpack.c.bf16 %v2488_v53, %v2485_v15  ;;  %6486 = vmatpush3.bf16.msra.mxu1 %v7091_v34 }
 0x3ef   :  { %6438 = vmatpush3.bf16.msra.mxu0 %v7092_v38  ;;  %6503 = vmatprep.subr.bf16.mxu1 %v7093_v11 }
 0x3f0   :  { %6471 = vmatprep.mubr.msk.bf16.mxu1 %vm1003_vm0, %v2520_v56 }
 0x3f1   :  { %6424 = vmatmul.mubr.msk.bf16.gmra.mrb[88].mxu0 %vm1003_vm0, %v9339_v18  ;;  %6472 = vmatmul.mubr.msk.bf16.gmra.mrb[88].mxu1 %vm1003_vm0, %v2521_v23 }
 0x3f2   :  { %v6381_v36 = vpop.f32.mrb[76].mxu1  ;;  %6427 = vmatprep.mubr.msk.bf16.mxu0 %vm1003_vm0, %v9340_v58 }
 0x3f3   :  { %v2501_v48 = vpop.f32.mrb[77].mxu1 }
 0x3f4   :  { %v6382_v39 = vpop.f32.mrb[78].mxu1 }
 0x3f5   :  { %v2523_v59 = vpack.c.bf16 %v6382_v39, %v6381_v36  ;;  %v2504_v54 = vpop.f32.mrb[79].mxu1 }
 0x3f6   :  { %v2522_v40 = vpack.c.bf16 %v2504_v54, %v2501_v48 }
 0x3f8   :  { %6475 = vmatprep.mubr.msk.bf16.mxu1 %vm1003_vm0, %v2522_v40 }
 0x3f9   :  { %6428 = vmatmul.mubr.msk.bf16.gmra.mrb[92].mxu0 %vm1003_vm0, %v9341_v35  ;;  %6476 = vmatmul.mubr.msk.bf16.gmra.mrb[92].mxu1 %vm1003_vm0, %v2523_v59 }
 0x3fa   :  { %6439 = vmatprep.mubr.msk.bf16.mxu0 %vm1003_vm0, %v7900_v21  ;;  %6487 = vmatprep.mubr.msk.bf16.mxu1 %vm1003_vm0, %v9342_v13  ;;  %v9344_v21 = vpack.c.bf16 %v8295_v49, %v8289_v50 }
 0x401   :  { %6440 = vmatmul.mubr.msk.bf16.vlgmr.msra.gmra.mrb[80].mxu0 %vm1003_vm0, %v7908_v27  ;;  %6488 = vmatmul.mubr.msk.bf16.vlgmr.msra.gmra.mrb[80].mxu1 %vm1003_vm0, %v9343_v26  ;;  %v9345_v27 = vpack.c.bf16 %v8291_v6, %v8284_v17 }
 0x402   :  { %6443 = vmatprep.mubr.msk.bf16.mxu0 %vm1003_vm0, %v7924_v42  ;;  %6504 = vmatpush3.bf16.msra.mxu1 %v7093_v11  ;;  %v9346_v42 = vpack.c.bf16 %v8312_v52, %v8306_v16 }
 0x403   :  { %6491 = vmatprep.mubr.msk.bf16.mxu1 %vm1003_vm0, %v9344_v21  ;;  %6505 = vmatprep.subr.bf16.mxu1 %v7094_v22 }
 0x406   :  { %6506 = vmatpush3.bf16.msra.mxu1 %v7094_v22 }
 0x407   :  { %6507 = vmatprep.subr.bf16.mxu1 %v7095_v24 }
 0x409   :  { %6444 = vmatmul.mubr.msk.bf16.gmra.mrb[84].mxu0 %vm1003_vm0, %v7932_v45  ;;  %6492 = vmatmul.mubr.msk.bf16.gmra.mrb[84].mxu1 %vm1003_vm0, %v9345_v27  ;;  %v9347_v45 = vpack.c.bf16 %v8308_v57, %v8304_v3 }
 0x40a   :  { %6447 = vmatprep.mubr.msk.bf16.mxu0 %vm1003_vm0, %v7948_v14  ;;  %6495 = vmatprep.mubr.msk.bf16.mxu1 %vm1003_vm0, %v9346_v42  ;;  %v9348_v14 = vpack.c.bf16 %v8322_v44, %v8318_v32 }
 0x40b   :  { %6508 = vmatpush3.bf16.msra.mxu1 %v7095_v24 }
 0x40c   :  { %6509 = vmatprep.subr.bf16.mxu1 %v7096_v37 }
 0x40f   :  { %6510 = vmatpush3.bf16.msra.mxu1 %v7096_v37 }
 0x411   :  { %6448 = vmatmul.mubr.msk.bf16.gmra.mrb[88].mxu0 %vm1003_vm0, %v7956_v63  ;;  %6496 = vmatmul.mubr.msk.bf16.gmra.mrb[88].mxu1 %vm1003_vm0, %v9347_v45  ;;  %v8441_v63 = vld [vmem:[%s9178_s9 + $0x1] ss:$0 sm:$0xff] }
 0x412   :  { %6451 = vmatprep.mubr.msk.bf16.mxu0 %vm1003_vm0, %v7977_v12  ;;  %6499 = vmatprep.mubr.msk.bf16.mxu1 %vm1003_vm0, %v2417_v47 }
 0x419   :  { %6452 = vmatmul.mubr.msk.bf16.gmra.mrb[92].mxu0 %vm1003_vm0, %v7985_v28  ;;  %6500 = vmatmul.mubr.msk.bf16.gmra.mrb[92].mxu1 %vm1003_vm0, %v9348_v14 }
 0x41a   :  { %6511 = vmatprep.mubr.msk.bf16.mxu1 %vm1003_vm0, %v8001_v46  ;;  %6543 = vmatprep.mubr.bf16.mxu0 %v7162_v19 }
 0x421   :  { %6512 = vmatmul.mubr.msk.bf16.vlgmr.msra.gmra.mrb[80].mxu1 %vm1003_vm0, %v8010_v55 }
 0x422   :  { %6515 = vmatprep.mubr.msk.bf16.mxu1 %vm1003_vm0, %v8035_v20 }
 0x429   :  { %6516 = vmatmul.mubr.msk.bf16.gmra.mrb[84].mxu1 %vm1003_vm0, %v8044_v31 }
 0x42a   :  { %6519 = vmatprep.mubr.msk.bf16.mxu1 %vm1003_vm0, %v8069_v2 }
 0x431   :  { %6520 = vmatmul.mubr.msk.bf16.gmra.mrb[88].mxu1 %vm1003_vm0, %v8078_v30 }
 0x432   :  { %6523 = vmatprep.mubr.msk.bf16.mxu1 %vm1003_vm0, %v8103_v33 }
 0x439   :  { %6524 = vmatmul.mubr.msk.bf16.gmra.mrb[92].mxu1 %vm1003_vm0, %v8110_v25 }
 0x43a   :  { %6575 = vmatprep.mubr.bf16.mxu1 %v7880_v0 }
 0x4d4   :  { %v6441_v12 = vpop.f32.mrb[80].mxu0 }
 0x4d5   :  { %v3012_v28 = vadd.f32 %v6441_v12, %v8441_v63  ;;  %v2923_v46 = vpop.f32.mrb[81].mxu0 }
 0x4d6   :  { %v3010_v55 = vadd.f32 %v8441_v63, %v2923_v46  ;;  %v6442_v6 = vpop.f32.mrb[82].mxu0 }
 0x4d7   :  { %v3044_v7 = vmul.f32 0.01, %v3012_v28  ;;  %v3013_v8 = vadd.f32 %v6442_v6, %v8441_v63  ;;  %v2926_v20 = vpop.f32.mrb[83].mxu0  ;;  %vm3028_vm3 = vcmp.gt.f32.partialorder %v3012_v28, 0.0 }
 0x4d8   :  { %v3042_v31 = vmul.f32 0.01, %v3010_v55  ;;  %v3011_v0 = vadd.f32 %v8441_v63, %v2926_v20  ;;  %vm3026_vm4 = vcmp.gt.f32.partialorder %v3010_v55, 0.0 }
 0x4d9   :  { %vm3029_vm5 = vcmp.gt.f32.partialorder %v3013_v8, 0.0  ;;  %v3045_v2 = vmul.f32 0.01, %v3013_v8  ;;  %v8447_v30 = vsel %vm3028_vm3, %v3012_v28, %v3044_v7 }
 0x4da   :  { %vm3027_vm6 = vcmp.gt.f32.partialorder %v3011_v0, 0.0  ;;  %v3043_v4 = vmul.f32 0.01, %v3011_v0  ;;  %v8451_v33 = vsel %vm3026_vm4, %v3010_v55, %v3042_v31  ;;  %v8521_v55 = vld [vmem:[%s9182_s13 + $0x1] ss:$0 sm:$0xff] }
 0x4db   :  { %v8449_v57 = vsel %vm3029_vm5, %v3013_v8, %v3045_v2  ;;  %9350 = vst [vmem:[#allocation80_spill] sm:$0xff] %v8451_v33 }
 0x4dc   :  { %9349 = vst [vmem:[#allocation79_spill] sm:$0xff] %v8449_v57  ;;  %v8455_v25 = vpack.c.bf16 %v8449_v57, %v8447_v30  ;;  %v8457_v32 = vsel %vm3027_vm6, %v3011_v0, %v3043_v4  ;;  %v6445_v44 = vpop.f32.mrb[84].mxu0 }
 0x4dd   :  { %9351 = vst [vmem:[#allocation81_spill] sm:$0xff] %v8457_v32  ;;  %v8461_v17 = vpack.c.bf16 %v8457_v32, %v8451_v33  ;;  %v3016_v50 = vadd.f32 %v6445_v44, %v8441_v63  ;;  %v2939_v49 = vpop.f32.mrb[85].mxu0  ;;  %v7110_v33 = vld [vmem:[#allocation10 + $0x48] sm:$0xff]  }
 0x4de   :  { %v3014_v3 = vadd.f32 %v8441_v63, %v2939_v49  ;;  %v6446_v16 = vpop.f32.mrb[86].mxu0 }
 0x4df   :  { %v3048_v52 = vmul.f32 0.01, %v3016_v50  ;;  %v3017_v1 = vadd.f32 %v6446_v16, %v8441_v63  ;;  %v2942_v60 = vpop.f32.mrb[87].mxu0  ;;  %6527 = vmatprep.subr.bf16.mxu0 %v8461_v17  ;;  %vm3032_vm7 = vcmp.gt.f32.partialorder %v3016_v50, 0.0 }
 0x4e0   :  { %v3046_v47 = vmul.f32 0.01, %v3014_v3  ;;  %v3015_v5 = vadd.f32 %v8441_v63, %v2942_v60  ;;  %6528 = vmatpush3.bf16.msra.mxu0 %v8461_v17  ;;  %vm3030_vm8 = vcmp.gt.f32.partialorder %v3014_v3, 0.0 }
 0x4e1   :  { %vm3033_vm9 = vcmp.gt.f32.partialorder %v3017_v1, 0.0  ;;  %v3049_v51 = vmul.f32 0.01, %v3017_v1  ;;  %6529 = vmatprep.subr.bf16.mxu0 %v8455_v25  ;;  %v8470_v43 = vsel %vm3032_vm7, %v3016_v50, %v3048_v52 }
 0x4e2   :  { %vm3031_vm10 = vcmp.gt.f32.partialorder %v3015_v5, 0.0  ;;  %v3047_v41 = vmul.f32 0.01, %v3015_v5  ;;  %9352 = vst [vmem:[#allocation82_spill] sm:$0xff] %v8470_v43  ;;  %v8474_v34 = vsel %vm3030_vm8, %v3014_v3, %v3046_v47 }
 0x4e3   :  { %v8472_v29 = vsel %vm3033_vm9, %v3017_v1, %v3049_v51  ;;  %9354 = vst [vmem:[#allocation84_spill] sm:$0xff] %v8474_v34 }
 0x4e4   :  { %9353 = vst [vmem:[#allocation83_spill] sm:$0xff] %v8472_v29  ;;  %v8478_v38 = vpack.c.bf16 %v8472_v29, %v8470_v43  ;;  %v8480_v9 = vsel %vm3031_vm10, %v3015_v5, %v3047_v41  ;;  %v6449_v10 = vpop.f32.mrb[88].mxu0  ;;  %6530 = vmatpush3.bf16.msra.mxu0 %v8455_v25 }
 0x4e5   :  { %9355 = vst [vmem:[#allocation85_spill] sm:$0xff] %v8480_v9  ;;  %v8485_v61 = vpack.c.bf16 %v8480_v9, %v8474_v34  ;;  %v3020_v15 = vadd.f32 %v6449_v10, %v8441_v63  ;;  %v2955_v11 = vpop.f32.mrb[89].mxu0 }
 0x4e6   :  { %v3018_v62 = vadd.f32 %v8441_v63, %v2955_v11  ;;  %v6450_v23 = vpop.f32.mrb[90].mxu0 }
 0x4e7   :  { %v3052_v53 = vmul.f32 0.01, %v3020_v15  ;;  %v3021_v56 = vadd.f32 %v6450_v23, %v8441_v63  ;;  %v2958_v18 = vpop.f32.mrb[91].mxu0  ;;  %6531 = vmatprep.subr.bf16.mxu0 %v8485_v61  ;;  %vm3036_vm11 = vcmp.gt.f32.partialorder %v3020_v15, 0.0 }
 0x4e8   :  { %v3050_v36 = vmul.f32 0.01, %v3018_v62  ;;  %v3019_v58 = vadd.f32 %v8441_v63, %v2958_v18  ;;  %6532 = vmatpush3.bf16.msra.mxu0 %v8485_v61  ;;  %vm3034_vm12 = vcmp.gt.f32.partialorder %v3018_v62, 0.0 }
 0x4e9   :  { %vm3037_vm13 = vcmp.gt.f32.partialorder %v3021_v56, 0.0  ;;  %v3053_v48 = vmul.f32 0.01, %v3021_v56  ;;  %6533 = vmatprep.subr.bf16.mxu0 %v8478_v38  ;;  %v8494_v59 = vsel %vm3036_vm11, %v3020_v15, %v3052_v53 }
 0x4ea   :  { %vm3035_vm14 = vcmp.gt.f32.partialorder %v3019_v58, 0.0  ;;  %v3051_v39 = vmul.f32 0.01, %v3019_v58  ;;  %9356 = vst [vmem:[#allocation86_spill] sm:$0xff] %v8494_v59  ;;  %v8498_v40 = vsel %vm3034_vm12, %v3018_v62, %v3050_v36 }
 0x4eb   :  { %v8496_v54 = vsel %vm3037_vm13, %v3021_v56, %v3053_v48  ;;  %9358 = vst [vmem:[#allocation88_spill] sm:$0xff] %v8498_v40 }
 0x4ec   :  { %9357 = vst [vmem:[#allocation87_spill] sm:$0xff] %v8496_v54  ;;  %v8502_v35 = vpack.c.bf16 %v8496_v54, %v8494_v59  ;;  %v8504_v13 = vsel %vm3035_vm14, %v3019_v58, %v3051_v39  ;;  %v6453_v22 = vpop.f32.mrb[92].mxu0  ;;  %6534 = vmatpush3.bf16.msra.mxu0 %v8478_v38  ;;  %v9368_v39 = vld [vmem:[#allocation40_spill] sm:$0xff] }
 0x4ed   :  { %9359 = vst [vmem:[#allocation89_spill] sm:$0xff] %v8504_v13  ;;  %v8509_v26 = vpack.c.bf16 %v8504_v13, %v8498_v40  ;;  %v3024_v21 = vadd.f32 %v6453_v22, %v8441_v63  ;;  %v2971_v24 = vpop.f32.mrb[93].mxu0 }
 0x4ee   :  { %v3022_v37 = vadd.f32 %v8441_v63, %v2971_v24  ;;  %v6454_v27 = vpop.f32.mrb[94].mxu0 }
 0x4ef   :  { %v3056_v42 = vmul.f32 0.01, %v3024_v21  ;;  %v3025_v45 = vadd.f32 %v6454_v27, %v8441_v63  ;;  %v2974_v14 = vpop.f32.mrb[95].mxu0  ;;  %6535 = vmatprep.subr.bf16.mxu0 %v8509_v26  ;;  %vm3040_vm15 = vcmp.gt.f32.partialorder %v3024_v21, 0.0  ;;  %v9369_v27 = vld [vmem:[#allocation41_spill] sm:$0xff] }
 0x4f0   :  { %v3054_v19 = vmul.f32 0.01, %v3022_v37  ;;  %v3023_v12 = vadd.f32 %v8441_v63, %v2974_v14  ;;  %6536 = vmatpush3.bf16.msra.mxu0 %v8509_v26  ;;  %vm3038_vm1 = vcmp.gt.f32.partialorder %v3022_v37, 0.0 }
 0x4f1   :  { %vm3041_vm2 = vcmp.gt.f32.partialorder %v3025_v45, 0.0  ;;  %v3057_v28 = vmul.f32 0.01, %v3025_v45  ;;  %6537 = vmatprep.subr.bf16.mxu0 %v8502_v35  ;;  %v8523_v6 = vsel %vm3040_vm15, %v3024_v21, %v3056_v42 }
 0x4f2   :  { %vm3039_vm3 = vcmp.gt.f32.partialorder %v3023_v12, 0.0  ;;  %v3055_v46 = vmul.f32 0.01, %v3023_v12  ;;  %9360 = vst [vmem:[#allocation90_spill] sm:$0xff] %v8523_v6  ;;  %v8527_v8 = vsel %vm3038_vm1, %v3022_v37, %v3054_v19 }
 0x4f3   :  { %v8525_v7 = vsel %vm3041_vm2, %v3025_v45, %v3057_v28  ;;  %9362 = vst [vmem:[#allocation92_spill] sm:$0xff] %v8527_v8 }
 0x4f4   :  { %9361 = vst [vmem:[#allocation91_spill] sm:$0xff] %v8525_v7  ;;  %v8531_v63 = vpack.c.bf16 %v8525_v7, %v8523_v6  ;;  %v8533_v20 = vsel %vm3039_vm3, %v3023_v12, %v3055_v46  ;;  %v6513_v31 = vpop.f32.mrb[80].mxu1  ;;  %6538 = vmatpush3.bf16.msra.mxu0 %v8502_v35  ;;  %v7108_v6 = vld [vmem:[%s9175_s6 + $0x58] sm:$0xff]  }
 0x4f5   :  { %9363 = vst [vmem:[#allocation93_spill] sm:$0xff] %v8533_v20  ;;  %v8538_v0 = vpack.c.bf16 %v8533_v20, %v8527_v8  ;;  %v3562_v2 = vadd.f32 %v6513_v31, %v8521_v55  ;;  %v3473_v4 = vpop.f32.mrb[81].mxu1 }
 0x4f6   :  { %v3560_v44 = vadd.f32 %v8521_v55, %v3473_v4  ;;  %v6514_v50 = vpop.f32.mrb[82].mxu1 }
 0x4f7   :  { %v3594_v49 = vmul.f32 0.01, %v3562_v2  ;;  %v3563_v3 = vadd.f32 %v6514_v50, %v8521_v55  ;;  %v3476_v16 = vpop.f32.mrb[83].mxu1  ;;  %6539 = vmatprep.subr.bf16.mxu0 %v8538_v0  ;;  %vm3578_vm4 = vcmp.gt.f32.partialorder %v3562_v2, 0.0 }
 0x4f8   :  { %v3592_v52 = vmul.f32 0.01, %v3560_v44  ;;  %v3561_v1 = vadd.f32 %v8521_v55, %v3476_v16  ;;  %6540 = vmatpush3.bf16.msra.mxu0 %v8538_v0  ;;  %vm3576_vm5 = vcmp.gt.f32.partialorder %v3560_v44, 0.0  ;;  %v9374_v16 = vld [vmem:[#allocation46_spill] sm:$0xff] }
 0x4f9   :  { %vm3579_vm6 = vcmp.gt.f32.partialorder %v3563_v3, 0.0  ;;  %v3595_v60 = vmul.f32 0.01, %v3563_v3  ;;  %6541 = vmatprep.subr.bf16.mxu0 %v8531_v63  ;;  %v8547_v5 = vsel %vm3578_vm4, %v3562_v2, %v3594_v49 }
 0x4fa   :  { %vm3577_vm7 = vcmp.gt.f32.partialorder %v3561_v1, 0.0  ;;  %v3593_v47 = vmul.f32 0.01, %v3561_v1  ;;  %9364 = vst [vmem:[#allocation94_spill] sm:$0xff] %v8547_v5  ;;  %v8551_v41 = vsel %vm3576_vm5, %v3560_v44, %v3592_v52 }
 0x4fb   :  { %v8549_v51 = vsel %vm3579_vm6, %v3563_v3, %v3595_v60  ;;  %9366 = vst [vmem:[#allocation96_spill] sm:$0xff] %v8551_v41 }
 0x4fc   :  { %9365 = vst [vmem:[#allocation95_spill] sm:$0xff] %v8549_v51  ;;  %v8555_v10 = vpack.c.bf16 %v8549_v51, %v8547_v5  ;;  %v8557_v15 = vsel %vm3577_vm7, %v3561_v1, %v3593_v47  ;;  %v6517_v11 = vpop.f32.mrb[84].mxu1  ;;  %6542 = vmatpush3.bf16.msra.mxu0 %v8531_v63 }
 0x4fd   :  { %9367 = vst [vmem:[#allocation97_spill] sm:$0xff] %v8557_v15  ;;  %v8562_v62 = vpack.c.bf16 %v8557_v15, %v8551_v41  ;;  %v3566_v23 = vadd.f32 %v6517_v11, %v8521_v55  ;;  %v3489_v53 = vpop.f32.mrb[85].mxu1  ;;  %6591 = vmatprep.subr.bf16.mxu0 %v8461_v17  ;;  %v9375_v11 = vld [vmem:[#allocation47_spill] sm:$0xff]  ;;  %v7105_v41 = vld [vmem:[%s9175_s6 + $0x48] sm:$0xff]  }
 0x4fe   :  { %v3564_v56 = vadd.f32 %v8521_v55, %v3489_v53  ;;  %v6518_v18 = vpop.f32.mrb[86].mxu1 }
 0x4ff   :  { %v3598_v36 = vmul.f32 0.01, %v3566_v23  ;;  %v3567_v58 = vadd.f32 %v6518_v18, %v8521_v55  ;;  %v3492_v48 = vpop.f32.mrb[87].mxu1  ;;  %6559 = vmatprep.subr.bf16.mxu1 %v8562_v62  ;;  %6544 = vmatmul.mubr.bf16.vlgmr.msra.gmra.mrb[96].mxu0 %v9368_v39  ;;  %vm3582_vm8 = vcmp.gt.f32.partialorder %v3566_v23, 0.0 }
 0x500   :  { %v3596_v22 = vmul.f32 0.01, %v3564_v56  ;;  %v3565_v21 = vadd.f32 %v8521_v55, %v3492_v48  ;;  %6560 = vmatpush3.bf16.msra.mxu1 %v8562_v62  ;;  %6592 = vmatpush3.bf16.msra.mxu0 %v8461_v17  ;;  %vm3580_vm9 = vcmp.gt.f32.partialorder %v3564_v56, 0.0 }
 0x501   :  { %vm3583_vm10 = vcmp.gt.f32.partialorder %v3567_v58, 0.0  ;;  %v3599_v24 = vmul.f32 0.01, %v3567_v58  ;;  %6561 = vmatprep.subr.bf16.mxu1 %v8555_v10  ;;  %6593 = vmatprep.subr.bf16.mxu0 %v8455_v25  ;;  %v8576_v42 = vsel %vm3582_vm8, %v3566_v23, %v3598_v36 }
 0x502   :  { %vm3581_vm11 = vcmp.gt.f32.partialorder %v3565_v21, 0.0  ;;  %v3597_v37 = vmul.f32 0.01, %v3565_v21  ;;  %6547 = vmatprep.mubr.bf16.mxu0 %v9369_v27  ;;  %9370 = vst [vmem:[#allocation40_spill] sm:$0xff] %v8576_v42  ;;  %v8580_v14 = vsel %vm3580_vm9, %v3564_v56, %v3596_v22 }
 0x503   :  { %v8578_v45 = vsel %vm3583_vm10, %v3567_v58, %v3599_v24  ;;  %9372 = vst [vmem:[#allocation98_spill] sm:$0xff] %v8580_v14 }
 0x504   :  { %9371 = vst [vmem:[#allocation41_spill] sm:$0xff] %v8578_v45  ;;  %v8584_v19 = vpack.c.bf16 %v8578_v45, %v8576_v42  ;;  %v8586_v12 = vsel %vm3581_vm11, %v3565_v21, %v3597_v37  ;;  %v6521_v28 = vpop.f32.mrb[88].mxu1  ;;  %6562 = vmatpush3.bf16.msra.mxu1 %v8555_v10  ;;  %6594 = vmatpush3.bf16.msra.mxu0 %v8455_v25 }
 0x505   :  { %9373 = vst [vmem:[#allocation99_spill] sm:$0xff] %v8586_v12  ;;  %v8592_v46 = vpack.c.bf16 %v8586_v12, %v8580_v14  ;;  %v3570_v31 = vadd.f32 %v6521_v28, %v8521_v55  ;;  %v3505_v2 = vpop.f32.mrb[89].mxu1  ;;  %6595 = vmatprep.subr.bf16.mxu0 %v8485_v61 }
 0x506   :  { %v3568_v4 = vadd.f32 %v8521_v55, %v3505_v2  ;;  %v6522_v44 = vpop.f32.mrb[90].mxu1 }
 0x507   :  { %v3602_v50 = vmul.f32 0.01, %v3570_v31  ;;  %v3571_v49 = vadd.f32 %v6522_v44, %v8521_v55  ;;  %v3508_v3 = vpop.f32.mrb[91].mxu1  ;;  %6563 = vmatprep.subr.bf16.mxu1 %v8592_v46  ;;  %6548 = vmatmul.mubr.bf16.gmra.mrb[100].mxu0 %v9374_v16  ;;  %vm3586_vm12 = vcmp.gt.f32.partialorder %v3570_v31, 0.0 }
 0x508   :  { %v3600_v52 = vmul.f32 0.01, %v3568_v4  ;;  %v3569_v1 = vadd.f32 %v8521_v55, %v3508_v3  ;;  %6564 = vmatpush3.bf16.msra.mxu1 %v8592_v46  ;;  %6596 = vmatpush3.bf16.msra.mxu0 %v8485_v61  ;;  %vm3584_vm13 = vcmp.gt.f32.partialorder %v3568_v4, 0.0 }
 0x509   :  { %vm3587_vm14 = vcmp.gt.f32.partialorder %v3571_v49, 0.0  ;;  %v3603_v60 = vmul.f32 0.01, %v3571_v49  ;;  %6565 = vmatprep.subr.bf16.mxu1 %v8584_v19  ;;  %6597 = vmatprep.subr.bf16.mxu0 %v8478_v38  ;;  %v8606_v23 = vsel %vm3586_vm12, %v3570_v31, %v3602_v50  ;;  %v9380_v31 = vld [vmem:[#allocation52_spill] sm:$0xff] }
 0x50a   :  { %vm3585_vm15 = vcmp.gt.f32.partialorder %v3569_v1, 0.0  ;;  %v3601_v47 = vmul.f32 0.01, %v3569_v1  ;;  %6551 = vmatprep.mubr.bf16.mxu0 %v9375_v11  ;;  %9376 = vst [vmem:[#allocation46_spill] sm:$0xff] %v8606_v23  ;;  %v8610_v56 = vsel %vm3584_vm13, %v3568_v4, %v3600_v52  ;;  %v7097_v11 = vld [vmem:[%s9176_s7 + $0x40] sm:$0xff]  }
 0x50b   :  { %v8608_v53 = vsel %vm3587_vm14, %v3571_v49, %v3603_v60  ;;  %9378 = vst [vmem:[#allocation100_spill] sm:$0xff] %v8610_v56  ;;  %v9381_v49 = vld [vmem:[#allocation53_spill] sm:$0xff] }
 0x50c   :  { %9377 = vst [vmem:[#allocation47_spill] sm:$0xff] %v8608_v53  ;;  %v8614_v18 = vpack.c.bf16 %v8608_v53, %v8606_v23  ;;  %v8616_v36 = vsel %vm3585_vm15, %v3569_v1, %v3601_v47  ;;  %v6525_v58 = vpop.f32.mrb[92].mxu1  ;;  %6566 = vmatpush3.bf16.msra.mxu1 %v8584_v19  ;;  %6598 = vmatpush3.bf16.msra.mxu0 %v8478_v38  ;;  %v9386_v47 = vld [vmem:[#allocation58_spill] sm:$0xff] }
 0x50d   :  { %9379 = vst [vmem:[#allocation101_spill] sm:$0xff] %v8616_v36  ;;  %v8622_v48 = vpack.c.bf16 %v8616_v36, %v8610_v56  ;;  %v3574_v39 = vadd.f32 %v6525_v58, %v8521_v55  ;;  %v3521_v22 = vpop.f32.mrb[93].mxu1  ;;  %6599 = vmatprep.subr.bf16.mxu0 %v8509_v26  ;;  %v9387_v58 = vld [vmem:[#allocation59_spill] sm:$0xff] }
 0x50e   :  { %v3572_v21 = vadd.f32 %v8521_v55, %v3521_v22  ;;  %v6526_v24 = vpop.f32.mrb[94].mxu1  ;;  %v9389_v22 = vld [vmem:[#allocation61_spill] sm:$0xff] }
 0x50f   :  { %v3606_v37 = vmul.f32 0.01, %v3574_v39  ;;  %v3575_v27 = vadd.f32 %v6526_v24, %v8521_v55  ;;  %v3524_v28 = vpop.f32.mrb[95].mxu1  ;;  %6567 = vmatprep.subr.bf16.mxu1 %v8622_v48  ;;  %6552 = vmatmul.mubr.bf16.gmra.mrb[104].mxu0 %v9380_v31  ;;  %vm3590_vm1 = vcmp.gt.f32.partialorder %v3574_v39, 0.0  ;;  %v9390_v24 = vld [vmem:[#allocation62_spill] sm:$0xff]  ;;  %v9393_v31 = vld [vmem:[#allocation65_spill] sm:$0xff] }
 0x510   :  { %v3604_v2 = vmul.f32 0.01, %v3572_v21  ;;  %v3573_v4 = vadd.f32 %v8521_v55, %v3524_v28  ;;  %6568 = vmatpush3.bf16.msra.mxu1 %v8622_v48  ;;  %6600 = vmatpush3.bf16.msra.mxu0 %v8509_v26  ;;  %vm3588_vm2 = vcmp.gt.f32.partialorder %v3572_v21, 0.0  ;;  %v9392_v28 = vld [vmem:[#allocation64_spill] sm:$0xff] }
 0x511   :  { %vm3591_vm3 = vcmp.gt.f32.partialorder %v3575_v27, 0.0  ;;  %v3607_v44 = vmul.f32 0.01, %v3575_v27  ;;  %6569 = vmatprep.subr.bf16.mxu1 %v8614_v18  ;;  %6601 = vmatprep.subr.bf16.mxu0 %v8502_v35  ;;  %v8636_v3 = vsel %vm3590_vm1, %v3574_v39, %v3606_v37  ;;  %v9388_v39 = vld [vmem:[#allocation60_spill] sm:$0xff]  ;;  %v9391_v37 = vld [vmem:[#allocation63_spill] sm:$0xff] }
 0x512   :  { %vm3589_vm4 = vcmp.gt.f32.partialorder %v3573_v4, 0.0  ;;  %v3605_v50 = vmul.f32 0.01, %v3573_v4  ;;  %6555 = vmatprep.mubr.bf16.mxu0 %v9381_v49  ;;  %9382 = vst [vmem:[#allocation52_spill] sm:$0xff] %v8636_v3  ;;  %v8640_v55 = vsel %vm3588_vm2, %v3572_v21, %v3604_v2  ;;  %v7098_v21 = vld [vmem:[%s9176_s7 + $0x48] sm:$0xff]   ;;  %v9394_v2 = vld [vmem:[#allocation66_spill] sm:$0xff] }
 0x513   :  { %v8638_v16 = vsel %vm3591_vm3, %v3575_v27, %v3607_v44  ;;  %9384 = vst [vmem:[#allocation102_spill] sm:$0xff] %v8640_v55  ;;  %v7099_v27 = vld [vmem:[%s9176_s7 + $0x50] sm:$0xff]   ;;  %v9396_v44 = vld [vmem:[#allocation68_spill] sm:$0xff]  ;;  %v9397_v49 = vld [vmem:[#allocation69_spill] sm:$0xff] }
 0x514   :  { %9383 = vst [vmem:[#allocation53_spill] sm:$0xff] %v8638_v16  ;;  %v8644_v52 = vpack.c.bf16 %v8638_v16, %v8636_v3  ;;  %v8646_v1 = vsel %vm3589_vm4, %v3573_v4, %v3605_v50  ;;  %6570 = vmatpush3.bf16.msra.mxu1 %v8614_v18  ;;  %6602 = vmatpush3.bf16.msra.mxu0 %v8502_v35  ;;  %v9395_v4 = vld [vmem:[#allocation67_spill] sm:$0xff]  ;;  %v7163_v50 = vld [vmem:[#allocation6 + $0x28] sm:$0xff]  }
 0x515   :  { %9385 = vst [vmem:[#allocation103_spill] sm:$0xff] %v8646_v1  ;;  %v8652_v60 = vpack.c.bf16 %v8646_v1, %v8640_v55  ;;  %6603 = vmatprep.subr.bf16.mxu0 %v8538_v0 }
 0x517   :  { %6571 = vmatprep.subr.bf16.mxu1 %v8652_v60  ;;  %6556 = vmatmul.mubr.bf16.gmra.mrb[108].mxu0 %v9386_v47  ;;  %v7164_v47 = vld [vmem:[#allocation6 + $0x30] sm:$0xff]  }
 0x518   :  { %6572 = vmatpush3.bf16.msra.mxu1 %v8652_v60  ;;  %6604 = vmatpush3.bf16.msra.mxu0 %v8538_v0 }
 0x519   :  { %6573 = vmatprep.subr.bf16.mxu1 %v8644_v52  ;;  %6605 = vmatprep.subr.bf16.mxu0 %v8531_v63 }
 0x51a   :  { %6607 = vmatprep.mubr.bf16.mxu0 %v9387_v58  ;;  %v7165_v58 = vld [vmem:[#allocation6 + $0x38] sm:$0xff]  }
 0x51c   :  { %6574 = vmatpush3.bf16.msra.mxu1 %v8644_v52  ;;  %6606 = vmatpush3.bf16.msra.mxu0 %v8531_v63 }
 0x51d   :  { %6623 = vmatprep.subr.bf16.mxu1 %v8562_v62  ;;  %6655 = vmatprep.subr.bf16.mxu0 %v7097_v11 }
 0x51f   :  { %6576 = vmatmul.mubr.bf16.vlgmr.msra.gmra.mrb[96].mxu1 %v9388_v39  ;;  %6608 = vmatmul.mubr.bf16.vlgmr.msra.gmra.mrb[112].mxu0 %v9389_v22  ;;  %v9399_v39 = vld [vmem:[#allocation71_spill] sm:$0xff]  ;;  %v9400_v22 = vld [vmem:[#allocation72_spill] sm:$0xff] }
 0x520   :  { %6624 = vmatpush3.bf16.msra.mxu1 %v8562_v62  ;;  %6579 = vmatprep.mubr.bf16.mxu1 %v9390_v24  ;;  %v9402_v24 = vld [vmem:[#allocation74_spill] sm:$0xff] }
 0x521   :  { %6625 = vmatprep.subr.bf16.mxu1 %v8555_v10  ;;  %6611 = vmatprep.mubr.bf16.mxu0 %v9391_v37  ;;  %v9403_v37 = vld [vmem:[#allocation75_spill] sm:$0xff] }
 0x522   :  { %6656 = vmatpush3.bf16.msra.mxu0 %v7097_v11  ;;  %v9398_v11 = vld [vmem:[#allocation70_spill] sm:$0xff] }
 0x523   :  { %6657 = vmatprep.subr.bf16.mxu0 %v7098_v21 }
 0x524   :  { %6626 = vmatpush3.bf16.msra.mxu1 %v8555_v10 }
 0x525   :  { %6627 = vmatprep.subr.bf16.mxu1 %v8592_v46 }
 0x526   :  { %6658 = vmatpush3.bf16.msra.mxu0 %v7098_v21  ;;  %v9401_v21 = vld [vmem:[#allocation73_spill] sm:$0xff] }
 0x527   :  { %6580 = vmatmul.mubr.bf16.gmra.mrb[100].mxu1 %v9392_v28  ;;  %6612 = vmatmul.mubr.bf16.gmra.mrb[116].mxu0 %v9393_v31  ;;  %v9405_v28 = vld [vmem:[#allocation77_spill] sm:$0xff]  ;;  %v9406_v31 = vld [vmem:[#allocation78_spill] sm:$0xff] }
 0x528   :  { %6628 = vmatpush3.bf16.msra.mxu1 %v8592_v46  ;;  %6583 = vmatprep.mubr.bf16.mxu1 %v9394_v2  ;;  %v7100_v2 = vld [vmem:[%s9176_s7 + $0x58] sm:$0xff]  }
 0x529   :  { %6629 = vmatprep.subr.bf16.mxu1 %v8584_v19  ;;  %6615 = vmatprep.mubr.bf16.mxu0 %v9395_v4  ;;  %v7101_v4 = vld [vmem:[#allocation12 + $0x40] sm:$0xff]  }
 0x52a   :  { %6659 = vmatprep.subr.bf16.mxu0 %v7099_v27 }
 0x52b   :  { %6660 = vmatpush3.bf16.msra.mxu0 %v7099_v27  ;;  %v9404_v27 = vld [vmem:[#allocation76_spill] sm:$0xff] }
 0x52c   :  { %6630 = vmatpush3.bf16.msra.mxu1 %v8584_v19  ;;  %6661 = vmatprep.subr.bf16.mxu0 %v7100_v2 }
 0x52d   :  { %6631 = vmatprep.subr.bf16.mxu1 %v8622_v48 }
 0x52f   :  { %6584 = vmatmul.mubr.bf16.gmra.mrb[104].mxu1 %v9396_v44  ;;  %6616 = vmatmul.mubr.bf16.gmra.mrb[120].mxu0 %v7163_v50  ;;  %v7102_v44 = vld [vmem:[#allocation12 + $0x48] sm:$0xff]   ;;  %v7103_v50 = vld [vmem:[%s9175_s6 + $0x40] sm:$0xff]  }
 0x530   :  { %6632 = vmatpush3.bf16.msra.mxu1 %v8622_v48  ;;  %6587 = vmatprep.mubr.bf16.mxu1 %v9397_v49  ;;  %v7104_v49 = vld [vmem:[#allocation12 + $0x50] sm:$0xff]  }
 0x531   :  { %6633 = vmatprep.subr.bf16.mxu1 %v8614_v18  ;;  %6619 = vmatprep.mubr.bf16.mxu0 %v7164_v47  ;;  %v7107_v47 = vld [vmem:[#allocation12 + $0x58] sm:$0xff]  }
 0x532   :  { %6662 = vmatpush3.bf16.msra.mxu0 %v7100_v2 }
 0x533   :  { %6679 = vmatprep.subr.bf16.mxu0 %v7103_v50 }
 0x534   :  { %6634 = vmatpush3.bf16.msra.mxu1 %v8614_v18 }
 0x535   :  { %6635 = vmatprep.subr.bf16.mxu1 %v8652_v60 }
 0x537   :  { %6588 = vmatmul.mubr.bf16.gmra.mrb[108].mxu1 %v9398_v11  ;;  %6620 = vmatmul.mubr.bf16.gmra.mrb[124].mxu0 %v7165_v58  ;;  %v8714_v11 = vld [vmem:[#allocation10 + $0x40] sm:$0xff]  }
 0x538   :  { %6636 = vmatpush3.bf16.msra.mxu1 %v8652_v60  ;;  %6639 = vmatprep.mubr.bf16.mxu1 %v9399_v39 }
 0x539   :  { %6637 = vmatprep.subr.bf16.mxu1 %v8644_v52 }
 0x53c   :  { %6638 = vmatpush3.bf16.msra.mxu1 %v8644_v52 }
 0x53d   :  { %6727 = vmatprep.subr.bf16.mxu1 %v7101_v4 }
 0x53f   :  { %6640 = vmatmul.mubr.bf16.vlgmr.msra.gmra.mrb[112].mxu1 %v9400_v22 }
 0x540   :  { %6643 = vmatprep.mubr.bf16.mxu1 %v9401_v21  ;;  %6728 = vmatpush3.bf16.msra.mxu1 %v7101_v4 }
 0x541   :  { %6729 = vmatprep.subr.bf16.mxu1 %v7102_v44 }
 0x544   :  { %6730 = vmatpush3.bf16.msra.mxu1 %v7102_v44 }
 0x545   :  { %6731 = vmatprep.subr.bf16.mxu1 %v7104_v49 }
 0x547   :  { %6644 = vmatmul.mubr.bf16.gmra.mrb[116].mxu1 %v9402_v24 }
 0x548   :  { %6647 = vmatprep.mubr.bf16.mxu1 %v9403_v37  ;;  %6732 = vmatpush3.bf16.msra.mxu1 %v7104_v49 }
 0x549   :  { %6733 = vmatprep.subr.bf16.mxu1 %v7107_v47 }
 0x54c   :  { %6734 = vmatpush3.bf16.msra.mxu1 %v7107_v47 }
 0x54d   :  { %6751 = vmatprep.subr.bf16.mxu1 %v8714_v11 }
 0x54f   :  { %6648 = vmatmul.mubr.bf16.gmra.mrb[120].mxu1 %v9404_v27 }
 0x550   :  { %6651 = vmatprep.mubr.bf16.mxu1 %v9405_v28 }
 0x557   :  { %6652 = vmatmul.mubr.bf16.gmra.mrb[124].mxu1 %v9406_v31 }
 0x5d2   :  { %v8717_v58 = vpop.f32.mrb[96].mxu0 }
 0x5d3   :  { %v8719_v39 = vpop.f32.mrb[97].mxu0 }
 0x5d4   :  { %v8721_v22 = vpop.f32.mrb[98].mxu0 }
 0x5d5   :  { %v8725_v24 = vpop.f32.mrb[99].mxu0 }
 0x5d6   :  { %v9407_v43 = vpack.c.bf16 %v8725_v24, %v8719_v39  ;;  %v7112_v24 = vld [vmem:[#allocation10 + $0x50] sm:$0xff]  }
 0x5da   :  { %v8729_v27 = vpop.f32.mrb[100].mxu0 }
 0x5db   :  { %v8731_v28 = vpop.f32.mrb[101].mxu0 }
 0x5dc   :  { %v8733_v31 = vpop.f32.mrb[102].mxu0 }
 0x5dd   :  { %v8737_v4 = vpop.f32.mrb[103].mxu0 }
 0x5e2   :  { %v8741_v49 = vpop.f32.mrb[104].mxu0 }
 0x5e3   :  { %v8743_v47 = vpop.f32.mrb[105].mxu0 }
 0x5e4   :  { %v8745_v21 = vpop.f32.mrb[106].mxu0 }
 0x5e5   :  { %v8749_v1 = vpop.f32.mrb[107].mxu0 }
 0x5ea   :  { %v8753_v2 = vpop.f32.mrb[108].mxu0 }
 0x5eb   :  { %v8755_v55 = vpop.f32.mrb[109].mxu0 }
 0x5ec   :  { %v8757_v3 = vpop.f32.mrb[110].mxu0 }
 0x5ed   :  { %v8761_v36 = vpop.f32.mrb[111].mxu0 }
 0x5f2   :  { %v6577_v37 = vpop.f32.mrb[96].mxu1  ;;  %v8765_v56 = vpop.f32.mrb[112].mxu0 }
 0x5f3   :  { %v3811_v23 = vpop.f32.mrb[97].mxu1  ;;  %v8767_v12 = vpop.f32.mrb[113].mxu0 }
 0x5f4   :  { %v6578_v16 = vpop.f32.mrb[98].mxu1  ;;  %v8769_v45 = vpop.f32.mrb[114].mxu0 }
 0x5f5   :  { %v3875_v14 = vpack.c.bf16 %v6578_v16, %v6577_v37  ;;  %v3814_v42 = vpop.f32.mrb[99].mxu1  ;;  %v8773_v44 = vpop.f32.mrb[115].mxu0 }
 0x5f6   :  { %v3874_v51 = vpack.c.bf16 %v3814_v42, %v3811_v23  ;;  %v7106_v42 = vld [vmem:[%s9175_s6 + $0x50] sm:$0xff]  }
 0x5f8   :  { %6663 = vmatprep.mubr.msk.bf16.mxu0 %vm1003_vm0, %v3874_v51 }
 0x5f9   :  { %6664 = vmatmul.mubr.msk.bf16.vlgmr.msra.gmra.mrb[128].mxu0 %vm1003_vm0, %v3875_v14 }
 0x5fa   :  { %v6581_v5 = vpop.f32.mrb[100].mxu1  ;;  %6680 = vmatpush3.bf16.msra.mxu0 %v7103_v50  ;;  %v8782_v16 = vpop.f32.mrb[116].mxu0 }
 0x5fb   :  { %v3827_v37 = vpop.f32.mrb[101].mxu1  ;;  %6681 = vmatprep.subr.bf16.mxu0 %v7105_v41  ;;  %v8787_v23 = vpop.f32.mrb[117].mxu0 }
 0x5fc   :  { %v6582_v15 = vpop.f32.mrb[102].mxu1  ;;  %v8789_v53 = vpop.f32.mrb[118].mxu0 }
 0x5fd   :  { %v3877_v20 = vpack.c.bf16 %v6582_v15, %v6581_v5  ;;  %v3830_v7 = vpop.f32.mrb[103].mxu1  ;;  %v8793_v14 = vpop.f32.mrb[119].mxu0 }
 0x5fe   :  { %v3876_v50 = vpack.c.bf16 %v3830_v7, %v3827_v37  ;;  %6682 = vmatpush3.bf16.msra.mxu0 %v7105_v41  ;;  %v7111_v7 = vld [vmem:[#allocation9 + $0x40] sm:$0xff]  }
 0x5ff   :  { %6683 = vmatprep.subr.bf16.mxu0 %v7106_v42 }
 0x600   :  { %6667 = vmatprep.mubr.msk.bf16.mxu0 %vm1003_vm0, %v3876_v50 }
 0x601   :  { %6668 = vmatmul.mubr.msk.bf16.gmra.mrb[132].mxu0 %vm1003_vm0, %v3877_v20 }
 0x602   :  { %v6585_v5 = vpop.f32.mrb[104].mxu1  ;;  %6684 = vmatpush3.bf16.msra.mxu0 %v7106_v42  ;;  %v8802_v15 = vpop.f32.mrb[120].mxu0 }
 0x603   :  { %v3843_v51 = vpop.f32.mrb[105].mxu1  ;;  %6685 = vmatprep.subr.bf16.mxu0 %v7108_v6  ;;  %v8804_v41 = vpop.f32.mrb[121].mxu0 }
 0x604   :  { %v6586_v37 = vpop.f32.mrb[106].mxu1  ;;  %v8806_v8 = vpop.f32.mrb[122].mxu0 }
 0x605   :  { %v3879_v13 = vpack.c.bf16 %v6586_v37, %v6585_v5  ;;  %v3846_v54 = vpop.f32.mrb[107].mxu1  ;;  %v8810_v50 = vpop.f32.mrb[123].mxu0 }
 0x606   :  { %v3878_v20 = vpack.c.bf16 %v3846_v54, %v3843_v51  ;;  %6686 = vmatpush3.bf16.msra.mxu0 %v7108_v6 }
 0x607   :  { %6703 = vmatprep.subr.bf16.mxu0 %v7111_v7 }
 0x608   :  { %6671 = vmatprep.mubr.msk.bf16.mxu0 %vm1003_vm0, %v3878_v20 }
 0x609   :  { %6672 = vmatmul.mubr.msk.bf16.gmra.mrb[136].mxu0 %vm1003_vm0, %v3879_v13 }
 0x60a   :  { %v6589_v59 = vpop.f32.mrb[108].mxu1  ;;  %v8816_v9 = vpop.f32.mrb[124].mxu0 }
 0x60b   :  { %v3859_v5 = vpop.f32.mrb[109].mxu1  ;;  %v8818_v37 = vpop.f32.mrb[125].mxu0 }
 0x60c   :  { %v6590_v29 = vpop.f32.mrb[110].mxu1  ;;  %v8820_v40 = vpop.f32.mrb[126].mxu0 }
 0x60d   :  { %v3881_v34 = vpack.c.bf16 %v6590_v29, %v6589_v59  ;;  %v3862_v54 = vpop.f32.mrb[111].mxu1  ;;  %v8824_v51 = vpop.f32.mrb[127].mxu0 }
 0x60e   :  { %v3880_v42 = vpack.c.bf16 %v3862_v54, %v3859_v5  ;;  %v3985_v13 = vpack.c.bf16 %v8824_v51, %v8818_v37  ;;  %v7113_v5 = vld [vmem:[#allocation9 + $0x48] sm:$0xff]   ;;  %v7114_v54 = vld [vmem:[#allocation9 + $0x50] sm:$0xff]  }
 0x610   :  { %6675 = vmatprep.mubr.msk.bf16.mxu0 %vm1003_vm0, %v3880_v42  ;;  %v9408_v42 = vpack.c.bf16 %v8721_v22, %v8717_v58 }
 0x611   :  { %6676 = vmatmul.mubr.msk.bf16.gmra.mrb[140].mxu0 %vm1003_vm0, %v3881_v34 }
 0x612   :  { %v6641_v20 = vpop.f32.mrb[112].mxu1  ;;  %6687 = vmatprep.mubr.msk.bf16.mxu0 %vm1003_vm0, %v9407_v43  ;;  %v9409_v43 = vpack.c.bf16 %v8737_v4, %v8731_v28  ;;  %v9410_v28 = vpack.c.bf16 %v8733_v31, %v8729_v27 }
 0x613   :  { %v4021_v29 = vpop.f32.mrb[113].mxu1 }
 0x614   :  { %v6642_v59 = vpop.f32.mrb[114].mxu1 }
 0x615   :  { %v4085_v32 = vpack.c.bf16 %v6642_v59, %v6641_v20  ;;  %v4024_v6 = vpop.f32.mrb[115].mxu1  ;;  %v7117_v20 = vld [vmem:[#allocation13 + $0x40] sm:$0xff]  }
 0x616   :  { %v4084_v57 = vpack.c.bf16 %v4024_v6, %v4021_v29 }
 0x618   :  { %6735 = vmatprep.mubr.msk.bf16.mxu1 %vm1003_vm0, %v4084_v57 }
 0x619   :  { %6688 = vmatmul.mubr.msk.bf16.vlgmr.msra.gmra.mrb[128].mxu0 %vm1003_vm0, %v9408_v42  ;;  %6736 = vmatmul.mubr.msk.bf16.vlgmr.msra.gmra.mrb[128].mxu1 %vm1003_vm0, %v4085_v32  ;;  %v7115_v32 = vld [vmem:[#allocation10 + $0x58] sm:$0xff]  }
 0x61a   :  { %v6645_v34 = vpop.f32.mrb[116].mxu1  ;;  %6752 = vmatpush3.bf16.msra.mxu1 %v8714_v11  ;;  %6691 = vmatprep.mubr.msk.bf16.mxu0 %vm1003_vm0, %v9409_v43  ;;  %v7116_v11 = vld [vmem:[#allocation9 + $0x58] sm:$0xff]  }
 0x61b   :  { %v4037_v39 = vpop.f32.mrb[117].mxu1  ;;  %6753 = vmatprep.subr.bf16.mxu1 %v7110_v33  ;;  %6704 = vmatpush3.bf16.msra.mxu0 %v7111_v7  ;;  %v9411_v7 = vpack.c.bf16 %v8749_v1, %v8743_v47  ;;  %v9412_v1 = vpack.c.bf16 %v8745_v21, %v8741_v49  ;;  %v9413_v47 = vpack.c.bf16 %v8761_v36, %v8755_v55  ;;  %v7118_v55 = vld [vmem:[#allocation13 + $0x48] sm:$0xff]  }
 0x61c   :  { %v6646_v57 = vpop.f32.mrb[118].mxu1  ;;  %6705 = vmatprep.subr.bf16.mxu0 %v7113_v5  ;;  %v9414_v21 = vpack.c.bf16 %v8757_v3, %v8753_v2  ;;  %v9415_v36 = vpack.c.bf16 %v8773_v44, %v8767_v12  ;;  %v9416_v49 = vpack.c.bf16 %v8769_v45, %v8765_v56  ;;  %v7119_v12 = vld [vmem:[#allocation13 + $0x50] sm:$0xff]   ;;  %v7120_v3 = vld [vmem:[#allocation13 + $0x58] sm:$0xff]   ;;  %v9424_v56 = vld [vmem:[#allocation80_spill] sm:$0xff] }
 0x61d   :  { %v4087_v58 = vpack.c.bf16 %v6646_v57, %v6645_v34  ;;  %v4040_v22 = vpop.f32.mrb[119].mxu1  ;;  %v9426_v2 = vld [vmem:[#allocation79_spill] sm:$0xff] }
 0x61e   :  { %v4086_v6 = vpack.c.bf16 %v4040_v22, %v4037_v39  ;;  %6754 = vmatpush3.bf16.msra.mxu1 %v7110_v33 }
 0x61f   :  { %6755 = vmatprep.subr.bf16.mxu1 %v7112_v24  ;;  %6706 = vmatpush3.bf16.msra.mxu0 %v7113_v5 }
 0x620   :  { %6739 = vmatprep.mubr.msk.bf16.mxu1 %vm1003_vm0, %v4086_v6  ;;  %6707 = vmatprep.subr.bf16.mxu0 %v7114_v54 }
 0x621   :  { %6692 = vmatmul.mubr.msk.bf16.gmra.mrb[132].mxu0 %vm1003_vm0, %v9410_v28  ;;  %6740 = vmatmul.mubr.msk.bf16.gmra.mrb[132].mxu1 %vm1003_vm0, %v4087_v58 }
 0x622   :  { %v6649_v4 = vpop.f32.mrb[120].mxu1  ;;  %6695 = vmatprep.mubr.msk.bf16.mxu0 %vm1003_vm0, %v9411_v7  ;;  %6756 = vmatpush3.bf16.msra.mxu1 %v7112_v24  ;;  %v9430_v7 = vld [vmem:[#allocation82_spill] sm:$0xff] }
 0x623   :  { %v4053_v33 = vpop.f32.mrb[121].mxu1  ;;  %6757 = vmatprep.subr.bf16.mxu1 %v7115_v32  ;;  %6708 = vmatpush3.bf16.msra.mxu0 %v7114_v54 }
 0x624   :  { %v6650_v29 = vpop.f32.mrb[122].mxu1  ;;  %6709 = vmatprep.subr.bf16.mxu0 %v7116_v11 }
 0x625   :  { %v4089_v59 = vpack.c.bf16 %v6650_v29, %v6649_v4  ;;  %v4056_v5 = vpop.f32.mrb[123].mxu1  ;;  %v9429_v4 = vld [vmem:[#allocation27_spill] sm:$0xff] }
 0x626   :  { %v4088_v27 = vpack.c.bf16 %v4056_v5, %v4053_v33  ;;  %6758 = vmatpush3.bf16.msra.mxu1 %v7115_v32  ;;  %v3630_v33 = vadd.f32 %v9430_v7, %v9429_v4  ;;  %v9431_v5 = vld [vmem:[#allocation24_spill] sm:$0xff]  ;;  %v9445_v7 = vld [vmem:[#allocation35_spill] sm:$0xff] }
 0x627   :  { %6710 = vmatpush3.bf16.msra.mxu0 %v7116_v11  ;;  %6775 = vmatprep.subr.bf16.mxu1 %v7117_v20 }
 0x628   :  { %6743 = vmatprep.mubr.msk.bf16.mxu1 %vm1003_vm0, %v4088_v27  ;;  %v9432_v27 = vld [vmem:[#allocation84_spill] sm:$0xff] }
 0x629   :  { %6696 = vmatmul.mubr.msk.bf16.gmra.mrb[136].mxu0 %vm1003_vm0, %v9412_v1  ;;  %6744 = vmatmul.mubr.msk.bf16.gmra.mrb[136].mxu1 %vm1003_vm0, %v4089_v59  ;;  %v3628_v1 = vadd.f32 %v9432_v27, %v9431_v5  ;;  %v9447_v27 = vld [vmem:[#allocation32_spill] sm:$0xff] }
 0x62a   :  { %v6653_v31 = vpop.f32.mrb[124].mxu1  ;;  %6699 = vmatprep.mubr.msk.bf16.mxu0 %vm1003_vm0, %v9413_v47 }
 0x62b   :  { %v4069_v42 = vpop.f32.mrb[125].mxu1 }
 0x62c   :  { %v6654_v34 = vpop.f32.mrb[126].mxu1 }
 0x62d   :  { %v4091_v43 = vpack.c.bf16 %v6654_v34, %v6653_v31  ;;  %v4072_v39 = vpop.f32.mrb[127].mxu1  ;;  %v9434_v34 = vld [vmem:[#allocation83_spill] sm:$0xff] }
 0x62e   :  { %v4090_v24 = vpack.c.bf16 %v4072_v39, %v4069_v42  ;;  %v9433_v42 = vld [vmem:[#allocation25_spill] sm:$0xff] }
 0x630   :  { %6747 = vmatprep.mubr.msk.bf16.mxu1 %vm1003_vm0, %v4090_v24 }
 0x631   :  { %6700 = vmatmul.mubr.msk.bf16.gmra.mrb[140].mxu0 %vm1003_vm0, %v9414_v21  ;;  %6748 = vmatmul.mubr.msk.bf16.gmra.mrb[140].mxu1 %vm1003_vm0, %v4091_v43  ;;  %v3631_v43 = vadd.f32 %v9434_v34, %v9433_v42  ;;  %v9449_v34 = vld [vmem:[#allocation33_spill] sm:$0xff] }
 0x632   :  { %6711 = vmatprep.mubr.msk.bf16.mxu0 %vm1003_vm0, %v8461_v17  ;;  %6759 = vmatprep.mubr.msk.bf16.mxu1 %vm1003_vm0, %v9415_v36  ;;  %v9417_v17 = vpack.c.bf16 %v8793_v14, %v8787_v23 }
 0x639   :  { %6712 = vmatmul.mubr.msk.bf16.vlgmr.msra.gmra.mrb[128].mxu0 %vm1003_vm0, %v8455_v25  ;;  %6760 = vmatmul.mubr.msk.bf16.vlgmr.msra.gmra.mrb[128].mxu1 %vm1003_vm0, %v9416_v49  ;;  %v9418_v25 = vpack.c.bf16 %v8789_v53, %v8782_v16  ;;  %v9423_v53 = vld [vmem:[#allocation20_spill] sm:$0xff]  ;;  %v9435_v49 = vld [vmem:[#allocation26_spill] sm:$0xff] }
 0x63a   :  { %6715 = vmatprep.mubr.msk.bf16.mxu0 %vm1003_vm0, %v8485_v61  ;;  %6776 = vmatpush3.bf16.msra.mxu1 %v7117_v20  ;;  %v9419_v61 = vpack.c.bf16 %v8810_v50, %v8804_v41  ;;  %v9427_v41 = vld [vmem:[#allocation22_spill] sm:$0xff]  ;;  %v9428_v50 = vld [vmem:[#allocation81_spill] sm:$0xff] }
 0x63b   :  { %6763 = vmatprep.mubr.msk.bf16.mxu1 %vm1003_vm0, %v9417_v17  ;;  %6777 = vmatprep.subr.bf16.mxu1 %v7118_v55  ;;  %v3625_v37 = vadd.f32 %v9428_v50, %v9427_v41  ;;  %v9436_v17 = vld [vmem:[#allocation85_spill] sm:$0xff]  ;;  %v9443_v50 = vld [vmem:[#allocation30_spill] sm:$0xff] }
 0x63e   :  { %6778 = vmatpush3.bf16.msra.mxu1 %v7118_v55 }
 0x63f   :  { %6779 = vmatprep.subr.bf16.mxu1 %v7119_v12 }
 0x641   :  { %6716 = vmatmul.mubr.msk.bf16.gmra.mrb[132].mxu0 %vm1003_vm0, %v8478_v38  ;;  %6764 = vmatmul.mubr.msk.bf16.gmra.mrb[132].mxu1 %vm1003_vm0, %v9418_v25  ;;  %v9420_v38 = vpack.c.bf16 %v8806_v8, %v8802_v15 }
 0x642   :  { %6719 = vmatprep.mubr.msk.bf16.mxu0 %vm1003_vm0, %v8509_v26  ;;  %6767 = vmatprep.mubr.msk.bf16.mxu1 %vm1003_vm0, %v9419_v61  ;;  %v9421_v26 = vpack.c.bf16 %v8820_v40, %v8816_v9  ;;  %v8938_v9 = vld [vmem:[%s9178_s9 + $0x2] ss:$0 sm:$0xff] }
 0x643   :  { %6780 = vmatpush3.bf16.msra.mxu1 %v7119_v12  ;;  %v3629_v12 = vadd.f32 %v9436_v17, %v9435_v49  ;;  %v9037_v17 = vld [vmem:[%s9182_s13 + $0x2] ss:$0 sm:$0xff] }
 0x644   :  { %6781 = vmatprep.subr.bf16.mxu1 %v7120_v3 }
 0x647   :  { %6782 = vmatpush3.bf16.msra.mxu1 %v7120_v3 }
 0x649   :  { %6720 = vmatmul.mubr.msk.bf16.gmra.mrb[136].mxu0 %vm1003_vm0, %v8502_v35  ;;  %6768 = vmatmul.mubr.msk.bf16.gmra.mrb[136].mxu1 %vm1003_vm0, %v9420_v38 }
 0x64a   :  { %6723 = vmatprep.mubr.msk.bf16.mxu0 %vm1003_vm0, %v8538_v0  ;;  %6771 = vmatprep.mubr.msk.bf16.mxu1 %vm1003_vm0, %v3985_v13 }
 0x651   :  { %6724 = vmatmul.mubr.msk.bf16.gmra.mrb[140].mxu0 %vm1003_vm0, %v8531_v63  ;;  %6772 = vmatmul.mubr.msk.bf16.gmra.mrb[140].mxu1 %vm1003_vm0, %v9421_v26 }
 0x652   :  { %6783 = vmatprep.mubr.msk.bf16.mxu1 %vm1003_vm0, %v8562_v62 }
 0x659   :  { %6784 = vmatmul.mubr.msk.bf16.vlgmr.msra.gmra.mrb[128].mxu1 %vm1003_vm0, %v8555_v10  ;;  %v9422_v10 = vld [vmem:[#allocation23_spill] sm:$0xff] }
 0x65a   :  { %6787 = vmatprep.mubr.msk.bf16.mxu1 %vm1003_vm0, %v8592_v46  ;;  %v3626_v62 = vadd.f32 %v8447_v30, %v9422_v10  ;;  %v9437_v10 = vld [vmem:[#allocation31_spill] sm:$0xff] }
 0x661   :  { %6788 = vmatmul.mubr.msk.bf16.gmra.mrb[132].mxu1 %vm1003_vm0, %v8584_v19 }
 0x662   :  { %6791 = vmatprep.mubr.msk.bf16.mxu1 %vm1003_vm0, %v8622_v48 }
 0x669   :  { %6792 = vmatmul.mubr.msk.bf16.gmra.mrb[136].mxu1 %vm1003_vm0, %v8614_v18  ;;  %v3624_v18 = vadd.f32 %v9424_v56, %v9423_v53  ;;  %v9439_v56 = vld [vmem:[#allocation28_spill] sm:$0xff] }
 0x66a   :  { %6795 = vmatprep.mubr.msk.bf16.mxu1 %vm1003_vm0, %v8652_v60  ;;  %v9425_v60 = vld [vmem:[#allocation21_spill] sm:$0xff] }
 0x66b   :  { %v3627_v44 = vadd.f32 %v9426_v2, %v9425_v60  ;;  %v9441_v2 = vld [vmem:[#allocation29_spill] sm:$0xff] }
 0x671   :  { %6796 = vmatmul.mubr.msk.bf16.gmra.mrb[140].mxu1 %vm1003_vm0, %v8644_v52 }
 0x70c   :  { %v6713_v40 = vpop.f32.mrb[128].mxu0 }
 0x70d   :  { %v4580_v35 = vadd.f32 %v6713_v40, %v8938_v9  ;;  %v4491_v8 = vpop.f32.mrb[129].mxu0 }
 0x70e   :  { %v4578_v63 = vadd.f32 %v8938_v9, %v4491_v8  ;;  %v6714_v0 = vpop.f32.mrb[130].mxu0 }
 0x70f   :  { %vm4596_vm5 = vcmp.gt.f32.partialorder %v4580_v35, 0.0  ;;  %v4612_v45 = vmul.f32 0.01, %v4580_v35  ;;  %v4581_v19 = vadd.f32 %v6714_v0, %v8938_v9  ;;  %v4494_v46 = vpop.f32.mrb[131].mxu0 }
 0x710   :  { %vm4594_vm6 = vcmp.gt.f32.partialorder %v4578_v63, 0.0  ;;  %v4610_v48 = vmul.f32 0.01, %v4578_v63  ;;  %v4579_v52 = vadd.f32 %v8938_v9, %v4494_v46 }
 0x711   :  { %v4628_v16 = vsel %vm4596_vm5, %v4580_v35, %v4612_v45  ;;  %vm4597_vm7 = vcmp.gt.f32.partialorder %v4581_v19, 0.0  ;;  %v4613_v23 = vmul.f32 0.01, %v4581_v19 }
 0x712   :  { %v5194_v14 = vadd.f32 %v4628_v16, %v3626_v62  ;;  %v4626_v30 = vsel %vm4594_vm6, %v4578_v63, %v4610_v48  ;;  %vm4595_vm8 = vcmp.gt.f32.partialorder %v4579_v52, 0.0  ;;  %v4611_v15 = vmul.f32 0.01, %v4579_v52  ;;  %v9438_v62 = vld [vmem:[#allocation86_spill] sm:$0xff] }
 0x713   :  { %v5192_v51 = vadd.f32 %v4626_v30, %v3624_v18  ;;  %v4629_v13 = vsel %vm4597_vm7, %v4581_v19, %v4613_v23  ;;  %v3634_v45 = vadd.f32 %v9438_v62, %v9437_v10  ;;  %v9440_v18 = vld [vmem:[#allocation88_spill] sm:$0xff]  ;;  %v9453_v62 = vld [vmem:[#allocation39_spill] sm:$0xff] }
 0x714   :  { %5226 = vst.msk [vmem:[%s9183_s14 + $0x10] sm:$0xff] %vm1003_vm0, %v5194_v14  ;;  %v5195_v57 = vadd.f32 %v4629_v13, %v3627_v44  ;;  %v4627_v54 = vsel %vm4595_vm8, %v4579_v52, %v4611_v15  ;;  %v6717_v58 = vpop.f32.mrb[132].mxu0  ;;  %v3632_v48 = vadd.f32 %v9440_v18, %v9439_v56  ;;  %v9442_v44 = vld [vmem:[#allocation87_spill] sm:$0xff]  ;;  %v9455_v18 = vld [vmem:[#allocation36_spill] sm:$0xff] }
 0x715   :  { %5224 = vst.msk [vmem:[%s9183_s14] sm:$0xff] %vm1003_vm0, %v5192_v51  ;;  %v5193_v22 = vadd.f32 %v4627_v54, %v3625_v37  ;;  %v4584_v6 = vadd.f32 %v6717_v58, %v8938_v9  ;;  %v4507_v32 = vpop.f32.mrb[133].mxu0  ;;  %v3635_v16 = vadd.f32 %v9442_v44, %v9441_v2  ;;  %v9444_v37 = vld [vmem:[#allocation89_spill] sm:$0xff] }
 0x716   :  { %5227 = vst.msk [vmem:[%s9183_s14 + $0x18] sm:$0xff] %vm1003_vm0, %v5195_v57  ;;  %v4582_v11 = vadd.f32 %v8938_v9, %v4507_v32  ;;  %v6718_v28 = vpop.f32.mrb[134].mxu0  ;;  %v3633_v51 = vadd.f32 %v9444_v37, %v9443_v50  ;;  %v9457_v44 = vld [vmem:[#allocation37_spill] sm:$0xff]  ;;  %v9459_v37 = vld [vmem:[#allocation38_spill] sm:$0xff] }
 0x717   :  { %5225 = vst.msk [vmem:[%s9183_s14 + $0x8] sm:$0xff] %vm1003_vm0, %v5193_v22  ;;  %vm4600_vm9 = vcmp.gt.f32.partialorder %v4584_v6, 0.0  ;;  %v4616_v20 = vmul.f32 0.01, %v4584_v6  ;;  %v4585_v29 = vadd.f32 %v6718_v28, %v8938_v9  ;;  %v4510_v59 = vpop.f32.mrb[135].mxu0 }
 0x718   :  { %vm4598_vm10 = vcmp.gt.f32.partialorder %v4582_v11, 0.0  ;;  %v4614_v31 = vmul.f32 0.01, %v4582_v11  ;;  %v4583_v47 = vadd.f32 %v8938_v9, %v4510_v59 }
 0x719   :  { %v4632_v39 = vsel %vm4600_vm9, %v4584_v6, %v4616_v20  ;;  %vm4601_vm11 = vcmp.gt.f32.partialorder %v4585_v29, 0.0  ;;  %v4617_v24 = vmul.f32 0.01, %v4585_v29 }
 0x71a   :  { %v5198_v21 = vadd.f32 %v4632_v39, %v3630_v33  ;;  %v4630_v36 = vsel %vm4598_vm10, %v4582_v11, %v4614_v31  ;;  %vm4599_vm12 = vcmp.gt.f32.partialorder %v4583_v47, 0.0  ;;  %v4615_v55 = vmul.f32 0.01, %v4583_v47  ;;  %v9446_v33 = vld [vmem:[#allocation90_spill] sm:$0xff] }
 0x71b   :  { %v5196_v3 = vadd.f32 %v4630_v36, %v3628_v1  ;;  %v4633_v25 = vsel %vm4601_vm11, %v4585_v29, %v4617_v24  ;;  %v3638_v20 = vadd.f32 %v9446_v33, %v9445_v7  ;;  %v9448_v1 = vld [vmem:[#allocation92_spill] sm:$0xff]  ;;  %v9461_v33 = vld [vmem:[#allocation45_spill] sm:$0xff] }
 0x71c   :  { %5230 = vst.msk [vmem:[%s9183_s14 + $0x30] sm:$0xff] %vm1003_vm0, %v5198_v21  ;;  %v5199_v61 = vadd.f32 %v4633_v25, %v3631_v43  ;;  %v4631_v38 = vsel %vm4599_vm12, %v4583_v47, %v4615_v55  ;;  %v6721_v26 = vpop.f32.mrb[136].mxu0  ;;  %v3636_v31 = vadd.f32 %v9448_v1, %v9447_v27  ;;  %v9450_v43 = vld [vmem:[#allocation91_spill] sm:$0xff]  ;;  %v9463_v1 = vld [vmem:[#allocation42_spill] sm:$0xff] }
 0x71d   :  { %5228 = vst.msk [vmem:[%s9183_s14 + $0x20] sm:$0xff] %vm1003_vm0, %v5196_v3  ;;  %v5197_v40 = vadd.f32 %v4631_v38, %v3629_v12  ;;  %v4588_v35 = vadd.f32 %v6721_v26, %v8938_v9  ;;  %v4523_v8 = vpop.f32.mrb[137].mxu0  ;;  %v3639_v39 = vadd.f32 %v9450_v43, %v9449_v34  ;;  %v9451_v12 = vld [vmem:[#allocation34_spill] sm:$0xff]  ;;  %v9452_v3 = vld [vmem:[#allocation93_spill] sm:$0xff]  ;;  %v9465_v43 = vld [vmem:[#allocation43_spill] sm:$0xff] }
 0x71e   :  { %5231 = vst.msk [vmem:[%s9183_s14 + $0x38] sm:$0xff] %vm1003_vm0, %v5199_v61  ;;  %v4586_v63 = vadd.f32 %v8938_v9, %v4523_v8  ;;  %v6722_v0 = vpop.f32.mrb[138].mxu0  ;;  %v3637_v25 = vadd.f32 %v9452_v3, %v9451_v12  ;;  %v9467_v3 = vld [vmem:[#allocation44_spill] sm:$0xff] }
 0x71f   :  { %5229 = vst.msk [vmem:[%s9183_s14 + $0x28] sm:$0xff] %vm1003_vm0, %v5197_v40  ;;  %vm4604_vm13 = vcmp.gt.f32.partialorder %v4588_v35, 0.0  ;;  %v4620_v19 = vmul.f32 0.01, %v4588_v35  ;;  %v4589_v46 = vadd.f32 %v6722_v0, %v8938_v9  ;;  %v4526_v53 = vpop.f32.mrb[139].mxu0 }
 0x720   :  { %vm4602_vm14 = vcmp.gt.f32.partialorder %v4586_v63, 0.0  ;;  %v4618_v52 = vmul.f32 0.01, %v4586_v63  ;;  %v4587_v60 = vadd.f32 %v8938_v9, %v4526_v53 }
 0x721   :  { %v4636_v23 = vsel %vm4604_vm13, %v4588_v35, %v4620_v19  ;;  %vm4605_vm15 = vcmp.gt.f32.partialorder %v4589_v46, 0.0  ;;  %v4621_v14 = vmul.f32 0.01, %v4589_v46 }
 0x722   :  { %v5202_v30 = vadd.f32 %v4636_v23, %v3634_v45  ;;  %v4634_v15 = vsel %vm4602_vm14, %v4586_v63, %v4618_v52  ;;  %vm4603_vm1 = vcmp.gt.f32.partialorder %v4587_v60, 0.0  ;;  %v4619_v41 = vmul.f32 0.01, %v4587_v60  ;;  %v9454_v45 = vld [vmem:[#allocation94_spill] sm:$0xff] }
 0x723   :  { %v5200_v13 = vadd.f32 %v4634_v15, %v3632_v48  ;;  %v4637_v57 = vsel %vm4605_vm15, %v4589_v46, %v4621_v14  ;;  %v3642_v19 = vadd.f32 %v9454_v45, %v9453_v62  ;;  %v9456_v48 = vld [vmem:[#allocation96_spill] sm:$0xff]  ;;  %v9469_v45 = vld [vmem:[#allocation51_spill] sm:$0xff] }
 0x724   :  { %5234 = vst.msk [vmem:[%s9183_s14 + $0x50] sm:$0xff] %vm1003_vm0, %v5202_v30  ;;  %v5203_v54 = vadd.f32 %v4637_v57, %v3635_v16  ;;  %v4635_v58 = vsel %vm4603_vm1, %v4587_v60, %v4619_v41  ;;  %v6725_v22 = vpop.f32.mrb[140].mxu0  ;;  %v3640_v52 = vadd.f32 %v9456_v48, %v9455_v18  ;;  %v9458_v16 = vld [vmem:[#allocation95_spill] sm:$0xff]  ;;  %v9471_v48 = vld [vmem:[#allocation48_spill] sm:$0xff] }
 0x725   :  { %5232 = vst.msk [vmem:[%s9183_s14 + $0x40] sm:$0xff] %vm1003_vm0, %v5200_v13  ;;  %v5201_v6 = vadd.f32 %v4635_v58, %v3633_v51  ;;  %v4592_v32 = vadd.f32 %v6725_v22, %v8938_v9  ;;  %v4539_v11 = vpop.f32.mrb[141].mxu0  ;;  %v3643_v23 = vadd.f32 %v9458_v16, %v9457_v44  ;;  %v9460_v51 = vld [vmem:[#allocation97_spill] sm:$0xff] }
 0x726   :  { %5235 = vst.msk [vmem:[%s9183_s14 + $0x58] sm:$0xff] %vm1003_vm0, %v5203_v54  ;;  %v4590_v28 = vadd.f32 %v8938_v9, %v4539_v11  ;;  %v6726_v4 = vpop.f32.mrb[142].mxu0  ;;  %v3641_v13 = vadd.f32 %v9460_v51, %v9459_v37  ;;  %v9473_v16 = vld [vmem:[#allocation49_spill] sm:$0xff]  ;;  %v9475_v51 = vld [vmem:[#allocation50_spill] sm:$0xff] }
 0x727   :  { %5233 = vst.msk [vmem:[%s9183_s14 + $0x48] sm:$0xff] %vm1003_vm0, %v5201_v6  ;;  %vm4608_vm2 = vcmp.gt.f32.partialorder %v4592_v32, 0.0  ;;  %v4624_v29 = vmul.f32 0.01, %v4592_v32  ;;  %v4593_v59 = vadd.f32 %v6726_v4, %v8938_v9  ;;  %v4542_v5 = vpop.f32.mrb[143].mxu0 }
 0x728   :  { %vm4606_vm3 = vcmp.gt.f32.partialorder %v4590_v28, 0.0  ;;  %v4622_v47 = vmul.f32 0.01, %v4590_v28  ;;  %v4591_v42 = vadd.f32 %v8938_v9, %v4542_v5 }
 0x729   :  { %v4640_v24 = vsel %vm4608_vm2, %v4592_v32, %v4624_v29  ;;  %vm4609_vm4 = vcmp.gt.f32.partialorder %v4593_v59, 0.0  ;;  %v4625_v21 = vmul.f32 0.01, %v4593_v59 }
 0x72a   :  { %v5206_v36 = vadd.f32 %v4640_v24, %v3638_v20  ;;  %v4638_v55 = vsel %vm4606_vm3, %v4590_v28, %v4622_v47  ;;  %vm4607_vm5 = vcmp.gt.f32.partialorder %v4591_v42, 0.0  ;;  %v4623_v49 = vmul.f32 0.01, %v4591_v42  ;;  %v9462_v20 = vld [vmem:[#allocation40_spill] sm:$0xff] }
 0x72b   :  { %v5204_v61 = vadd.f32 %v4638_v55, %v3636_v31  ;;  %v4641_v9 = vsel %vm4609_vm4, %v4593_v59, %v4625_v21  ;;  %v3646_v29 = vadd.f32 %v9462_v20, %v9461_v33  ;;  %v9464_v31 = vld [vmem:[#allocation98_spill] sm:$0xff]  ;;  %v9477_v20 = vld [vmem:[#allocation57_spill] sm:$0xff] }
 0x72c   :  { %5238 = vst.msk [vmem:[%s9183_s14 + $0x70] sm:$0xff] %vm1003_vm0, %v5206_v36  ;;  %v5207_v38 = vadd.f32 %v4641_v9, %v3639_v39  ;;  %v4639_v26 = vsel %vm4607_vm5, %v4591_v42, %v4623_v49  ;;  %v6785_v40 = vpop.f32.mrb[128].mxu1  ;;  %v3644_v47 = vadd.f32 %v9464_v31, %v9463_v1  ;;  %v9466_v39 = vld [vmem:[#allocation41_spill] sm:$0xff]  ;;  %v9479_v31 = vld [vmem:[#allocation54_spill] sm:$0xff] }
 0x72d   :  { %5236 = vst.msk [vmem:[%s9183_s14 + $0x60] sm:$0xff] %vm1003_vm0, %v5204_v61  ;;  %v5205_v35 = vadd.f32 %v4639_v26, %v3637_v25  ;;  %v5130_v8 = vadd.f32 %v6785_v40, %v9037_v17  ;;  %v5041_v63 = vpop.f32.mrb[129].mxu1  ;;  %v3647_v24 = vadd.f32 %v9466_v39, %v9465_v43  ;;  %v9468_v25 = vld [vmem:[#allocation99_spill] sm:$0xff] }
 0x72e   :  { %5239 = vst.msk [vmem:[%s9183_s14 + $0x78] sm:$0xff] %vm1003_vm0, %v5207_v38  ;;  %v5128_v0 = vadd.f32 %v9037_v17, %v5041_v63  ;;  %v6786_v10 = vpop.f32.mrb[130].mxu1  ;;  %v3645_v61 = vadd.f32 %v9468_v25, %v9467_v3  ;;  %v9481_v39 = vld [vmem:[#allocation55_spill] sm:$0xff]  ;;  %v9483_v25 = vld [vmem:[#allocation56_spill] sm:$0xff] }
 0x72f   :  { %5237 = vst.msk [vmem:[%s9183_s14 + $0x68] sm:$0xff] %vm1003_vm0, %v5205_v35  ;;  %vm5146_vm6 = vcmp.gt.f32.partialorder %v5130_v8, 0.0  ;;  %v5162_v46 = vmul.f32 0.01, %v5130_v8  ;;  %v5131_v53 = vadd.f32 %v6786_v10, %v9037_v17  ;;  %v5044_v56 = vpop.f32.mrb[131].mxu1 }
 0x730   :  { %vm5144_vm7 = vcmp.gt.f32.partialorder %v5128_v0, 0.0  ;;  %v5160_v60 = vmul.f32 0.01, %v5128_v0  ;;  %v5129_v2 = vadd.f32 %v9037_v17, %v5044_v56 }
 0x731   :  { %v5178_v14 = vsel %vm5146_vm6, %v5130_v8, %v5162_v46  ;;  %vm5147_vm8 = vcmp.gt.f32.partialorder %v5131_v53, 0.0  ;;  %v5163_v30 = vmul.f32 0.01, %v5131_v53 }
 0x732   :  { %v5210_v15 = vadd.f32 %v5178_v14, %v3642_v19  ;;  %v5176_v41 = vsel %vm5144_vm7, %v5128_v0, %v5160_v60  ;;  %vm5145_vm9 = vcmp.gt.f32.partialorder %v5129_v2, 0.0  ;;  %v5161_v50 = vmul.f32 0.01, %v5129_v2  ;;  %v9470_v19 = vld [vmem:[#allocation46_spill] sm:$0xff] }
 0x733   :  { %v5208_v57 = vadd.f32 %v5176_v41, %v3640_v52  ;;  %v5179_v54 = vsel %vm5147_vm8, %v5131_v53, %v5163_v30  ;;  %v3650_v46 = vadd.f32 %v9470_v19, %v9469_v45  ;;  %v9472_v52 = vld [vmem:[#allocation100_spill] sm:$0xff] }
 0x734   :  { %5242 = vst.msk [vmem:[%s9184_s15 + $0x10] sm:$0xff] %vm1003_vm0, %v5210_v15  ;;  %v5211_v58 = vadd.f32 %v5179_v54, %v3643_v23  ;;  %v5177_v22 = vsel %vm5145_vm9, %v5129_v2, %v5161_v50  ;;  %v6789_v6 = vpop.f32.mrb[132].mxu1  ;;  %v3648_v60 = vadd.f32 %v9472_v52, %v9471_v48  ;;  %v9474_v23 = vld [vmem:[#allocation47_spill] sm:$0xff] }
 0x735   :  { %5240 = vst.msk [vmem:[%s9184_s15] sm:$0xff] %vm1003_vm0, %v5208_v57  ;;  %v5209_v32 = vadd.f32 %v5177_v22, %v3641_v13  ;;  %v5134_v11 = vadd.f32 %v6789_v6, %v9037_v17  ;;  %v5057_v28 = vpop.f32.mrb[133].mxu1  ;;  %v3651_v14 = vadd.f32 %v9474_v23, %v9473_v16  ;;  %v9476_v13 = vld [vmem:[#allocation101_spill] sm:$0xff] }
 0x736   :  { %5243 = vst.msk [vmem:[%s9184_s15 + $0x18] sm:$0xff] %vm1003_vm0, %v5211_v58  ;;  %v5132_v4 = vadd.f32 %v9037_v17, %v5057_v28  ;;  %v6790_v7 = vpop.f32.mrb[134].mxu1  ;;  %v3649_v57 = vadd.f32 %v9476_v13, %v9475_v51 }
 0x737   :  { %5241 = vst.msk [vmem:[%s9184_s15 + $0x8] sm:$0xff] %vm1003_vm0, %v5209_v32  ;;  %vm5150_vm10 = vcmp.gt.f32.partialorder %v5134_v11, 0.0  ;;  %v5166_v59 = vmul.f32 0.01, %v5134_v11  ;;  %v5135_v5 = vadd.f32 %v6790_v7, %v9037_v17  ;;  %v5060_v27 = vpop.f32.mrb[135].mxu1 }
 0x738   :  { %vm5148_vm11 = vcmp.gt.f32.partialorder %v5132_v4, 0.0  ;;  %v5164_v42 = vmul.f32 0.01, %v5132_v4  ;;  %v5133_v34 = vadd.f32 %v9037_v17, %v5060_v27 }
 0x739   :  { %v5182_v21 = vsel %vm5150_vm10, %v5134_v11, %v5166_v59  ;;  %vm5151_vm12 = vcmp.gt.f32.partialorder %v5135_v5, 0.0  ;;  %v5167_v36 = vmul.f32 0.01, %v5135_v5 }
 0x73a   :  { %v5214_v55 = vadd.f32 %v5182_v21, %v3646_v29  ;;  %v5180_v49 = vsel %vm5148_vm11, %v5132_v4, %v5164_v42  ;;  %vm5149_vm13 = vcmp.gt.f32.partialorder %v5133_v34, 0.0  ;;  %v5165_v12 = vmul.f32 0.01, %v5133_v34  ;;  %v9478_v29 = vld [vmem:[#allocation52_spill] sm:$0xff] }
 0x73b   :  { %v5212_v9 = vadd.f32 %v5180_v49, %v3644_v47  ;;  %v5183_v38 = vsel %vm5151_vm12, %v5135_v5, %v5167_v36  ;;  %v3654_v59 = vadd.f32 %v9478_v29, %v9477_v20  ;;  %v9480_v47 = vld [vmem:[#allocation102_spill] sm:$0xff] }
 0x73c   :  { %5246 = vst.msk [vmem:[%s9184_s15 + $0x30] sm:$0xff] %vm1003_vm0, %v5214_v55  ;;  %v5215_v26 = vadd.f32 %v5183_v38, %v3647_v24  ;;  %v5181_v40 = vsel %vm5149_vm13, %v5133_v34, %v5165_v12  ;;  %v6793_v35 = vpop.f32.mrb[136].mxu1  ;;  %v3652_v42 = vadd.f32 %v9480_v47, %v9479_v31  ;;  %v9482_v24 = vld [vmem:[#allocation53_spill] sm:$0xff] }
 0x73d   :  { %5244 = vst.msk [vmem:[%s9184_s15 + $0x20] sm:$0xff] %vm1003_vm0, %v5212_v9  ;;  %v5213_v8 = vadd.f32 %v5181_v40, %v3645_v61  ;;  %v5138_v63 = vadd.f32 %v6793_v35, %v9037_v17  ;;  %v5073_v0 = vpop.f32.mrb[137].mxu1  ;;  %v3655_v21 = vadd.f32 %v9482_v24, %v9481_v39  ;;  %v9484_v61 = vld [vmem:[#allocation103_spill] sm:$0xff] }
 0x73e   :  { %5247 = vst.msk [vmem:[%s9184_s15 + $0x38] sm:$0xff] %vm1003_vm0, %v5215_v26  ;;  %v5136_v10 = vadd.f32 %v9037_v17, %v5073_v0  ;;  %v6794_v62 = vpop.f32.mrb[138].mxu1  ;;  %v3653_v9 = vadd.f32 %v9484_v61, %v9483_v25 }
 0x73f   :  { %5245 = vst.msk [vmem:[%s9184_s15 + $0x28] sm:$0xff] %vm1003_vm0, %v5213_v8  ;;  %vm5154_vm14 = vcmp.gt.f32.partialorder %v5138_v63, 0.0  ;;  %v5170_v53 = vmul.f32 0.01, %v5138_v63  ;;  %v5139_v56 = vadd.f32 %v6794_v62, %v9037_v17  ;;  %v5076_v18 = vpop.f32.mrb[139].mxu1 }
 0x740   :  { %vm5152_vm15 = vcmp.gt.f32.partialorder %v5136_v10, 0.0  ;;  %v5168_v2 = vmul.f32 0.01, %v5136_v10  ;;  %v5137_v44 = vadd.f32 %v9037_v17, %v5076_v18 }
 0x741   :  { %v5186_v30 = vsel %vm5154_vm14, %v5138_v63, %v5170_v53  ;;  %vm5155_vm1 = vcmp.gt.f32.partialorder %v5139_v56, 0.0  ;;  %v5171_v15 = vmul.f32 0.01, %v5139_v56 }
 0x742   :  { %v5218_v41 = vadd.f32 %v5186_v30, %v3650_v46  ;;  %v5184_v50 = vsel %vm5152_vm15, %v5136_v10, %v5168_v2  ;;  %vm5153_vm2 = vcmp.gt.f32.partialorder %v5137_v44, 0.0  ;;  %v5169_v37 = vmul.f32 0.01, %v5137_v44 }
 0x743   :  { %v5216_v54 = vadd.f32 %v5184_v50, %v3648_v60  ;;  %v5187_v58 = vsel %vm5155_vm1, %v5139_v56, %v5171_v15 }
 0x744   :  { %5250 = vst.msk [vmem:[%s9184_s15 + $0x50] sm:$0xff] %vm1003_vm0, %v5218_v41  ;;  %v5219_v22 = vadd.f32 %v5187_v58, %v3651_v14  ;;  %v5185_v6 = vsel %vm5153_vm2, %v5137_v44, %v5169_v37  ;;  %v6797_v32 = vpop.f32.mrb[140].mxu1 }
 0x745   :  { %5248 = vst.msk [vmem:[%s9184_s15 + $0x40] sm:$0xff] %vm1003_vm0, %v5216_v54  ;;  %v5217_v11 = vadd.f32 %v5185_v6, %v3649_v57  ;;  %v5142_v28 = vadd.f32 %v6797_v32, %v9037_v17  ;;  %v5089_v4 = vpop.f32.mrb[141].mxu1 }
 0x746   :  { %5251 = vst.msk [vmem:[%s9184_s15 + $0x58] sm:$0xff] %vm1003_vm0, %v5219_v22  ;;  %v5140_v7 = vadd.f32 %v9037_v17, %v5089_v4  ;;  %v6798_v33 = vpop.f32.mrb[142].mxu1 }
 0x747   :  { %5249 = vst.msk [vmem:[%s9184_s15 + $0x48] sm:$0xff] %vm1003_vm0, %v5217_v11  ;;  %vm5158_vm3 = vcmp.gt.f32.partialorder %v5142_v28, 0.0  ;;  %v5174_v5 = vmul.f32 0.01, %v5142_v28  ;;  %v5143_v27 = vadd.f32 %v6798_v33, %v9037_v17  ;;  %v5092_v1 = vpop.f32.mrb[143].mxu1 }
 0x748   :  { %vm5156_vm4 = vcmp.gt.f32.partialorder %v5140_v7, 0.0  ;;  %v5172_v34 = vmul.f32 0.01, %v5140_v7  ;;  %v5141_v43 = vadd.f32 %v9037_v17, %v5092_v1 }
 0x749   :  { %v5190_v36 = vsel %vm5158_vm3, %v5142_v28, %v5174_v5  ;;  %vm5159_vm5 = vcmp.gt.f32.partialorder %v5143_v27, 0.0  ;;  %v5175_v55 = vmul.f32 0.01, %v5143_v27 }
 0x74a   :  { %v5222_v49 = vadd.f32 %v5190_v36, %v3654_v59  ;;  %v5188_v12 = vsel %vm5156_vm4, %v5140_v7, %v5172_v34  ;;  %vm5157_vm6 = vcmp.gt.f32.partialorder %v5141_v43, 0.0  ;;  %v5173_v3 = vmul.f32 0.01, %v5141_v43 }
 0x74b   :  { %v5220_v38 = vadd.f32 %v5188_v12, %v3652_v42  ;;  %v5191_v26 = vsel %vm5159_vm5, %v5143_v27, %v5175_v55 }
 0x74c   :  { %5254 = vst.msk [vmem:[%s9184_s15 + $0x70] sm:$0xff] %vm1003_vm0, %v5222_v49  ;;  %v5223_v17 = vadd.f32 %v5191_v26, %v3655_v21  ;;  %v5189_v40 = vsel %vm5157_vm6, %v5141_v43, %v5173_v3 }
 0x74d   :  { %5252 = vst.msk [vmem:[%s9184_s15 + $0x60] sm:$0xff] %vm1003_vm0, %v5220_v38  ;;  %v5221_v35 = vadd.f32 %v5189_v40, %v3653_v9 }
 0x74e   :  { %5255 = vst.msk [vmem:[%s9184_s15 + $0x78] sm:$0xff] %vm1003_vm0, %v5223_v17 }
 0x74f   :  { %5253 = vst.msk [vmem:[%s9184_s15 + $0x68] sm:$0xff] %vm1003_vm0, %v5221_v35 }
 0x750   :  { %5264 = vsyncpa [#allocation3], 1 }
 0x751   :  { %5265 = vsyncpa [#allocation5], 1 }
 0x752   :  { %5266 = vsyncpa [#allocation8], 1 }
 0x753   :  { %5267 = vsyncpa [#allocation11], 1 }
 0x754   :  { %5268 = vsyncpa [#allocation14], 1 }

</bundles_post_ra>
